<compile_context>
chip_gen: v5e
topology: v5e:2x2
jax: 0.10.0
libtpu: 0.0.40
codegen_flags: <defaults>
</compile_context>

<pallas_src>
import functools

import jax
import jax.numpy as jnp
from jax import lax
from jax.experimental import pallas as pl
from jax.experimental.pallas import tpu as pltpu


def _round_up(v, m):
    return (v + m - 1) // m * m


@functools.partial(jax.jit, static_argnames=("target_pixels",))
def segmentation_wrapper_forward(x, w1, b1, w2, b2, *, target_pixels=1024):
    """Forward pass of the wrapped segmentation model.

    x:  [B, Cin, H, W] float32 (NCHW, PyTorch convention)
    w1: [3, 3, Cin, HIDDEN] conv3x3 weight (HWIO)   b1: [HIDDEN]
    w2: [HIDDEN, NUM_CLASSES] 1x1 conv weight       b2: [NUM_CLASSES]
    returns: [B, NUM_CLASSES, H, W] float32 logits
    """
    B, Cin, H, W = x.shape
    hidden = w1.shape[-1]
    n_cls = w2.shape[1]

    HP = _round_up(max(hidden, 128), 128)        # lane-padded hidden width
    Wp = W + 2                                   # zero-padded image width
    # Row tile: ~target_pixels output pixels per grid step (>= 8 rows).
    TH = max(1, min(H, max(8, target_pixels // Wp)))
    n_th = -(-H // TH)                           # row tiles per image
    Hp = n_th * TH                               # padded image height
    n_pix = _round_up(TH * Wp, 128)              # lane-dense pixels per tile
    # Rows of the padded image each slab must carry so that every shifted
    # window slab[s : s + n_pix] (s <= 2*Wp + 2) stays in bounds.
    R = -(-(n_pix + 2 * Wp + 2) // Wp)
    rows_total = (n_th - 1) * TH + R
    Q = R * Wp                                   # flattened pixels per slab
    n_slabs = B * n_th

    # ---- wrapper glue (~1x input bytes): NCHW->NHWC, bf16, zero-pad, and
    # ---- gather overlapping row slabs (few halo rows duplicated per tile).
    xh = jnp.transpose(x, (0, 2, 3, 1)).astype(jnp.bfloat16)        # [B,H,W,C]
    xp = jnp.pad(xh, ((0, 0), (1, rows_total - 1 - H), (1, 1), (0, 0)))
    slabs = jnp.stack([xp[:, t * TH:t * TH + R] for t in range(n_th)], axis=1)
    slabs = slabs.reshape(n_slabs, Q, Cin)                          # bf16

    # ---- trace-time weight packing (tiny, stays resident in VMEM).
    w1p = jnp.zeros((9, Cin, HP), jnp.float32)
    w1p = w1p.at[:, :, :hidden].set(w1.reshape(9, Cin, hidden).astype(jnp.float32))
    b1p = jnp.zeros((1, HP), jnp.float32).at[0, :hidden].set(b1.astype(jnp.float32))
    w2t = jnp.zeros((n_cls, HP), jnp.float32)
    w2t = w2t.at[:, :hidden].set(jnp.transpose(w2).astype(jnp.float32))
    b2c = b2.reshape(n_cls, 1).astype(jnp.float32)

    def kernel(slab_ref, w1_ref, b1_ref, w2t_ref, b2_ref, out_ref):
        # Fused: 3x3 conv as 9 shifted matmuls + bias + ReLU + 1x1 conv.
        xs = slab_ref[0].astype(jnp.float32)                   # (Q, Cin)
        acc = None
        for dy in range(3):
            for dx in range(3):
                s = dy * Wp + dx                               # static shift
                lhs = xs[s:s + n_pix, :]                       # (n_pix, Cin)
                part = jnp.dot(lhs, w1_ref[dy * 3 + dx],
                               preferred_element_type=jnp.float32)
                acc = part if acc is None else acc + part      # (n_pix, HP) f32
        h = jnp.maximum(acc + b1_ref[...], 0.0)                # f32 epilogue
        # classes-on-sublanes / pixels-on-lanes -> lane-dense output stores.
        o_t = jnp.dot(w2t_ref[...], h.T,
                      preferred_element_type=jnp.float32)      # (n_cls, n_pix)
        out_ref[0] = o_t + b2_ref[...]

    out = pl.pallas_call(
        kernel,
        out_shape=jax.ShapeDtypeStruct((n_slabs, n_cls, n_pix), jnp.float32),
        grid_spec=pltpu.PrefetchScalarGridSpec(
            num_scalar_prefetch=0,
            grid=(n_slabs,),
            in_specs=[
                pl.BlockSpec((1, Q, Cin), lambda i: (i, 0, 0)),    # streamed
                pl.BlockSpec((9, Cin, HP), lambda i: (0, 0, 0)),   # resident
                pl.BlockSpec((1, HP), lambda i: (0, 0)),
                pl.BlockSpec((n_cls, HP), lambda i: (0, 0)),
                pl.BlockSpec((n_cls, 1), lambda i: (0, 0)),
            ],
            out_specs=pl.BlockSpec((1, n_cls, n_pix), lambda i: (i, 0, 0)),
        ),
        compiler_params=pltpu.CompilerParams(
            dimension_semantics=("parallel",),       # megacore / v7x 2 TCs
            vmem_limit_bytes=32 * 1024 * 1024,       # safe on v5e/v6e/v7x
        ),
    )(slabs, w1p, b1p, w2t, b2c)

    # ---- unpack to NCHW (kept for PyTorch semantics; skip if NHWC is fine).
    out = out[:, :, :TH * Wp].reshape(B, n_th, n_cls, TH, Wp)
    out = jnp.transpose(out, (0, 2, 1, 3, 4)).reshape(B, n_cls, Hp, Wp)
    return out[:, :, :H, :W]


def _reference_forward(x, w1, b1, w2, b2):
    """Pure-JAX (XLA) reference of the same synthetic segmentation head."""
    xh = jnp.transpose(x, (0, 2, 3, 1)).astype(jnp.bfloat16).astype(jnp.float32)
    h = lax.conv_general_dilated(
        xh, w1, window_strides=(1, 1), padding="SAME",
        dimension_numbers=("NHWC", "HWIO", "NHWC"))
    h = jnp.maximum(h + b1, 0.0)
    o = jnp.einsum("bhwk,kc->bhwc", h, w2) + b2
    return jnp.transpose(o, (0, 3, 1, 2))


if __name__ == "__main__":
    # Small shapes consistent with an NCHW segmentation forward pass.
    B, Cin, H, W = 2, 4, 16, 16
    HIDDEN, NUM_CLASSES = 32, 8

    key = jax.random.PRNGKey(0)
    kx, k1, k2, k3, k4 = jax.random.split(key, 5)

    x = jax.random.normal(kx, (B, Cin, H, W), dtype=jnp.float32)
    w1 = 0.1 * jax.random.normal(k1, (3, 3, Cin, HIDDEN), dtype=jnp.float32)
    b1 = 0.1 * jax.random.normal(k2, (HIDDEN,), dtype=jnp.float32)
    w2 = 0.1 * jax.random.normal(k3, (HIDDEN, NUM_CLASSES), dtype=jnp.float32)
    b2 = 0.1 * jax.random.normal(k4, (NUM_CLASSES,), dtype=jnp.float32)

    out = segmentation_wrapper_forward(x, w1, b1, w2, b2)
    out = jax.block_until_ready(out)

    ref = _reference_forward(x, w1, b1, w2, b2)
    assert out.shape == (B, NUM_CLASSES, H, W), out.shape
    max_err = float(jnp.max(jnp.abs(out - ref)))
    # bf16 input cast + MXU default precision in both paths -> small diffs.
    assert max_err < 5e-2, f"mismatch vs reference: max |diff| = {max_err}"

    print("KERNEL_OK")
</pallas_src>

<mosaic_0001>
module attributes {stable_mosaic.version = 11 : i64} {
  func.func @kernel(%arg0: i32, %arg1: memref<1x432x4xbf16, #tpu.memory_space<vmem>>, %arg2: memref<9x4x128xf32, #tpu.memory_space<vmem>>, %arg3: memref<1x128xf32, #tpu.memory_space<vmem>>, %arg4: memref<8x128xf32, #tpu.memory_space<vmem>>, %arg5: memref<8x1xf32, #tpu.memory_space<vmem>>, %arg6: memref<1x8x384xf32, #tpu.memory_space<vmem>>) attributes {dimension_semantics = [#tpu.dimension_semantics<parallel>], iteration_bounds = array<i64: 2>, scalar_prefetch = 0 : i64, scratch_operands = 0 : i64, tpu.core_type = #tpu.core_type<tc>, window_params = [{transform_indices = @transform_0, window_bounds = array<i64: 1, 432, 4>}, {pipeline_mode = #tpu.pipeline_mode<synchronous>, transform_indices = @transform_1, window_bounds = array<i64: 9, 4, 128>}, {pipeline_mode = #tpu.pipeline_mode<synchronous>, transform_indices = @transform_2, window_bounds = array<i64: 1, 128>}, {pipeline_mode = #tpu.pipeline_mode<synchronous>, transform_indices = @transform_3, window_bounds = array<i64: 8, 128>}, {pipeline_mode = #tpu.pipeline_mode<synchronous>, transform_indices = @transform_4, window_bounds = array<i64: 8, 1>}, {transform_indices = @transform_5, window_bounds = array<i64: 1, 8, 384>}]} {
    %c0 = arith.constant 0 : index
    %c0_0 = arith.constant 0 : index
    %c0_1 = arith.constant 0 : index
    %0 = vector.load %arg1[%c0, %c0_0, %c0_1] : memref<1x432x4xbf16, #tpu.memory_space<vmem>>, vector<1x432x4xbf16>
    %1 = vector.shape_cast %0 : vector<1x432x4xbf16> to vector<432x4xbf16>
    %2 = arith.extf %1 : vector<432x4xbf16> to vector<432x4xf32>
    %3 = vector.extract_strided_slice %2 {offsets = [0, 0], sizes = [384, 4], strides = [1, 1]} : vector<432x4xf32> to vector<384x4xf32>
    %c0_2 = arith.constant 0 : index
    %c0_3 = arith.constant 0 : index
    %c0_4 = arith.constant 0 : index
    %4 = vector.load %arg2[%c0_2, %c0_3, %c0_4] : memref<9x4x128xf32, #tpu.memory_space<vmem>>, vector<1x4x128xf32>
    %5 = vector.shape_cast %4 : vector<1x4x128xf32> to vector<4x128xf32>
    %cst = arith.constant dense<0.000000e+00> : vector<384x128xf32>
    %6 = tpu.matmul %3, %5, %cst {dimension_numbers = #tpu.dot_dimension_numbers<[1], [0], [0], [1], [0, 0, 1, 1], [], []>} : vector<384x4xf32>, vector<4x128xf32>, vector<384x128xf32> -> vector<384x128xf32>
    %7 = vector.extract_strided_slice %2 {offsets = [1, 0], sizes = [384, 4], strides = [1, 1]} : vector<432x4xf32> to vector<384x4xf32>
    %c1 = arith.constant 1 : index
    %c0_5 = arith.constant 0 : index
    %c0_6 = arith.constant 0 : index
    %8 = vector.load %arg2[%c1, %c0_5, %c0_6] : memref<9x4x128xf32, #tpu.memory_space<vmem>>, vector<1x4x128xf32>
    %9 = vector.shape_cast %8 : vector<1x4x128xf32> to vector<4x128xf32>
    %cst_7 = arith.constant dense<0.000000e+00> : vector<384x128xf32>
    %10 = tpu.matmul %7, %9, %cst_7 {dimension_numbers = #tpu.dot_dimension_numbers<[1], [0], [0], [1], [0, 0, 1, 1], [], []>} : vector<384x4xf32>, vector<4x128xf32>, vector<384x128xf32> -> vector<384x128xf32>
    %11 = arith.addf %6, %10 : vector<384x128xf32>
    %12 = vector.extract_strided_slice %2 {offsets = [2, 0], sizes = [384, 4], strides = [1, 1]} : vector<432x4xf32> to vector<384x4xf32>
    %c2 = arith.constant 2 : index
    %c0_8 = arith.constant 0 : index
    %c0_9 = arith.constant 0 : index
    %13 = vector.load %arg2[%c2, %c0_8, %c0_9] : memref<9x4x128xf32, #tpu.memory_space<vmem>>, vector<1x4x128xf32>
    %14 = vector.shape_cast %13 : vector<1x4x128xf32> to vector<4x128xf32>
    %cst_10 = arith.constant dense<0.000000e+00> : vector<384x128xf32>
    %15 = tpu.matmul %12, %14, %cst_10 {dimension_numbers = #tpu.dot_dimension_numbers<[1], [0], [0], [1], [0, 0, 1, 1], [], []>} : vector<384x4xf32>, vector<4x128xf32>, vector<384x128xf32> -> vector<384x128xf32>
    %16 = arith.addf %11, %15 : vector<384x128xf32>
    %17 = vector.extract_strided_slice %2 {offsets = [18, 0], sizes = [384, 4], strides = [1, 1]} : vector<432x4xf32> to vector<384x4xf32>
    %c3 = arith.constant 3 : index
    %c0_11 = arith.constant 0 : index
    %c0_12 = arith.constant 0 : index
    %18 = vector.load %arg2[%c3, %c0_11, %c0_12] : memref<9x4x128xf32, #tpu.memory_space<vmem>>, vector<1x4x128xf32>
    %19 = vector.shape_cast %18 : vector<1x4x128xf32> to vector<4x128xf32>
    %cst_13 = arith.constant dense<0.000000e+00> : vector<384x128xf32>
    %20 = tpu.matmul %17, %19, %cst_13 {dimension_numbers = #tpu.dot_dimension_numbers<[1], [0], [0], [1], [0, 0, 1, 1], [], []>} : vector<384x4xf32>, vector<4x128xf32>, vector<384x128xf32> -> vector<384x128xf32>
    %21 = arith.addf %16, %20 : vector<384x128xf32>
    %22 = vector.extract_strided_slice %2 {offsets = [19, 0], sizes = [384, 4], strides = [1, 1]} : vector<432x4xf32> to vector<384x4xf32>
    %c4 = arith.constant 4 : index
    %c0_14 = arith.constant 0 : index
    %c0_15 = arith.constant 0 : index
    %23 = vector.load %arg2[%c4, %c0_14, %c0_15] : memref<9x4x128xf32, #tpu.memory_space<vmem>>, vector<1x4x128xf32>
    %24 = vector.shape_cast %23 : vector<1x4x128xf32> to vector<4x128xf32>
    %cst_16 = arith.constant dense<0.000000e+00> : vector<384x128xf32>
    %25 = tpu.matmul %22, %24, %cst_16 {dimension_numbers = #tpu.dot_dimension_numbers<[1], [0], [0], [1], [0, 0, 1, 1], [], []>} : vector<384x4xf32>, vector<4x128xf32>, vector<384x128xf32> -> vector<384x128xf32>
    %26 = arith.addf %21, %25 : vector<384x128xf32>
    %27 = vector.extract_strided_slice %2 {offsets = [20, 0], sizes = [384, 4], strides = [1, 1]} : vector<432x4xf32> to vector<384x4xf32>
    %c5 = arith.constant 5 : index
    %c0_17 = arith.constant 0 : index
    %c0_18 = arith.constant 0 : index
    %28 = vector.load %arg2[%c5, %c0_17, %c0_18] : memref<9x4x128xf32, #tpu.memory_space<vmem>>, vector<1x4x128xf32>
    %29 = vector.shape_cast %28 : vector<1x4x128xf32> to vector<4x128xf32>
    %cst_19 = arith.constant dense<0.000000e+00> : vector<384x128xf32>
    %30 = tpu.matmul %27, %29, %cst_19 {dimension_numbers = #tpu.dot_dimension_numbers<[1], [0], [0], [1], [0, 0, 1, 1], [], []>} : vector<384x4xf32>, vector<4x128xf32>, vector<384x128xf32> -> vector<384x128xf32>
    %31 = arith.addf %26, %30 : vector<384x128xf32>
    %32 = vector.extract_strided_slice %2 {offsets = [36, 0], sizes = [384, 4], strides = [1, 1]} : vector<432x4xf32> to vector<384x4xf32>
    %c6 = arith.constant 6 : index
    %c0_20 = arith.constant 0 : index
    %c0_21 = arith.constant 0 : index
    %33 = vector.load %arg2[%c6, %c0_20, %c0_21] : memref<9x4x128xf32, #tpu.memory_space<vmem>>, vector<1x4x128xf32>
    %34 = vector.shape_cast %33 : vector<1x4x128xf32> to vector<4x128xf32>
    %cst_22 = arith.constant dense<0.000000e+00> : vector<384x128xf32>
    %35 = tpu.matmul %32, %34, %cst_22 {dimension_numbers = #tpu.dot_dimension_numbers<[1], [0], [0], [1], [0, 0, 1, 1], [], []>} : vector<384x4xf32>, vector<4x128xf32>, vector<384x128xf32> -> vector<384x128xf32>
    %36 = arith.addf %31, %35 : vector<384x128xf32>
    %37 = vector.extract_strided_slice %2 {offsets = [37, 0], sizes = [384, 4], strides = [1, 1]} : vector<432x4xf32> to vector<384x4xf32>
    %c7 = arith.constant 7 : index
    %c0_23 = arith.constant 0 : index
    %c0_24 = arith.constant 0 : index
    %38 = vector.load %arg2[%c7, %c0_23, %c0_24] : memref<9x4x128xf32, #tpu.memory_space<vmem>>, vector<1x4x128xf32>
    %39 = vector.shape_cast %38 : vector<1x4x128xf32> to vector<4x128xf32>
    %cst_25 = arith.constant dense<0.000000e+00> : vector<384x128xf32>
    %40 = tpu.matmul %37, %39, %cst_25 {dimension_numbers = #tpu.dot_dimension_numbers<[1], [0], [0], [1], [0, 0, 1, 1], [], []>} : vector<384x4xf32>, vector<4x128xf32>, vector<384x128xf32> -> vector<384x128xf32>
    %41 = arith.addf %36, %40 : vector<384x128xf32>
    %42 = vector.extract_strided_slice %2 {offsets = [38, 0], sizes = [384, 4], strides = [1, 1]} : vector<432x4xf32> to vector<384x4xf32>
    %c8 = arith.constant 8 : index
    %c0_26 = arith.constant 0 : index
    %c0_27 = arith.constant 0 : index
    %43 = vector.load %arg2[%c8, %c0_26, %c0_27] : memref<9x4x128xf32, #tpu.memory_space<vmem>>, vector<1x4x128xf32>
    %44 = vector.shape_cast %43 : vector<1x4x128xf32> to vector<4x128xf32>
    %cst_28 = arith.constant dense<0.000000e+00> : vector<384x128xf32>
    %45 = tpu.matmul %42, %44, %cst_28 {dimension_numbers = #tpu.dot_dimension_numbers<[1], [0], [0], [1], [0, 0, 1, 1], [], []>} : vector<384x4xf32>, vector<4x128xf32>, vector<384x128xf32> -> vector<384x128xf32>
    %46 = arith.addf %41, %45 : vector<384x128xf32>
    %c0_29 = arith.constant 0 : index
    %c0_30 = arith.constant 0 : index
    %47 = vector.load %arg3[%c0_29, %c0_30] : memref<1x128xf32, #tpu.memory_space<vmem>>, vector<1x128xf32>
    %48 = vector.broadcast %47 : vector<1x128xf32> to vector<384x128xf32>
    %49 = arith.addf %46, %48 : vector<384x128xf32>
    %cst_31 = arith.constant 0.000000e+00 : f32
    %50 = vector.broadcast %cst_31 : f32 to vector<384x128xf32>
    %51 = arith.maximumf %49, %50 : vector<384x128xf32>
    %c0_32 = arith.constant 0 : index
    %c0_33 = arith.constant 0 : index
    %52 = vector.load %arg4[%c0_32, %c0_33] : memref<8x128xf32, #tpu.memory_space<vmem>>, vector<8x128xf32>
    %53 = tpu.transpose %51, [1, 0] : vector<384x128xf32> -> vector<128x384xf32>
    %cst_34 = arith.constant dense<0.000000e+00> : vector<8x384xf32>
    %54 = tpu.matmul %52, %53, %cst_34 {dimension_numbers = #tpu.dot_dimension_numbers<[1], [0], [0], [1], [0, 0, 1, 1], [], []>} : vector<8x128xf32>, vector<128x384xf32>, vector<8x384xf32> -> vector<8x384xf32>
    %c0_35 = arith.constant 0 : index
    %c0_36 = arith.constant 0 : index
    %55 = vector.load %arg5[%c0_35, %c0_36] : memref<8x1xf32, #tpu.memory_space<vmem>>, vector<8x1xf32>
    %56 = vector.broadcast %55 : vector<8x1xf32> to vector<8x384xf32>
    %57 = arith.addf %54, %56 : vector<8x384xf32>
    %c0_37 = arith.constant 0 : index
    %c0_38 = arith.constant 0 : index
    %c0_39 = arith.constant 0 : index
    %58 = vector.load %arg6[%c0_37, %c0_38, %c0_39] : memref<1x8x384xf32, #tpu.memory_space<vmem>>, vector<1x8x384xf32>
    %59 = vector.shape_cast %58 : vector<1x8x384xf32> to vector<8x384xf32>
    %60 = vector.shape_cast %57 : vector<8x384xf32> to vector<1x8x384xf32>
    tpu.vector_store %arg6[%c0_37, %c0_38, %c0_39], %60 {strides = array<i32>} : memref<1x8x384xf32, #tpu.memory_space<vmem>>, vector<1x8x384xf32>,
    return
  }
  func.func @transform_0(%arg0: i32) -> (i32, i32, i32) {
    %c0_i32 = arith.constant 0 : i32
    %c0_i32_0 = arith.constant 0 : i32
    %c0_i32_1 = arith.constant 0 : i32
    return %arg0, %c0_i32, %c0_i32_0 : i32, i32, i32
  }
  func.func @transform_1(%arg0: i32) -> (i32, i32, i32) {
    %c0_i32 = arith.constant 0 : i32
    %c0_i32_0 = arith.constant 0 : i32
    %c0_i32_1 = arith.constant 0 : i32
    %c0_i32_2 = arith.constant 0 : i32
    return %c0_i32, %c0_i32_0, %c0_i32_1 : i32, i32, i32
  }
  func.func @transform_2(%arg0: i32) -> (i32, i32) {
    %c0_i32 = arith.constant 0 : i32
    %c0_i32_0 = arith.constant 0 : i32
    %c0_i32_1 = arith.constant 0 : i32
    return %c0_i32, %c0_i32_0 : i32, i32
  }
  func.func @transform_3(%arg0: i32) -> (i32, i32) {
    %c0_i32 = arith.constant 0 : i32
    %c0_i32_0 = arith.constant 0 : i32
    %c0_i32_1 = arith.constant 0 : i32
    return %c0_i32, %c0_i32_0 : i32, i32
  }
  func.func @transform_4(%arg0: i32) -> (i32, i32) {
    %c0_i32 = arith.constant 0 : i32
    %c0_i32_0 = arith.constant 0 : i32
    %c0_i32_1 = arith.constant 0 : i32
    return %c0_i32, %c0_i32_0 : i32, i32
  }
  func.func @transform_5(%arg0: i32) -> (i32, i32, i32) {
    %c0_i32 = arith.constant 0 : i32
    %c0_i32_0 = arith.constant 0 : i32
    %c0_i32_1 = arith.constant 0 : i32
    return %arg0, %c0_i32, %c0_i32_0 : i32, i32, i32
  }
}

</mosaic_0001>

<bundles_post_ra>
// kernel: segmentation_wrapper_forward.1
= control target key start
LH: loop header
LB: loop body
LE: loop exit
PB: predicated region body
PF: predicated region fallthrough
CT: control target
= control target key end

     0   :  { %s4360_s18 = smov 0   ;;  %s6135_s0 = inlined_call_operand.vmem [shape: bf16[2,432,4], index: 0, kind: input, shape index: {}]   ;;  %s6136_s1 = inlined_call_operand.vmem [shape: f32[9,4,128], index: 1, kind: input, shape index: {}]   ;;  %s6137_s2 = inlined_call_operand.vmem [shape: f32[1,128], index: 2, kind: input, shape index: {}]   ;;  %s6138_s3 = inlined_call_operand.vmem [shape: f32[8,128], index: 3, kind: input, shape index: {}]   ;;  %s6139_s4 = inlined_call_operand.vmem [shape: f32[8,1], index: 4, kind: input, shape index: {}]   ;;  %s6140_s5 = inlined_call_operand.vmem [shape: f32[2,8,384], index: 5, kind: output, shape index: {}]  }
   0x1 LB: > { %s3715_s19 = sadd.s32 4294967295, %s4327_s18   ;;  %p3719_p0 = scmp.ge.s32.totalorder %s4327_s18, 1  ;;  %s4327_s18 = sphi %s4360_s18, %s15_s18  }
   0x2   : > { %p187_p1 = scmp.lt.s32.totalorder %s4327_s18, 3 }
   0x4   : > { %p188_p2 = pnand %p3719_p0, %p187_p1 }
   0x6   : > { %191 = sbr.rel (%p188_p2) target bundleno = 1220 (0x4c4), region = 40 }
   0xb   : > { %v3722_v0 = vld [vmem:[%s6136_s1 + $0x4] sm:$0xf]  ;;  %vm578_vm0 = vcmask 1043456   ;;  %p215_p3 = scmp.lt.s32.totalorder %s3715_s19, 1  ;;  %vm383_vm1 = vcmask 1046528   ;;  %vm481_vm2 = vcmask 31744  }
   0xc   : > { %4302 = vmatpush.msk.msra.mxu1 %vm578_vm0, %v3722_v0  ;;  %4303 = vmatpush.msk.msra.mxu2 %vm578_vm0, %v3722_v0  ;;  %vm1005_vm3 = vcmask 1045504   ;;  %vm1637_vm4 = vcmask 1044480   ;;  %vm2676_vm5 = vcmask 1042432   ;;  %vm3084_vm6 = vcmask 1041408  }
   0xd   : > { %s6376_s19 = smov (!%p215_p3, %s3715_s19), 1  ;;  %3723 = vmatpush.msk.msra.mxu0 %vm578_vm0, %v3722_v0  ;;  %4304 = vmatpush.msk.msra.mxu3 %vm578_vm0, %v3722_v0 }
   0xe   : > { %s4305_s22 = smul.u32 216, %s6376_s19 }
   0xf   : > { %s4306_s27 = smul.u32 24, %s6376_s19 }
  0x10   : > { %s4381_s25 = scalar_lea.vmem %s6135_s0, %s4305_s22 }
  0x11   : > { %v4384_v1 = vld [vmem:[%s4381_s25 + $0x30] sm:$0xff]   ;;  %v4283_v2 = vld [vmem:[%s4381_s25 + $0x38] sm:$0xff]   ;;  %v4388_v3 = vld [vmem:[%s4381_s25 + $0x60] sm:$0xff]   ;;  %s224_s30 = scalar_lea.vmem %s6140_s5, %s4306_s27 }
  0x12   : > { %v4391_v4 = vunpack.c.h.bf16 %v4384_v1  ;;  %v4393_v5 = vunpack.c.l.bf16 %v4283_v2  ;;  %v4396_v6 = vunpack.c.h.bf16 %v4388_v3  ;;  %v4289_v7 = vld [vmem:[%s4381_s25 + $0x68] sm:$0xff]   ;;  %v4174_v8 = vld [vmem:[%s4381_s25] sm:$0xff]   ;;  %v4406_v12 = vunpack.c.h.bf16 %v4283_v2  ;;  %v4410_v14 = vld [vmem:[%s4381_s25 + $0x90] sm:$0xff]  }
  0x13   : > { %v4400_v9 = vunpack.c.l.bf16 %v4289_v7  ;;  %v4402_v10 = vunpack.c.l.bf16 %v4174_v8  ;;  %v4404_v11 = vunpack.c.h.bf16 %v4174_v8  ;;  %v4277_v13 = vld [vmem:[%s4381_s25 + $0x8] sm:$0xff]   ;;  %v4415_v18 = vunpack.c.h.bf16 %v4289_v7  ;;  %v4295_v19 = vld [vmem:[%s4381_s25 + $0x98] sm:$0xff]   ;;  %v4284_v34 = vld [vmem:[%s4381_s25 + $0x40] sm:$0xff]  }
  0x14   : > { %6204 = vst [vmem:[#allocation2_spill] sm:$0xff] %v4391_v4  ;;  %v6141_v15 = vrot.slane %v4391_v4, 1  ;;  %v411_v16 = vrot.slane %v4393_v5, 1  ;;  %v6143_v17 = vrot.slane %v4396_v6, 1  ;;  %v4424_v24 = vunpack.c.l.bf16 %v4277_v13  ;;  %v4290_v36 = vld [vmem:[%s4381_s25 + $0x70] sm:$0xff]   ;;  %v4296_v45 = vld [vmem:[%s4381_s25 + $0xa0] sm:$0xff]  }
  0x15   : > { %6205 = vst [vmem:[#allocation3_spill] sm:$0xff] %v4393_v5  ;;  %v435_v20 = vrot.slane %v4400_v9, 1  ;;  %v384_v21 = vrot.slane %v4402_v10, 1  ;;  %v385_v22 = vrot.slane %v4404_v11, 1  ;;  %v4427_v25 = vunpack.c.h.bf16 %v4410_v14  ;;  %v4278_v51 = vld [vmem:[%s4381_s25 + $0x10] sm:$0xff]   ;;  %v4285_v63 = vld [vmem:[%s4381_s25 + $0x48] sm:$0xff]  }
  0x16   : > { %6206 = vst [vmem:[#allocation4_spill] sm:$0xff] %v4406_v12  ;;  %v412_v23 = vsel %vm383_vm1, %v6141_v15, %v411_v16  ;;  %v4434_v28 = vunpack.c.l.bf16 %v4295_v19  ;;  %v413_v29 = vrot.slane %v4406_v12, 1  ;;  %v437_v30 = vrot.slane %v4415_v18, 1  ;;  %v4291_v2 = vld [vmem:[%s4381_s25 + $0x78] sm:$0xff]  }
  0x17   : > { %6207 = vst [vmem:[#allocation5_spill] sm:$0xff] %v4424_v24  ;;  %3737 = vmatmul.msk.f32.vlgmr.msra.gmra.mxu1 %vm481_vm2, %v412_v23  ;;  %v436_v26 = vsel %vm383_vm1, %v6143_v17, %v435_v20  ;;  %v386_v27 = vsel %vm383_vm1, %v384_v21, %v385_v22  ;;  %v6142_v31 = vrot.slane %v4427_v25, 1  ;;  %v387_v32 = vrot.slane %v4424_v24, 1 }
  0x18   : > { %3749 = vmatmul.msk.f32.vlgmr.msra.gmra.mxu2 %vm481_vm2, %v436_v26  ;;  %3724 = vmatmul.msk.f32.vlgmr.msra.gmra.mxu0 %vm481_vm2, %v386_v27  ;;  %v459_v33 = vrot.slane %v4434_v28, 1  ;;  %v4444_v35 = vunpack.c.h.bf16 %v4295_v19  ;;  %v414_v38 = vsel %vm383_vm1, %v411_v16, %v413_v29  ;;  %v438_v39 = vsel %vm383_vm1, %v435_v20, %v437_v30 }
  0x19   : > { %v4453_v40 = vunpack.c.l.bf16 %v4284_v34  ;;  %v388_v41 = vsel %vm383_vm1, %v385_v22, %v387_v32  ;;  %v4456_v42 = vunpack.c.l.bf16 %v4290_v36  ;;  %v4458_v43 = vunpack.c.h.bf16 %v4277_v13  ;;  %v4297_v22 = vld [vmem:[%s4381_s25 + $0xa8] sm:$0xff]  }
  0x1a   : > { %6208 = vst [vmem:[#allocation6_spill] sm:$0xff] %v4444_v35  ;;  %v460_v37 = vsel %vm383_vm1, %v6142_v31, %v459_v33  ;;  %v461_v44 = vrot.slane %v4444_v35, 1  ;;  %v4469_v50 = vunpack.c.l.bf16 %v4296_v45  ;;  %v4474_v53 = vunpack.c.h.bf16 %v4284_v34 }
  0x1b   : > { %3761 = vmatmul.msk.f32.vlgmr.msra.gmra.mxu3 %vm481_vm2, %v460_v37  ;;  %6209 = vst [vmem:[#allocation7_spill] sm:$0xff] %v4453_v40  ;;  %v415_v46 = vrot.slane %v4453_v40, 1  ;;  %v439_v47 = vrot.slane %v4456_v42, 1  ;;  %v389_v48 = vrot.slane %v4458_v43, 1  ;;  %v4476_v54 = vunpack.c.h.bf16 %v4290_v36 }
  0x1c   : > { %6210 = vst [vmem:[#allocation8_spill] sm:$0xff] %v4458_v43  ;;  %v462_v49 = vsel %vm383_vm1, %v459_v33, %v461_v44  ;;  %v4480_v57 = vunpack.c.l.bf16 %v4278_v51  ;;  %v463_v58 = vrot.slane %v4469_v50, 1  ;;  %v417_v59 = vrot.slane %v4474_v53, 1 }
  0x1d   : > { %6211 = vst [vmem:[#allocation9_spill] sm:$0xff] %v4469_v50  ;;  %v416_v52 = vsel %vm383_vm1, %v413_v29, %v415_v46  ;;  %v440_v55 = vsel %vm383_vm1, %v437_v30, %v439_v47  ;;  %v390_v56 = vsel %vm383_vm1, %v387_v32, %v389_v48  ;;  %v441_v60 = vrot.slane %v4476_v54, 1  ;;  %v4279_v32 = vld [vmem:[%s4381_s25 + $0x18] sm:$0xff]  }
  0x1e   : > { %6212 = vst [vmem:[#allocation10_spill] sm:$0xff] %v4480_v57  ;;  %v391_v61 = vrot.slane %v4480_v57, 1  ;;  %v464_v62 = vsel %vm383_vm1, %v461_v44, %v463_v58  ;;  %v4491_v0 = vunpack.c.h.bf16 %v4296_v45  ;;  %v418_v7 = vsel %vm383_vm1, %v415_v46, %v417_v59 }
  0x1f   : > { %3738 = vmatmul.msk.f32.gmra.mxu1 %vm481_vm2, %v414_v38  ;;  %v442_v8 = vsel %vm383_vm1, %v439_v47, %v441_v60  ;;  %v4497_v13 = vunpack.c.l.bf16 %v4285_v63  ;;  %v4500_v19 = vunpack.c.l.bf16 %v4291_v2  ;;  %v4502_v20 = vunpack.c.h.bf16 %v4278_v51  ;;  %v4292_v51 = vld [vmem:[%s4381_s25 + $0x80] sm:$0xff]  }
  0x20   : > { %3750 = vmatmul.msk.f32.gmra.mxu2 %vm481_vm2, %v438_v39  ;;  %3725 = vmatmul.msk.f32.gmra.mxu0 %vm481_vm2, %v388_v41  ;;  %6213 = vst [vmem:[#allocation11_spill] sm:$0xff] %v4491_v0  ;;  %v392_v16 = vsel %vm383_vm1, %v389_v48, %v391_v61  ;;  %v465_v21 = vrot.slane %v4491_v0, 1  ;;  %v4513_v30 = vunpack.c.l.bf16 %v4297_v22  ;;  %v4518_v34 = vunpack.c.h.bf16 %v4285_v63  ;;  %v4286_v48 = vld [vmem:[%s4381_s25 + $0x50] sm:$0xff]  }
  0x21   : > { %6214 = vst [vmem:[#allocation12_spill] sm:$0xff] %v4502_v20  ;;  %v419_v23 = vrot.slane %v4497_v13, 1  ;;  %v443_v26 = vrot.slane %v4500_v19, 1  ;;  %v393_v27 = vrot.slane %v4502_v20, 1  ;;  %v4520_v36 = vunpack.c.h.bf16 %v4291_v2 }
  0x22   : > { %v466_v29 = vsel %vm383_vm1, %v463_v58, %v465_v21  ;;  %6215 = vst [vmem:[#allocation13_spill] sm:$0xff] %v4513_v30  ;;  %v4524_v39 = vunpack.c.l.bf16 %v4279_v32  ;;  %v467_v41 = vrot.slane %v4513_v30, 1  ;;  %v421_v44 = vrot.slane %v4518_v34, 1 }
  0x23   : > { %3762 = vmatmul.msk.f32.gmra.mxu3 %vm481_vm2, %v462_v49  ;;  %v420_v33 = vsel %vm383_vm1, %v417_v59, %v419_v23  ;;  %v444_v37 = vsel %vm383_vm1, %v441_v60, %v443_v26  ;;  %v394_v38 = vsel %vm383_vm1, %v391_v61, %v393_v27  ;;  %v445_v45 = vrot.slane %v4520_v36, 1 }
  0x24   : > { %6216 = vst [vmem:[#allocation14_spill] sm:$0xff] %v4524_v39  ;;  %v395_v46 = vrot.slane %v4524_v39, 1  ;;  %v468_v47 = vsel %vm383_vm1, %v465_v21, %v467_v41  ;;  %v4535_v49 = vunpack.c.h.bf16 %v4297_v22  ;;  %v4544_v59 = vunpack.c.l.bf16 %v4292_v51  ;;  %v4280_v21 = vld [vmem:[%s4381_s25 + $0x20] sm:$0xff]  }
  0x25   : > { %v4546_v60 = vunpack.c.h.bf16 %v4279_v32  ;;  %v4568_v32 = vunpack.c.l.bf16 %v4280_v21 }
  0x26   : > { %6217 = vst [vmem:[#allocation15_spill] sm:$0xff] %v4535_v49  ;;  %v396_v58 = vsel %vm383_vm1, %v393_v27, %v395_v46  ;;  %v469_v61 = vrot.slane %v4535_v49, 1  ;;  %v447_v2 = vrot.slane %v4544_v59, 1 }
  0x27   : > { %3739 = vmatmul.msk.f32.gmra.mxu1 %vm481_vm2, %v416_v52  ;;  %v422_v52 = vsel %vm383_vm1, %v419_v23, %v421_v44  ;;  %6218 = vst [vmem:[#allocation16_spill] sm:$0xff] %v4546_v60  ;;  %v4562_v23 = vunpack.c.h.bf16 %v4286_v48 }
  0x28   : > { %3751 = vmatmul.msk.f32.gmra.mxu2 %vm481_vm2, %v440_v55  ;;  %3726 = vmatmul.msk.f32.gmra.mxu0 %vm481_vm2, %v390_v56  ;;  %v446_v55 = vsel %vm383_vm1, %v443_v26, %v445_v45  ;;  %v4541_v56 = vunpack.c.l.bf16 %v4286_v48  ;;  %v4564_v26 = vunpack.c.h.bf16 %v4292_v51  ;;  %v448_v27 = vsel %vm383_vm1, %v445_v45, %v447_v2  ;;  %6220 = vst [vmem:[#allocation18_spill] sm:$0xff] %v4568_v32  ;;  %v4287_v45 = vld [vmem:[%s4381_s25 + $0x58] sm:$0xff]  }
  0x2a   : > { %v423_v63 = vrot.slane %v4541_v56, 1 }
  0x2b   : > { %3763 = vmatmul.msk.f32.gmra.mxu3 %vm481_vm2, %v464_v62  ;;  %v4298_v62 = vld [vmem:[%s4381_s25 + $0xb0] sm:$0xff]  }
  0x2c   : > { %v424_v22 = vsel %vm383_vm1, %v421_v44, %v423_v63 }
  0x2f   : > { %3740 = vmatmul.msk.f32.gmra.mxu1 %vm481_vm2, %v418_v7  ;;  %v397_v7 = vrot.slane %v4546_v60, 1 }
  0x30   : > { %3752 = vmatmul.msk.f32.gmra.mxu2 %vm481_vm2, %v442_v8  ;;  %3727 = vmatmul.msk.f32.gmra.mxu0 %vm481_vm2, %v392_v16  ;;  %v470_v8 = vsel %vm383_vm1, %v467_v41, %v469_v61  ;;  %v4557_v16 = vunpack.c.l.bf16 %v4298_v62  ;;  %v399_v41 = vrot.slane %v4568_v32, 1 }
  0x32   : > { %6219 = vst [vmem:[#allocation17_spill] sm:$0xff] %v4557_v16 }
  0x33   : > { %3764 = vmatmul.msk.f32.gmra.mxu3 %vm481_vm2, %v466_v29  ;;  %v398_v29 = vsel %vm383_vm1, %v395_v46, %v397_v7  ;;  %v4579_v46 = vunpack.c.h.bf16 %v4298_v62  ;;  %v4299_v62 = vld [vmem:[%s4381_s25 + $0xb8] sm:$0xff]  }
  0x35   : > { %6221 = vst [vmem:[#allocation19_spill] sm:$0xff] %v4579_v46 }
  0x37   : > { %3741 = vmatmul.msk.f32.gmra.mxu1 %vm481_vm2, %v420_v33  ;;  %v471_v33 = vrot.slane %v4557_v16, 1 }
  0x38   : > { %3753 = vmatmul.msk.f32.gmra.mxu2 %vm481_vm2, %v444_v37  ;;  %3728 = vmatmul.msk.f32.gmra.mxu0 %vm481_vm2, %v394_v38  ;;  %v425_v37 = vrot.slane %v4562_v23, 1  ;;  %v449_v38 = vrot.slane %v4564_v26, 1 }
  0x39   : > { %v472_v44 = vsel %vm383_vm1, %v469_v61, %v471_v33  ;;  %v473_v61 = vrot.slane %v4579_v46, 1 }
  0x3a   : > { %v426_v48 = vsel %vm383_vm1, %v423_v63, %v425_v37  ;;  %v450_v51 = vsel %vm383_vm1, %v447_v2, %v449_v38  ;;  %v331_v2 = vld [vmem:[%s6136_s1] sm:$0xf] }
  0x3b   : > { %3765 = vmatmul.msk.f32.gmra.mxu3 %vm481_vm2, %v468_v47  ;;  %v4293_v47 = vld [vmem:[%s4381_s25 + $0x88] sm:$0xff]   ;;  %3772 = vmatpush.msk.msrb.mxu1 %vm578_vm0, %v331_v2  ;;  %v4633_v2 = vunpack.c.h.bf16 %v4299_v62 }
  0x3d   : > { %6225 = vst [vmem:[#allocation23_spill] sm:$0xff] %v4633_v2 }
  0x3f   : > { %3742 = vmatmul.msk.f32.gmra.mxu1 %vm481_vm2, %v422_v52  ;;  %v4585_v52 = vunpack.c.l.bf16 %v4287_v45 }
  0x40   : > { %3754 = vmatmul.msk.f32.gmra.mxu2 %vm481_vm2, %v446_v55  ;;  %3729 = vmatmul.msk.f32.gmra.mxu0 %vm481_vm2, %v396_v58  ;;  %v400_v55 = vsel %vm383_vm1, %v397_v7, %v399_v41  ;;  %v4588_v58 = vunpack.c.l.bf16 %v4293_v47  ;;  %v3821_v7 = vld [vmem:[%s6136_s1 + $0x8] sm:$0xf] }
  0x41   : > { %v427_v63 = vrot.slane %v4585_v52, 1  ;;  %3822 = vmatpush.msk.msrb.mxu2 %vm578_vm0, %v3821_v7  ;;  %v4640_v7 = vunpack.c.l.bf16 %v4388_v3  ;;  %v3921_v3 = vld [vmem:[%s6136_s1 + $0x10] sm:$0xf] }
  0x42   : > { %3922 = vmatpush.msk.msrb.mxu0 %vm578_vm0, %v3921_v3 }
  0x43   : > { %3766 = vmatmul.msk.f32.gmra.mxu3 %vm481_vm2, %v470_v8  ;;  %v4590_v8 = vunpack.c.h.bf16 %v4280_v21  ;;  %v451_v21 = vrot.slane %v4588_v58, 1 }
  0x45   : > { %6222 = vst [vmem:[#allocation20_spill] sm:$0xff] %v4590_v8  ;;  %v452_v15 = vsel %vm383_vm1, %v449_v38, %v451_v21  ;;  %v3871_v38 = vld [vmem:[%s6136_s1 + $0xc] sm:$0xf] }
  0x46   : > { %3872 = vmatpush.msk.msrb.mxu3 %vm578_vm0, %v3871_v38 }
  0x47   : > { %3743 = vmatmul.msk.f32.gmra.mxu1 %vm481_vm2, %v424_v22  ;;  %v401_v22 = vrot.slane %v4590_v8, 1 }
  0x48   : > { %3755 = vmatmul.msk.f32.gmra.mxu2 %vm481_vm2, %v448_v27  ;;  %3730 = vmatmul.msk.f32.gmra.mxu0 %vm481_vm2, %v398_v29  ;;  %v474_v27 = vsel %vm383_vm1, %v471_v33, %v473_v61  ;;  %v4607_v29 = vunpack.c.l.bf16 %v4299_v62  ;;  %v4300_v62 = vld [vmem:[%s4381_s25 + $0xc0] sm:$0xff]  }
  0x49   : > { %v402_v31 = vsel %vm383_vm1, %v399_v41, %v401_v22 }
  0x4a   : > { %6223 = vst [vmem:[#allocation21_spill] sm:$0xff] %v4607_v29  ;;  %v475_v17 = vrot.slane %v4607_v29, 1 }
  0x4b   : > { %3767 = vmatmul.msk.f32.gmra.mxu3 %vm481_vm2, %v472_v44  ;;  %v4281_v44 = vld [vmem:[%s4381_s25 + $0x28] sm:$0xff]  }
  0x4c   : > { %v4620_v33 = vunpack.c.l.bf16 %v4281_v44  ;;  %v4646_v29 = vunpack.c.h.bf16 %v4281_v44  ;;  %v4660_v44 = vunpack.c.l.bf16 %v4300_v62  ;;  %v6229_v62 = vrot.slane %v4396_v6, 1 }
  0x4e   : > { %6224 = vst [vmem:[#allocation22_spill] sm:$0xff] %v4620_v33  ;;  %v403_v41 = vrot.slane %v4620_v33, 1 }
  0x4f   : > { %3744 = vmatmul.msk.f32.gmra.mxu1 %vm481_vm2, %v426_v48  ;;  %v428_v48 = vsel %vm383_vm1, %v425_v37, %v427_v63  ;;  %6226 = vst [vmem:[#allocation24_spill] sm:$0xff] %v4646_v29 }
  0x50   : > { %3756 = vmatmul.msk.f32.gmra.mxu2 %vm481_vm2, %v450_v51  ;;  %3731 = vmatmul.msk.f32.gmra.mxu0 %vm481_vm2, %v400_v55  ;;  %v4614_v51 = vunpack.c.h.bf16 %v4287_v45  ;;  %v4616_v55 = vunpack.c.h.bf16 %v4293_v47  ;;  %v476_v47 = vsel %vm383_vm1, %v473_v61, %v475_v17  ;;  %v477_v61 = vrot.slane %v4633_v2, 1  ;;  %6227 = vst [vmem:[#allocation25_spill] sm:$0xff] %v4660_v44 }
  0x52   : > { %v429_v37 = vrot.slane %v4614_v51, 1  ;;  %v453_v45 = vrot.slane %v4616_v55, 1 }
  0x53   : > { %3768 = vmatmul.msk.f32.gmra.mxu3 %vm481_vm2, %v474_v27  ;;  %v404_v27 = vsel %vm383_vm1, %v401_v22, %v403_v41  ;;  %v478_v22 = vsel %vm383_vm1, %v475_v17, %v477_v61 }
  0x57   : > { %3745 = vmatmul.msk.f32.gmra.mxu1 %vm481_vm2, %v428_v48  ;;  %v4644_v48 = vunpack.c.l.bf16 %v4410_v14 }
  0x58   : > { %3757 = vmatmul.msk.f32.gmra.mxu2 %vm481_vm2, %v452_v15  ;;  %3732 = vmatmul.msk.f32.gmra.mxu0 %vm481_vm2, %v402_v31  ;;  %v430_v15 = vsel %vm383_vm1, %v427_v63, %v429_v37  ;;  %v454_v31 = vsel %vm383_vm1, %v451_v21, %v453_v45  ;;  %v431_v63 = vrot.slane %v4640_v7, 1  ;;  %v405_v21 = vrot.slane %v4646_v29, 1 }
  0x59   : > { %v455_v14 = vrot.slane %v4644_v48, 1 }
  0x5a   : > { %v432_v38 = vsel %vm383_vm1, %v429_v37, %v431_v63 }
  0x5b   : > { %3769 = vmatmul.msk.f32.gmra.mxu3 %vm481_vm2, %v476_v47  ;;  %v456_v47 = vsel %vm383_vm1, %v453_v45, %v455_v14  ;;  %v434_v45 = vsel %vm383_vm1, %v431_v63, %v6229_v62  ;;  %v1007_v63 = vrot.slane %v4404_v11, 2  ;;  %v1638_v62 = vrot.slane %v4424_v24, 3 }
  0x5f   : > { %3746 = vmatmul.msk.f32.gmra.mxu1 %vm481_vm2, %v430_v15  ;;  %v406_v15 = vsel %vm383_vm1, %v403_v41, %v405_v21 }
  0x60   : > { %3758 = vmatmul.msk.f32.gmra.mxu2 %vm481_vm2, %v454_v31  ;;  %3733 = vmatmul.msk.f32.gmra.mxu0 %vm481_vm2, %v404_v27  ;;  %v4668_v31 = vunpack.c.l.bf16 %v4384_v1  ;;  %v479_v27 = vrot.slane %v4660_v44, 1  ;;  %v6230_v1 = vrot.slane %v4427_v25, 1 }
  0x62   : > { %6228 = vst [vmem:[#allocation26_spill] sm:$0xff] %v4668_v31  ;;  %v407_v17 = vrot.slane %v4668_v31, 1  ;;  %v480_v37 = vsel %vm383_vm1, %v477_v61, %v479_v27  ;;  %v458_v41 = vsel %vm383_vm1, %v455_v14, %v6230_v1  ;;  %v1006_v61 = vrot.slane %v4402_v10, 2 }
  0x63   : > { %3770 = vmatmul.msk.f32.gmra.mxu3 %vm481_vm2, %v478_v22  ;;  %v1009_v22 = vrot.slane %v4424_v24, 2  ;;  %v1013_v27 = vrot.slane %v4480_v57, 2 }
  0x64   : > { %v408_v3 = vsel %vm383_vm1, %v405_v21, %v407_v17  ;;  %v1008_v14 = vsel %vm1005_vm3, %v1006_v61, %v1007_v63  ;;  %v6231_v21 = vrot.slane %v4391_v4, 1  ;;  %v1643_v61 = vrot.slane %v4502_v20, 3 }
  0x67   : > { %3747 = vmatmul.msk.f32.gmra.mxu1 %vm481_vm2, %v432_v38  ;;  %v1011_v38 = vrot.slane %v4458_v43, 2 }
  0x68   : > { %3759 = vmatmul.msk.f32.gmra.mxu2 %vm481_vm2, %v456_v47  ;;  %3734 = vmatmul.msk.f32.gmra.mxu0 %vm481_vm2, %v406_v15  ;;  %v410_v15 = vsel %vm383_vm1, %v407_v17, %v6231_v21  ;;  %v1010_v17 = vsel %vm1005_vm3, %v1007_v63, %v1009_v22  ;;  %v1645_v21 = vrot.slane %v4524_v39, 3 }
  0x69   : > { %v1012_v47 = vsel %vm1005_vm3, %v1009_v22, %v1011_v38  ;;  %v1017_v22 = vrot.slane %v4524_v39, 2 }
  0x6b   : > { %3771 = vmatmul.msk.f32.gmra.mxu3 %vm481_vm2, %v480_v37  ;;  %v1014_v37 = vsel %vm1005_vm3, %v1011_v38, %v1013_v27 }
  0x6f   : > { %3748 = vmatmul.msk.f32.gmra.mxu1 %vm481_vm2, %v434_v45  ;;  %v1639_v45 = vrot.slane %v4458_v43, 3 }
  0x70   : > { %3760 = vmatmul.msk.f32.gmra.mxu2 %vm481_vm2, %v458_v41  ;;  %3735 = vmatmul.msk.f32.gmra.mxu0 %vm481_vm2, %v408_v3  ;;  %v1015_v41 = vrot.slane %v4502_v20, 2  ;;  %v1641_v3 = vrot.slane %v4480_v57, 3 }
  0x71   : > { %v1640_v1 = vsel %vm1637_vm4, %v1638_v62, %v1639_v45  ;;  %v1646_v62 = vsel %vm1637_vm4, %v1643_v61, %v1645_v21 }
  0x72   : > { %v1642_v38 = vsel %vm1637_vm4, %v1639_v45, %v1641_v3  ;;  %v1644_v63 = vsel %vm1637_vm4, %v1641_v3, %v1643_v61  ;;  %v1021_v45 = vrot.slane %v4568_v32, 2 }
  0x73   : > { %3873 = vmatmul.msk.f32.vlgmr.msrb.gmra.mxu3 %vm481_vm2, %v1012_v47 }
  0x77   : > { %3773 = vmatmul.msk.f32.vlgmr.msrb.gmra.mxu1 %vm481_vm2, %v4402_v10  ;;  %v1016_v10 = vsel %vm1005_vm3, %v1013_v27, %v1015_v41 }
  0x78   : > { %3823 = vmatmul.msk.f32.vlgmr.msrb.gmra.mxu2 %vm481_vm2, %v1008_v14  ;;  %3736 = vmatmul.msk.f32.gmra.mxu0 %vm481_vm2, %v410_v15  ;;  %v1019_v14 = vrot.slane %v4546_v60, 2 }
  0x7b   : > { %3874 = vmatmul.msk.f32.gmra.mxu3 %vm481_vm2, %v1014_v37 }
  0x7f   : > { %3774 = vmatmul.msk.f32.gmra.mxu1 %vm481_vm2, %v4404_v11  ;;  %v1018_v11 = vsel %vm1005_vm3, %v1015_v41, %v1017_v22 }
  0x80   : > { %3824 = vmatmul.msk.f32.gmra.mxu2 %vm481_vm2, %v1010_v17  ;;  %3923 = vmatmul.msk.f32.vlgmr.msrb.gmra.mxu0 %vm481_vm2, %v1640_v1  ;;  %v1647_v17 = vrot.slane %v4546_v60, 3 }
  0x83   : > { %3875 = vmatmul.msk.f32.gmra.mxu3 %vm481_vm2, %v1016_v10 }
  0x87   : > { %3775 = vmatmul.msk.f32.gmra.mxu1 %vm481_vm2, %v4424_v24 }
  0x88   : > { %3825 = vmatmul.msk.f32.gmra.mxu2 %vm481_vm2, %v1012_v47  ;;  %3924 = vmatmul.msk.f32.gmra.mxu0 %vm481_vm2, %v1642_v38  ;;  %v1020_v47 = vsel %vm1005_vm3, %v1017_v22, %v1019_v14  ;;  %v1648_v38 = vsel %vm1637_vm4, %v1645_v21, %v1647_v17  ;;  %v1023_v22 = vrot.slane %v4590_v8, 2 }
  0x8a   : > { %v1024_v61 = vsel %vm1005_vm3, %v1021_v45, %v1023_v22 }
  0x8b   : > { %3876 = vmatmul.msk.f32.gmra.mxu3 %vm481_vm2, %v1018_v11 }
  0x8f   : > { %3776 = vmatmul.msk.f32.gmra.mxu1 %vm481_vm2, %v4458_v43 }
  0x90   : > { %3826 = vmatmul.msk.f32.gmra.mxu2 %vm481_vm2, %v1014_v37  ;;  %3925 = vmatmul.msk.f32.gmra.mxu0 %vm481_vm2, %v1644_v63  ;;  %v1022_v37 = vsel %vm1005_vm3, %v1019_v14, %v1021_v45  ;;  %v1649_v63 = vrot.slane %v4568_v32, 3 }
  0x92   : > { %v1650_v43 = vsel %vm1637_vm4, %v1647_v17, %v1649_v63 }
  0x93   : > { %3877 = vmatmul.msk.f32.gmra.mxu3 %vm481_vm2, %v1020_v47 }
  0x94   : > { %v4733_v15 = vpop.f32.mrf.mxu1 }
  0x95   : > { %v4736_v27 = vpop.f32.mrf.mxu0 }
  0x97   : > { %3777 = vmatmul.msk.f32.gmra.mxu1 %vm481_vm2, %v4480_v57 }
  0x98   : > { %3827 = vmatmul.msk.f32.gmra.mxu2 %vm481_vm2, %v1016_v10  ;;  %3926 = vmatmul.msk.f32.gmra.mxu0 %vm481_vm2, %v1646_v62 }
  0x9b   : > { %v4746_v1 = vpop.f32.mrf.mxu2  ;;  %3878 = vmatmul.msk.f32.gmra.mxu3 %vm481_vm2, %v1022_v37 }
  0x9c   : > { %6232 = vst [vmem:[#allocation27_spill] sm:$0xff] %v4746_v1  ;;  %v4748_v41 = vpop.f32.mrf.mxu1 }
  0x9d   : > { %v4751_v3 = vpop.f32.mrf.mxu0 }
  0x9e   : > { %v4757_v10 = vpop.f32.mrf.mxu3 }
  0x9f   : > { %3778 = vmatmul.msk.f32.gmra.mxu1 %vm481_vm2, %v4502_v20  ;;  %6233 = vst [vmem:[#allocation28_spill] sm:$0xff] %v4757_v10  ;;  %v1025_v10 = vrot.slane %v4620_v33, 2 }
  0xa0   : > { %3828 = vmatmul.msk.f32.gmra.mxu2 %vm481_vm2, %v1018_v11  ;;  %3927 = vmatmul.msk.f32.gmra.mxu0 %vm481_vm2, %v1648_v38  ;;  %v1651_v38 = vrot.slane %v4590_v8, 3 }
  0xa1   : > { %v1026_v45 = vsel %vm1005_vm3, %v1023_v22, %v1025_v10  ;;  %v1653_v22 = vrot.slane %v4620_v33, 3 }
  0xa3   : > { %v4763_v14 = vpop.f32.mrf.mxu2  ;;  %3879 = vmatmul.msk.f32.gmra.mxu3 %vm481_vm2, %v1024_v61 }
  0xa4   : > { %6234 = vst [vmem:[#allocation29_spill] sm:$0xff] %v4763_v14  ;;  %v4765_v62 = vpop.f32.mrf.mxu1 }
  0xa5   : > { %v4768_v21 = vpop.f32.mrf.mxu0 }
  0xa6   : > { %v4774_v11 = vpop.f32.mrf.mxu3 }
  0xa7   : > { %3779 = vmatmul.msk.f32.gmra.mxu1 %vm481_vm2, %v4524_v39  ;;  %6235 = vst [vmem:[#allocation30_spill] sm:$0xff] %v4774_v11  ;;  %v1652_v39 = vsel %vm1637_vm4, %v1649_v63, %v1651_v38  ;;  %v1027_v11 = vrot.slane %v4646_v29, 2 }
  0xa8   : > { %3829 = vmatmul.msk.f32.gmra.mxu2 %vm481_vm2, %v1020_v47  ;;  %3928 = vmatmul.msk.f32.gmra.mxu0 %vm481_vm2, %v1650_v43 }
  0xa9   : > { %v1028_v47 = vsel %vm1005_vm3, %v1025_v10, %v1027_v11  ;;  %v1655_v10 = vrot.slane %v4646_v29, 3 }
  0xab   : > { %v4780_v24 = vpop.f32.mrf.mxu2  ;;  %3880 = vmatmul.msk.f32.gmra.mxu3 %vm481_vm2, %v1026_v45 }
  0xac   : > { %6236 = vst [vmem:[#allocation31_spill] sm:$0xff] %v4780_v24  ;;  %v4782_v20 = vpop.f32.mrf.mxu1 }
  0xad   : > { %v4785_v17 = vpop.f32.mrf.mxu0 }
  0xae   : > { %v4791_v43 = vpop.f32.mrf.mxu3 }
  0xaf   : > { %3780 = vmatmul.msk.f32.gmra.mxu1 %vm481_vm2, %v4546_v60  ;;  %6237 = vst [vmem:[#allocation32_spill] sm:$0xff] %v4791_v43  ;;  %v1654_v60 = vsel %vm1637_vm4, %v1651_v38, %v1653_v22  ;;  %v1029_v43 = vrot.slane %v4668_v31, 2 }
  0xb0   : > { %3830 = vmatmul.msk.f32.gmra.mxu2 %vm481_vm2, %v1022_v37  ;;  %3929 = vmatmul.msk.f32.gmra.mxu0 %vm481_vm2, %v1652_v39 }
  0xb1   : > { %v1030_v37 = vsel %vm1005_vm3, %v1027_v11, %v1029_v43  ;;  %v1657_v11 = vrot.slane %v4668_v31, 3 }
  0xb3   : > { %v4797_v57 = vpop.f32.mrf.mxu2  ;;  %3881 = vmatmul.msk.f32.gmra.mxu3 %vm481_vm2, %v1028_v47 }
  0xb4   : > { %6238 = vst [vmem:[#allocation33_spill] sm:$0xff] %v4797_v57  ;;  %v4799_v44 = vpop.f32.mrf.mxu1 }
  0xb5   : > { %v4802_v63 = vpop.f32.mrf.mxu0 }
  0xb6   : > { %v4808_v39 = vpop.f32.mrf.mxu3 }
  0xb7   : > { %3781 = vmatmul.msk.f32.gmra.mxu1 %vm481_vm2, %v4568_v32  ;;  %6239 = vst [vmem:[#allocation34_spill] sm:$0xff] %v4808_v39  ;;  %v1656_v32 = vsel %vm1637_vm4, %v1653_v22, %v1655_v10  ;;  %v1031_v39 = vrot.slane %v4391_v4, 2 }
  0xb8   : > { %3831 = vmatmul.msk.f32.gmra.mxu2 %vm481_vm2, %v1024_v61  ;;  %3930 = vmatmul.msk.f32.gmra.mxu0 %vm481_vm2, %v1654_v60 }
  0xb9   : > { %v1032_v61 = vsel %vm1005_vm3, %v1029_v43, %v1031_v39  ;;  %v1659_v43 = vrot.slane %v4391_v4, 3 }
  0xbb   : > { %v4814_v57 = vpop.f32.mrf.mxu2  ;;  %3882 = vmatmul.msk.f32.gmra.mxu3 %vm481_vm2, %v1030_v37 }
  0xbc   : > { %6240 = vst [vmem:[#allocation35_spill] sm:$0xff] %v4814_v57  ;;  %v4816_v24 = vpop.f32.mrf.mxu1 }
  0xbd   : > { %v4819_v38 = vpop.f32.mrf.mxu0 }
  0xbe   : > { %v4825_v60 = vpop.f32.mrf.mxu3 }
  0xbf   : > { %3782 = vmatmul.msk.f32.gmra.mxu1 %vm481_vm2, %v4590_v8  ;;  %6241 = vst [vmem:[#allocation36_spill] sm:$0xff] %v4825_v60  ;;  %v1658_v8 = vsel %vm1637_vm4, %v1655_v10, %v1657_v11  ;;  %v1033_v60 = vrot.slane %v4393_v5, 2 }
  0xc0   : > { %3832 = vmatmul.msk.f32.gmra.mxu2 %vm481_vm2, %v1026_v45  ;;  %3931 = vmatmul.msk.f32.gmra.mxu0 %vm481_vm2, %v1656_v32 }
  0xc1   : > { %v1034_v45 = vsel %vm1005_vm3, %v1031_v39, %v1033_v60  ;;  %v1661_v39 = vrot.slane %v4393_v5, 3 }
  0xc3   : > { %v4831_v57 = vpop.f32.mrf.mxu2  ;;  %3883 = vmatmul.msk.f32.gmra.mxu3 %vm481_vm2, %v1032_v61 }
  0xc4   : > { %6242 = vst [vmem:[#allocation37_spill] sm:$0xff] %v4831_v57  ;;  %v4833_v2 = vpop.f32.mrf.mxu1 }
  0xc5   : > { %v4836_v22 = vpop.f32.mrf.mxu0 }
  0xc6   : > { %v4842_v32 = vpop.f32.mrf.mxu3 }
  0xc7   : > { %3783 = vmatmul.msk.f32.gmra.mxu1 %vm481_vm2, %v4620_v33  ;;  %6243 = vst [vmem:[#allocation38_spill] sm:$0xff] %v4842_v32  ;;  %v1660_v33 = vsel %vm1637_vm4, %v1657_v11, %v1659_v43  ;;  %v1035_v32 = vrot.slane %v4406_v12, 2 }
  0xc8   : > { %3833 = vmatmul.msk.f32.gmra.mxu2 %vm481_vm2, %v1028_v47  ;;  %3932 = vmatmul.msk.f32.gmra.mxu0 %vm481_vm2, %v1658_v8 }
  0xc9   : > { %v1036_v47 = vsel %vm1005_vm3, %v1033_v60, %v1035_v32  ;;  %v1663_v60 = vrot.slane %v4406_v12, 3 }
  0xcb   : > { %v4848_v57 = vpop.f32.mrf.mxu2  ;;  %3884 = vmatmul.msk.f32.gmra.mxu3 %vm481_vm2, %v1034_v45 }
  0xcc   : > { %6244 = vst [vmem:[#allocation39_spill] sm:$0xff] %v4848_v57  ;;  %v4850_v14 = vpop.f32.mrf.mxu1 }
  0xcd   : > { %v4853_v10 = vpop.f32.mrf.mxu0 }
  0xce   : > { %v4859_v8 = vpop.f32.mrf.mxu3 }
  0xcf   : > { %3784 = vmatmul.msk.f32.gmra.mxu1 %vm481_vm2, %v4646_v29  ;;  %6245 = vst [vmem:[#allocation40_spill] sm:$0xff] %v4859_v8  ;;  %v1662_v29 = vsel %vm1637_vm4, %v1659_v43, %v1661_v39  ;;  %v1037_v8 = vrot.slane %v4453_v40, 2 }
  0xd0   : > { %3834 = vmatmul.msk.f32.gmra.mxu2 %vm481_vm2, %v1030_v37  ;;  %3933 = vmatmul.msk.f32.gmra.mxu0 %vm481_vm2, %v1660_v33 }
  0xd1   : > { %v1038_v37 = vsel %vm1005_vm3, %v1035_v32, %v1037_v8  ;;  %v1665_v32 = vrot.slane %v4453_v40, 3 }
  0xd3   : > { %v4865_v57 = vpop.f32.mrf.mxu2  ;;  %3885 = vmatmul.msk.f32.gmra.mxu3 %vm481_vm2, %v1036_v47 }
  0xd4   : > { %6246 = vst [vmem:[#allocation41_spill] sm:$0xff] %v4865_v57  ;;  %v4867_v1 = vpop.f32.mrf.mxu1 }
  0xd5   : > { %6247 = vst [vmem:[#allocation42_spill] sm:$0xff] %v4867_v1  ;;  %v4870_v11 = vpop.f32.mrf.mxu0 }
  0xd6   : > { %v4876_v33 = vpop.f32.mrf.mxu3 }
  0xd7   : > { %3785 = vmatmul.msk.f32.gmra.mxu1 %vm481_vm2, %v4668_v31  ;;  %6248 = vst [vmem:[#allocation43_spill] sm:$0xff] %v4876_v33  ;;  %v1664_v31 = vsel %vm1637_vm4, %v1661_v39, %v1663_v60  ;;  %v1039_v33 = vrot.slane %v4474_v53, 2 }
  0xd8   : > { %3835 = vmatmul.msk.f32.gmra.mxu2 %vm481_vm2, %v1032_v61  ;;  %3934 = vmatmul.msk.f32.gmra.mxu0 %vm481_vm2, %v1662_v29 }
  0xd9   : > { %v1040_v61 = vsel %vm1005_vm3, %v1037_v8, %v1039_v33  ;;  %v1667_v8 = vrot.slane %v4474_v53, 3 }
  0xdb   : > { %v4882_v57 = vpop.f32.mrf.mxu2  ;;  %3886 = vmatmul.msk.f32.gmra.mxu3 %vm481_vm2, %v1038_v37 }
  0xdc   : > { %6249 = vst [vmem:[#allocation44_spill] sm:$0xff] %v4882_v57  ;;  %v4884_v46 = vpop.f32.mrf.mxu1 }
  0xdd   : > { %6250 = vst [vmem:[#allocation45_spill] sm:$0xff] %v4884_v46  ;;  %v4887_v43 = vpop.f32.mrf.mxu0 }
  0xde   : > { %v4893_v29 = vpop.f32.mrf.mxu3 }
  0xdf   : > { %3786 = vmatmul.msk.f32.gmra.mxu1 %vm481_vm2, %v4391_v4  ;;  %6251 = vst [vmem:[#allocation46_spill] sm:$0xff] %v4893_v29  ;;  %v1666_v4 = vsel %vm1637_vm4, %v1663_v60, %v1665_v32  ;;  %v1041_v29 = vrot.slane %v4497_v13, 2 }
  0xe0   : > { %3836 = vmatmul.msk.f32.gmra.mxu2 %vm481_vm2, %v1034_v45  ;;  %3935 = vmatmul.msk.f32.gmra.mxu0 %vm481_vm2, %v1664_v31 }
  0xe1   : > { %v1042_v45 = vsel %vm1005_vm3, %v1039_v33, %v1041_v29  ;;  %v1669_v33 = vrot.slane %v4497_v13, 3 }
  0xe3   : > { %v4899_v57 = vpop.f32.mrf.mxu2  ;;  %3887 = vmatmul.msk.f32.gmra.mxu3 %vm481_vm2, %v1040_v61  ;;  %v1670_v49 = vsel %vm1637_vm4, %v1667_v8, %v1669_v33 }
  0xe4   : > { %6252 = vst [vmem:[#allocation47_spill] sm:$0xff] %v4899_v57  ;;  %v4901_v16 = vpop.f32.mrf.mxu1 }
  0xe5   : > { %6253 = vst [vmem:[#allocation48_spill] sm:$0xff] %v4901_v16  ;;  %v4904_v39 = vpop.f32.mrf.mxu0 }
  0xe6   : > { %v4910_v31 = vpop.f32.mrf.mxu3 }
  0xe7   : > { %3787 = vmatmul.msk.f32.gmra.mxu1 %vm481_vm2, %v4393_v5  ;;  %6254 = vst [vmem:[#allocation49_spill] sm:$0xff] %v4910_v31  ;;  %v1668_v5 = vsel %vm1637_vm4, %v1665_v32, %v1667_v8  ;;  %v1043_v31 = vrot.slane %v4518_v34, 2 }
  0xe8   : > { %3837 = vmatmul.msk.f32.gmra.mxu2 %vm481_vm2, %v1036_v47  ;;  %3936 = vmatmul.msk.f32.gmra.mxu0 %vm481_vm2, %v1666_v4 }
  0xe9   : > { %v1044_v47 = vsel %vm1005_vm3, %v1041_v29, %v1043_v31  ;;  %v1671_v29 = vrot.slane %v4518_v34, 3 }
  0xeb   : > { %v4916_v57 = vpop.f32.mrf.mxu2  ;;  %3888 = vmatmul.msk.f32.gmra.mxu3 %vm481_vm2, %v1042_v45  ;;  %v1672_v1 = vsel %vm1637_vm4, %v1669_v33, %v1671_v29 }
  0xec   : > { %6255 = vst [vmem:[#allocation50_spill] sm:$0xff] %v4916_v57  ;;  %v4918_v16 = vpop.f32.mrf.mxu1 }
  0xed   : > { %6256 = vst [vmem:[#allocation51_spill] sm:$0xff] %v4918_v16  ;;  %v4921_v60 = vpop.f32.mrf.mxu0 }
  0xee   : > { %v4927_v4 = vpop.f32.mrf.mxu3 }
  0xef   : > { %3788 = vmatmul.msk.f32.gmra.mxu1 %vm481_vm2, %v4406_v12  ;;  %6257 = vst [vmem:[#allocation52_spill] sm:$0xff] %v4927_v4  ;;  %v1045_v12 = vrot.slane %v4541_v56, 2 }
  0xf0   : > { %3838 = vmatmul.msk.f32.gmra.mxu2 %vm481_vm2, %v1038_v37  ;;  %3937 = vmatmul.msk.f32.gmra.mxu0 %vm481_vm2, %v1668_v5 }
  0xf1   : > { %v1046_v5 = vsel %vm1005_vm3, %v1043_v31, %v1045_v12 }
  0xf3   : > { %v4933_v57 = vpop.f32.mrf.mxu2  ;;  %3889 = vmatmul.msk.f32.gmra.mxu3 %vm481_vm2, %v1044_v47 }
  0xf4   : > { %6258 = vst [vmem:[#allocation53_spill] sm:$0xff] %v4933_v57  ;;  %v859_v16 = vpop.f32.mrf.mxu1 }
  0xf5   : > { %v4936_v32 = vpop.f32.mrf.mxu0  ;;  %v860_v4 = vadd.f32 %v859_v16, %v4736_v27  ;;  %v1673_v16 = vrot.slane %v4541_v56, 3 }
  0xf6   : > { %v1443_v37 = vpop.f32.mrf.mxu3 }
  0xf7   : > { %3789 = vmatmul.msk.f32.gmra.mxu1 %vm481_vm2, %v4453_v40  ;;  %v1047_v40 = vrot.slane %v4562_v23, 2 }
  0xf8   : > { %3839 = vmatmul.msk.f32.gmra.mxu2 %vm481_vm2, %v1040_v61  ;;  %3938 = vmatmul.msk.f32.gmra.mxu0 %vm481_vm2, %v1670_v49 }
  0xfb   : > { %v1219_v57 = vpop.f32.mrf.mxu2  ;;  %3890 = vmatmul.msk.f32.gmra.mxu3 %vm481_vm2, %v1046_v5 }
  0xfc   : > { %v1363_v46 = vadd.f32 %v1219_v57, %v860_v4  ;;  %v862_v30 = vpop.f32.mrf.mxu1  ;;  %v1048_v57 = vsel %vm1005_vm3, %v1045_v12, %v1047_v40 }
  0xfd   : > { %v1851_v8 = vpop.f32.mrf.mxu0  ;;  %v863_v27 = vadd.f32 %v862_v30, %v4751_v3  ;;  %v1675_v3 = vrot.slane %v4562_v23, 3 }
  0xfe   : > { %v1587_v0 = vadd.f32 %v1443_v37, %v1363_v46  ;;  %v1446_v49 = vpop.f32.mrf.mxu3  ;;  %v1674_v37 = vsel %vm1637_vm4, %v1671_v29, %v1673_v16 }
  0xff   : > { %3790 = vmatmul.msk.f32.gmra.mxu1 %vm481_vm2, %v4474_v53 }
 0x100   : > { %v4952_v61 = vadd.f32 %v1851_v8, %v1587_v0  ;;  %3840 = vmatmul.msk.f32.gmra.mxu2 %vm481_vm2, %v1042_v45  ;;  %3939 = vmatmul.msk.f32.gmra.mxu0 %vm481_vm2, %v1672_v1  ;;  %v1049_v0 = vrot.slane %v4585_v52, 2 }
 0x102   : > { %v1050_v30 = vsel %vm1005_vm3, %v1047_v40, %v1049_v0 }
 0x103   : > { %v1222_v31 = vpop.f32.mrf.mxu2  ;;  %3891 = vmatmul.msk.f32.gmra.mxu3 %vm481_vm2, %v1048_v57 }
 0x104   : > { %v1364_v4 = vadd.f32 %v1222_v31, %v863_v27  ;;  %v865_v33 = vpop.f32.mrf.mxu1 }
 0x105   : > { %v1854_v46 = vpop.f32.mrf.mxu0  ;;  %v866_v45 = vadd.f32 %v865_v33, %v4768_v21  ;;  %v1677_v33 = vrot.slane %v4585_v52, 3 }
 0x106   : > { %v1588_v8 = vadd.f32 %v1446_v49, %v1364_v4  ;;  %v1449_v1 = vpop.f32.mrf.mxu3  ;;  %v1676_v4 = vsel %vm1637_vm4, %v1673_v16, %v1675_v3 }
 0x107   : > { %3791 = vmatmul.msk.f32.gmra.mxu1 %vm481_vm2, %v4497_v13 }
 0x108   : > { %v4964_v12 = vadd.f32 %v1854_v46, %v1588_v8  ;;  %3841 = vmatmul.msk.f32.gmra.mxu2 %vm481_vm2, %v1044_v47  ;;  %3940 = vmatmul.msk.f32.gmra.mxu0 %vm481_vm2, %v1674_v37  ;;  %v1051_v46 = vrot.slane %v4614_v51, 2 }
 0x10a   : > { %v1052_v21 = vsel %vm1005_vm3, %v1049_v0, %v1051_v46 }
 0x10b   : > { %v1225_v29 = vpop.f32.mrf.mxu2  ;;  %3892 = vmatmul.msk.f32.gmra.mxu3 %vm481_vm2, %v1050_v30 }
 0x10c   : > { %v1365_v27 = vadd.f32 %v1225_v29, %v866_v45  ;;  %v868_v31 = vpop.f32.mrf.mxu1 }
 0x10d   : > { %v1857_v49 = vpop.f32.mrf.mxu0  ;;  %v869_v37 = vadd.f32 %v868_v31, %v4785_v17  ;;  %v1679_v31 = vrot.slane %v4614_v51, 3 }
 0x10e   : > { %v1589_v8 = vadd.f32 %v1449_v1, %v1365_v27  ;;  %v1452_v47 = vpop.f32.mrf.mxu3  ;;  %v1678_v27 = vsel %vm1637_vm4, %v1675_v3, %v1677_v33 }
 0x10f   : > { %3792 = vmatmul.msk.f32.gmra.mxu1 %vm481_vm2, %v4518_v34 }
 0x110   : > { %v4976_v40 = vadd.f32 %v1857_v49, %v1589_v8  ;;  %3842 = vmatmul.msk.f32.gmra.mxu2 %vm481_vm2, %v1046_v5  ;;  %3941 = vmatmul.msk.f32.gmra.mxu0 %vm481_vm2, %v1676_v4  ;;  %v1053_v49 = vrot.slane %v4640_v7, 2 }
 0x112   : > { %v1054_v17 = vsel %vm1005_vm3, %v1051_v46, %v1053_v49 }
 0x113   : > { %v1228_v16 = vpop.f32.mrf.mxu2  ;;  %3893 = vmatmul.msk.f32.gmra.mxu3 %vm481_vm2, %v1052_v21 }
 0x114   : > { %v1366_v45 = vadd.f32 %v1228_v16, %v869_v37  ;;  %v871_v29 = vpop.f32.mrf.mxu1 }
 0x115   : > { %v1860_v1 = vpop.f32.mrf.mxu0  ;;  %v872_v4 = vadd.f32 %v871_v29, %v4802_v63  ;;  %v1681_v29 = vrot.slane %v4640_v7, 3 }
 0x116   : > { %v1590_v8 = vadd.f32 %v1452_v47, %v1366_v45  ;;  %v1455_v5 = vpop.f32.mrf.mxu3  ;;  %v1680_v45 = vsel %vm1637_vm4, %v1677_v33, %v1679_v31 }
 0x117   : > { %3793 = vmatmul.msk.f32.gmra.mxu1 %vm481_vm2, %v4541_v56 }
 0x118   : > { %v4988_v0 = vadd.f32 %v1860_v1, %v1590_v8  ;;  %3843 = vmatmul.msk.f32.gmra.mxu2 %vm481_vm2, %v1048_v57  ;;  %3942 = vmatmul.msk.f32.gmra.mxu0 %vm481_vm2, %v1678_v27  ;;  %v1055_v1 = vrot.slane %v4396_v6, 2 }
 0x11a   : > { %v1056_v63 = vsel %vm1005_vm3, %v1053_v49, %v1055_v1 }
 0x11b   : > { %v1231_v3 = vpop.f32.mrf.mxu2  ;;  %3894 = vmatmul.msk.f32.gmra.mxu3 %vm481_vm2, %v1054_v17 }
 0x11c   : > { %v1367_v37 = vadd.f32 %v1231_v3, %v872_v4  ;;  %v874_v16 = vpop.f32.mrf.mxu1 }
 0x11d   : > { %v1863_v47 = vpop.f32.mrf.mxu0  ;;  %v875_v27 = vadd.f32 %v874_v16, %v4819_v38  ;;  %v1683_v16 = vrot.slane %v4396_v6, 3 }
 0x11e   : > { %v1591_v8 = vadd.f32 %v1455_v5, %v1367_v37  ;;  %v1458_v57 = vpop.f32.mrf.mxu3  ;;  %v1682_v37 = vsel %vm1637_vm4, %v1679_v31, %v1681_v29 }
 0x11f   : > { %3794 = vmatmul.msk.f32.gmra.mxu1 %vm481_vm2, %v4562_v23 }
 0x120   : > { %v5000_v46 = vadd.f32 %v1863_v47, %v1591_v8  ;;  %3844 = vmatmul.msk.f32.gmra.mxu2 %vm481_vm2, %v1050_v30  ;;  %3943 = vmatmul.msk.f32.gmra.mxu0 %vm481_vm2, %v1680_v45  ;;  %v1057_v47 = vrot.slane %v4400_v9, 2 }
 0x122   : > { %v1058_v38 = vsel %vm1005_vm3, %v1055_v1, %v1057_v47 }
 0x123   : > { %v1234_v33 = vpop.f32.mrf.mxu2  ;;  %3895 = vmatmul.msk.f32.gmra.mxu3 %vm481_vm2, %v1056_v63 }
 0x124   : > { %v1368_v4 = vadd.f32 %v1234_v33, %v875_v27  ;;  %v877_v3 = vpop.f32.mrf.mxu1 }
 0x125   : > { %v1866_v5 = vpop.f32.mrf.mxu0  ;;  %v878_v45 = vadd.f32 %v877_v3, %v4836_v22  ;;  %v1685_v3 = vrot.slane %v4400_v9, 3 }
 0x126   : > { %v1592_v8 = vadd.f32 %v1458_v57, %v1368_v4  ;;  %v1461_v30 = vpop.f32.mrf.mxu3  ;;  %v1684_v4 = vsel %vm1637_vm4, %v1681_v29, %v1683_v16 }
 0x127   : > { %3795 = vmatmul.msk.f32.gmra.mxu1 %vm481_vm2, %v4585_v52 }
 0x128   : > { %v5012_v49 = vadd.f32 %v1866_v5, %v1592_v8  ;;  %3845 = vmatmul.msk.f32.gmra.mxu2 %vm481_vm2, %v1052_v21  ;;  %3944 = vmatmul.msk.f32.gmra.mxu0 %vm481_vm2, %v1682_v37  ;;  %v1059_v5 = vrot.slane %v4415_v18, 2 }
 0x12a   : > { %v1060_v22 = vsel %vm1005_vm3, %v1057_v47, %v1059_v5 }
 0x12b   : > { %v1237_v31 = vpop.f32.mrf.mxu2  ;;  %3896 = vmatmul.msk.f32.gmra.mxu3 %vm481_vm2, %v1058_v38 }
 0x12c   : > { %v1369_v27 = vadd.f32 %v1237_v31, %v878_v45  ;;  %v880_v33 = vpop.f32.mrf.mxu1 }
 0x12d   : > { %v1869_v57 = vpop.f32.mrf.mxu0  ;;  %v881_v37 = vadd.f32 %v880_v33, %v4853_v10  ;;  %v1687_v33 = vrot.slane %v4415_v18, 3 }
 0x12e   : > { %v1593_v8 = vadd.f32 %v1461_v30, %v1369_v27  ;;  %v1464_v21 = vpop.f32.mrf.mxu3  ;;  %v1686_v27 = vsel %vm1637_vm4, %v1683_v16, %v1685_v3 }
 0x12f   : > { %3796 = vmatmul.msk.f32.gmra.mxu1 %vm481_vm2, %v4614_v51 }
 0x130   : > { %v5024_v1 = vadd.f32 %v1869_v57, %v1593_v8  ;;  %3846 = vmatmul.msk.f32.gmra.mxu2 %vm481_vm2, %v1054_v17  ;;  %3945 = vmatmul.msk.f32.gmra.mxu0 %vm481_vm2, %v1684_v4  ;;  %v1061_v57 = vrot.slane %v4456_v42, 2 }
 0x132   : > { %v1062_v10 = vsel %vm1005_vm3, %v1059_v5, %v1061_v57 }
 0x133   : > { %v1240_v29 = vpop.f32.mrf.mxu2  ;;  %3897 = vmatmul.msk.f32.gmra.mxu3 %vm481_vm2, %v1060_v22 }
 0x134   : > { %v1370_v45 = vadd.f32 %v1240_v29, %v881_v37  ;;  %v883_v31 = vpop.f32.mrf.mxu1 }
 0x135   : > { %v1872_v30 = vpop.f32.mrf.mxu0  ;;  %v884_v4 = vadd.f32 %v883_v31, %v4870_v11  ;;  %v1689_v31 = vrot.slane %v4456_v42, 3 }
 0x136   : > { %v1594_v8 = vadd.f32 %v1464_v21, %v1370_v45  ;;  %v1467_v17 = vpop.f32.mrf.mxu3  ;;  %v1688_v45 = vsel %vm1637_vm4, %v1685_v3, %v1687_v33 }
 0x137   : > { %3797 = vmatmul.msk.f32.gmra.mxu1 %vm481_vm2, %v4640_v7 }
 0x138   : > { %v5036_v47 = vadd.f32 %v1872_v30, %v1594_v8  ;;  %3847 = vmatmul.msk.f32.gmra.mxu2 %vm481_vm2, %v1056_v63  ;;  %3946 = vmatmul.msk.f32.gmra.mxu0 %vm481_vm2, %v1686_v27  ;;  %v1063_v30 = vrot.slane %v4476_v54, 2 }
 0x13a   : > { %v1064_v11 = vsel %vm1005_vm3, %v1061_v57, %v1063_v30 }
 0x13b   : > { %v1243_v16 = vpop.f32.mrf.mxu2  ;;  %3898 = vmatmul.msk.f32.gmra.mxu3 %vm481_vm2, %v1062_v10 }
 0x13c   : > { %v1371_v37 = vadd.f32 %v1243_v16, %v884_v4  ;;  %v886_v29 = vpop.f32.mrf.mxu1 }
 0x13d   : > { %v1875_v21 = vpop.f32.mrf.mxu0  ;;  %v887_v27 = vadd.f32 %v886_v29, %v4887_v43  ;;  %v1691_v29 = vrot.slane %v4476_v54, 3 }
 0x13e   : > { %v1595_v8 = vadd.f32 %v1467_v17, %v1371_v37  ;;  %v1470_v63 = vpop.f32.mrf.mxu3  ;;  %v1690_v37 = vsel %vm1637_vm4, %v1687_v33, %v1689_v31 }
 0x13f   : > { %3798 = vmatmul.msk.f32.gmra.mxu1 %vm481_vm2, %v4396_v6 }
 0x140   : > { %v5048_v5 = vadd.f32 %v1875_v21, %v1595_v8  ;;  %3848 = vmatmul.msk.f32.gmra.mxu2 %vm481_vm2, %v1058_v38  ;;  %3947 = vmatmul.msk.f32.gmra.mxu0 %vm481_vm2, %v1688_v45  ;;  %v1065_v21 = vrot.slane %v4500_v19, 2 }
 0x142   : > { %v1066_v43 = vsel %vm1005_vm3, %v1063_v30, %v1065_v21 }
 0x143   : > { %v1246_v3 = vpop.f32.mrf.mxu2  ;;  %3899 = vmatmul.msk.f32.gmra.mxu3 %vm481_vm2, %v1064_v11 }
 0x144   : > { %v1372_v4 = vadd.f32 %v1246_v3, %v887_v27  ;;  %v889_v16 = vpop.f32.mrf.mxu1 }
 0x145   : > { %v1878_v17 = vpop.f32.mrf.mxu0  ;;  %v890_v45 = vadd.f32 %v889_v16, %v4904_v39  ;;  %v1693_v16 = vrot.slane %v4500_v19, 3 }
 0x146   : > { %v1596_v8 = vadd.f32 %v1470_v63, %v1372_v4  ;;  %v1473_v38 = vpop.f32.mrf.mxu3  ;;  %v1692_v4 = vsel %vm1637_vm4, %v1689_v31, %v1691_v29 }
 0x147   : > { %3799 = vmatmul.msk.f32.gmra.mxu1 %vm481_vm2, %v4400_v9 }
 0x148   : > { %v5060_v57 = vadd.f32 %v1878_v17, %v1596_v8  ;;  %3849 = vmatmul.msk.f32.gmra.mxu2 %vm481_vm2, %v1060_v22  ;;  %3948 = vmatmul.msk.f32.gmra.mxu0 %vm481_vm2, %v1690_v37  ;;  %v1067_v17 = vrot.slane %v4520_v36, 2 }
 0x14a   : > { %v1068_v39 = vsel %vm1005_vm3, %v1065_v21, %v1067_v17 }
 0x14b   : > { %v1249_v33 = vpop.f32.mrf.mxu2  ;;  %3900 = vmatmul.msk.f32.gmra.mxu3 %vm481_vm2, %v1066_v43 }
 0x14c   : > { %v1373_v27 = vadd.f32 %v1249_v33, %v890_v45  ;;  %v892_v3 = vpop.f32.mrf.mxu1 }
 0x14d   : > { %v1881_v63 = vpop.f32.mrf.mxu0  ;;  %v893_v37 = vadd.f32 %v892_v3, %v4921_v60  ;;  %v1695_v3 = vrot.slane %v4520_v36, 3 }
 0x14e   : > { %v1597_v8 = vadd.f32 %v1473_v38, %v1373_v27  ;;  %v1476_v22 = vpop.f32.mrf.mxu3  ;;  %v1694_v27 = vsel %vm1637_vm4, %v1691_v29, %v1693_v16 }
 0x14f   : > { %3800 = vmatmul.msk.f32.gmra.mxu1 %vm481_vm2, %v4415_v18 }
 0x150   : > { %v5072_v30 = vadd.f32 %v1881_v63, %v1597_v8  ;;  %3850 = vmatmul.msk.f32.gmra.mxu2 %vm481_vm2, %v1062_v10  ;;  %3949 = vmatmul.msk.f32.gmra.mxu0 %vm481_vm2, %v1692_v4  ;;  %v1069_v63 = vrot.slane %v4544_v59, 2 }
 0x152   : > { %6259 = vst [vmem:[#allocation54_spill] sm:$0xff] %v5072_v30  ;;  %v1070_v60 = vsel %vm1005_vm3, %v1067_v17, %v1069_v63 }
 0x153   : > { %v1252_v31 = vpop.f32.mrf.mxu2  ;;  %3901 = vmatmul.msk.f32.gmra.mxu3 %vm481_vm2, %v1068_v39 }
 0x154   : > { %v1374_v45 = vadd.f32 %v1252_v31, %v893_v37  ;;  %v895_v33 = vpop.f32.mrf.mxu1 }
 0x155   : > { %v1884_v38 = vpop.f32.mrf.mxu0  ;;  %v896_v4 = vadd.f32 %v895_v33, %v4936_v32  ;;  %v1697_v33 = vrot.slane %v4544_v59, 3 }
 0x156   : > { %v1598_v8 = vadd.f32 %v1476_v22, %v1374_v45  ;;  %v1479_v10 = vpop.f32.mrf.mxu3  ;;  %v1696_v45 = vsel %vm1637_vm4, %v1693_v16, %v1695_v3 }
 0x157   : > { %3801 = vmatmul.msk.f32.gmra.mxu1 %vm481_vm2, %v4456_v42 }
 0x158   : > { %v5084_v21 = vadd.f32 %v1884_v38, %v1598_v8  ;;  %3851 = vmatmul.msk.f32.gmra.mxu2 %vm481_vm2, %v1064_v11  ;;  %3950 = vmatmul.msk.f32.gmra.mxu0 %vm481_vm2, %v1694_v27  ;;  %v1071_v38 = vrot.slane %v4564_v26, 2 }
 0x15a   : > { %v1072_v32 = vsel %vm1005_vm3, %v1069_v63, %v1071_v38 }
 0x15b   : > { %v1255_v29 = vpop.f32.mrf.mxu2  ;;  %3902 = vmatmul.msk.f32.gmra.mxu3 %vm481_vm2, %v1070_v60 }
 0x15c   : > { %v1375_v37 = vadd.f32 %v1255_v29, %v896_v4  ;;  %v898_v31 = vpop.f32.mrf.mxu1 }
 0x15d   : > { %v1887_v22 = vpop.f32.mrf.mxu0  ;;  %v899_v27 = vadd.f32 %v898_v31, %v4733_v15  ;;  %v1699_v31 = vrot.slane %v4564_v26, 3 }
 0x15e   : > { %v1599_v8 = vadd.f32 %v1479_v10, %v1375_v37  ;;  %v1482_v11 = vpop.f32.mrf.mxu3  ;;  %v1698_v37 = vsel %vm1637_vm4, %v1695_v3, %v1697_v33 }
 0x15f   : > { %3802 = vmatmul.msk.f32.gmra.mxu1 %vm481_vm2, %v4476_v54 }
 0x160   : > { %v5096_v17 = vadd.f32 %v1887_v22, %v1599_v8  ;;  %3852 = vmatmul.msk.f32.gmra.mxu2 %vm481_vm2, %v1066_v43  ;;  %3951 = vmatmul.msk.f32.gmra.mxu0 %vm481_vm2, %v1696_v45  ;;  %v1073_v22 = vrot.slane %v4588_v58, 2 }
 0x162   : > { %v1074_v15 = vsel %vm1005_vm3, %v1071_v38, %v1073_v22 }
 0x163   : > { %v1258_v16 = vpop.f32.mrf.mxu2  ;;  %3903 = vmatmul.msk.f32.gmra.mxu3 %vm481_vm2, %v1072_v32 }
 0x164   : > { %v1376_v4 = vadd.f32 %v1258_v16, %v899_v27  ;;  %v901_v29 = vpop.f32.mrf.mxu1 }
 0x165   : > { %v1890_v10 = vpop.f32.mrf.mxu0  ;;  %v902_v45 = vadd.f32 %v901_v29, %v4748_v41  ;;  %v1701_v29 = vrot.slane %v4588_v58, 3 }
 0x166   : > { %v1600_v8 = vadd.f32 %v1482_v11, %v1376_v4  ;;  %v1485_v43 = vpop.f32.mrf.mxu3  ;;  %v1700_v4 = vsel %vm1637_vm4, %v1697_v33, %v1699_v31 }
 0x167   : > { %3803 = vmatmul.msk.f32.gmra.mxu1 %vm481_vm2, %v4500_v19 }
 0x168   : > { %v5108_v63 = vadd.f32 %v1890_v10, %v1600_v8  ;;  %3853 = vmatmul.msk.f32.gmra.mxu2 %vm481_vm2, %v1068_v39  ;;  %3952 = vmatmul.msk.f32.gmra.mxu0 %vm481_vm2, %v1698_v37  ;;  %v1075_v10 = vrot.slane %v4616_v55, 2 }
 0x16a   : > { %v1076_v41 = vsel %vm1005_vm3, %v1073_v22, %v1075_v10 }
 0x16b   : > { %v1261_v3 = vpop.f32.mrf.mxu2  ;;  %3904 = vmatmul.msk.f32.gmra.mxu3 %vm481_vm2, %v1074_v15 }
 0x16c   : > { %v1377_v27 = vadd.f32 %v1261_v3, %v902_v45  ;;  %v904_v16 = vpop.f32.mrf.mxu1 }
 0x16d   : > { %v1893_v11 = vpop.f32.mrf.mxu0  ;;  %v905_v37 = vadd.f32 %v904_v16, %v4765_v62  ;;  %v1703_v16 = vrot.slane %v4616_v55, 3 }
 0x16e   : > { %v1601_v8 = vadd.f32 %v1485_v43, %v1377_v27  ;;  %v1488_v39 = vpop.f32.mrf.mxu3  ;;  %v1702_v27 = vsel %vm1637_vm4, %v1699_v31, %v1701_v29 }
 0x16f   : > { %3804 = vmatmul.msk.f32.gmra.mxu1 %vm481_vm2, %v4520_v36 }
 0x170   : > { %v5120_v38 = vadd.f32 %v1893_v11, %v1601_v8  ;;  %3854 = vmatmul.msk.f32.gmra.mxu2 %vm481_vm2, %v1070_v60  ;;  %3953 = vmatmul.msk.f32.gmra.mxu0 %vm481_vm2, %v1700_v4  ;;  %v1077_v11 = vrot.slane %v4644_v48, 2 }
 0x172   : > { %v1078_v62 = vsel %vm1005_vm3, %v1075_v10, %v1077_v11 }
 0x173   : > { %v1264_v33 = vpop.f32.mrf.mxu2  ;;  %3905 = vmatmul.msk.f32.gmra.mxu3 %vm481_vm2, %v1076_v41 }
 0x174   : > { %v1378_v45 = vadd.f32 %v1264_v33, %v905_v37  ;;  %v907_v3 = vpop.f32.mrf.mxu1 }
 0x175   : > { %v1896_v43 = vpop.f32.mrf.mxu0  ;;  %v908_v4 = vadd.f32 %v907_v3, %v4782_v20  ;;  %v1705_v3 = vrot.slane %v4644_v48, 3 }
 0x176   : > { %v1602_v8 = vadd.f32 %v1488_v39, %v1378_v45  ;;  %v1491_v60 = vpop.f32.mrf.mxu3  ;;  %v1704_v45 = vsel %vm1637_vm4, %v1701_v29, %v1703_v16 }
 0x177   : > { %3805 = vmatmul.msk.f32.gmra.mxu1 %vm481_vm2, %v4544_v59 }
 0x178   : > { %v5132_v22 = vadd.f32 %v1896_v43, %v1602_v8  ;;  %3855 = vmatmul.msk.f32.gmra.mxu2 %vm481_vm2, %v1072_v32  ;;  %3954 = vmatmul.msk.f32.gmra.mxu0 %vm481_vm2, %v1702_v27  ;;  %v1079_v43 = vrot.slane %v4427_v25, 2 }
 0x17a   : > { %v1080_v20 = vsel %vm1005_vm3, %v1077_v11, %v1079_v43 }
 0x17b   : > { %v1267_v31 = vpop.f32.mrf.mxu2  ;;  %3906 = vmatmul.msk.f32.gmra.mxu3 %vm481_vm2, %v1078_v62 }
 0x17c   : > { %v1379_v37 = vadd.f32 %v1267_v31, %v908_v4  ;;  %v910_v33 = vpop.f32.mrf.mxu1 }
 0x17d   : > { %v1899_v39 = vpop.f32.mrf.mxu0  ;;  %v911_v27 = vadd.f32 %v910_v33, %v4799_v44  ;;  %v1707_v33 = vrot.slane %v4427_v25, 3 }
 0x17e   : > { %v1603_v8 = vadd.f32 %v1491_v60, %v1379_v37  ;;  %v1494_v32 = vpop.f32.mrf.mxu3  ;;  %v1706_v37 = vsel %vm1637_vm4, %v1703_v16, %v1705_v3 }
 0x17f   : > { %3806 = vmatmul.msk.f32.gmra.mxu1 %vm481_vm2, %v4564_v26 }
 0x180   : > { %v5144_v10 = vadd.f32 %v1899_v39, %v1603_v8  ;;  %3856 = vmatmul.msk.f32.gmra.mxu2 %vm481_vm2, %v1074_v15  ;;  %3955 = vmatmul.msk.f32.gmra.mxu0 %vm481_vm2, %v1704_v45  ;;  %v1081_v39 = vrot.slane %v4434_v28, 2 }
 0x182   : > { %v1082_v44 = vsel %vm1005_vm3, %v1079_v43, %v1081_v39 }
 0x183   : > { %v1270_v29 = vpop.f32.mrf.mxu2  ;;  %3907 = vmatmul.msk.f32.gmra.mxu3 %vm481_vm2, %v1080_v20 }
 0x184   : > { %v1380_v4 = vadd.f32 %v1270_v29, %v911_v27  ;;  %v913_v31 = vpop.f32.mrf.mxu1 }
 0x185   : > { %v1902_v60 = vpop.f32.mrf.mxu0  ;;  %v914_v45 = vadd.f32 %v913_v31, %v4816_v24  ;;  %v1709_v31 = vrot.slane %v4434_v28, 3 }
 0x186   : > { %v1604_v8 = vadd.f32 %v1494_v32, %v1380_v4  ;;  %v1497_v15 = vpop.f32.mrf.mxu3  ;;  %v1708_v4 = vsel %vm1637_vm4, %v1705_v3, %v1707_v33 }
 0x187   : > { %3807 = vmatmul.msk.f32.gmra.mxu1 %vm481_vm2, %v4588_v58 }
 0x188   : > { %v5156_v11 = vadd.f32 %v1902_v60, %v1604_v8  ;;  %3857 = vmatmul.msk.f32.gmra.mxu2 %vm481_vm2, %v1076_v41  ;;  %3956 = vmatmul.msk.f32.gmra.mxu0 %vm481_vm2, %v1706_v37  ;;  %v1083_v60 = vrot.slane %v4444_v35, 2 }
 0x18a   : > { %6260 = vst [vmem:[#allocation55_spill] sm:$0xff] %v5156_v11  ;;  %v1084_v24 = vsel %vm1005_vm3, %v1081_v39, %v1083_v60 }
 0x18b   : > { %v1273_v16 = vpop.f32.mrf.mxu2  ;;  %3908 = vmatmul.msk.f32.gmra.mxu3 %vm481_vm2, %v1082_v44 }
 0x18c   : > { %v1381_v27 = vadd.f32 %v1273_v16, %v914_v45  ;;  %v916_v29 = vpop.f32.mrf.mxu1 }
 0x18d   : > { %v1905_v32 = vpop.f32.mrf.mxu0  ;;  %v917_v37 = vadd.f32 %v916_v29, %v4833_v2  ;;  %v4021_v2 = vld [vmem:[%s6136_s1 + $0x18] sm:$0xf] }
 0x18e   : > { %v1605_v8 = vadd.f32 %v1497_v15, %v1381_v27  ;;  %v1500_v41 = vpop.f32.mrf.mxu3  ;;  %v1710_v27 = vsel %vm1637_vm4, %v1707_v33, %v1709_v31  ;;  %v1711_v33 = vrot.slane %v4444_v35, 3  ;;  %4022 = vmatpush.msk.msra.mxu2 %vm578_vm0, %v4021_v2 }
 0x18f   : > { %3808 = vmatmul.msk.f32.gmra.mxu1 %vm481_vm2, %v4616_v55 }
 0x190   : > { %v5168_v43 = vadd.f32 %v1905_v32, %v1605_v8  ;;  %3858 = vmatmul.msk.f32.gmra.mxu2 %vm481_vm2, %v1078_v62  ;;  %3957 = vmatmul.msk.f32.gmra.mxu0 %vm481_vm2, %v1708_v4  ;;  %v1085_v32 = vrot.slane %v4469_v50, 2 }
 0x192   : > { %6261 = vst [vmem:[#allocation56_spill] sm:$0xff] %v5168_v43  ;;  %v1086_v29 = vsel %vm1005_vm3, %v1083_v60, %v1085_v32 }
 0x193   : > { %v1276_v3 = vpop.f32.mrf.mxu2  ;;  %3909 = vmatmul.msk.f32.gmra.mxu3 %vm481_vm2, %v1084_v24 }
 0x194   : > { %v1382_v45 = vadd.f32 %v1276_v3, %v917_v37  ;;  %v919_v16 = vpop.f32.mrf.mxu1 }
 0x195   : > { %v1908_v15 = vpop.f32.mrf.mxu0  ;;  %v920_v4 = vadd.f32 %v919_v16, %v4850_v14  ;;  %v3971_v14 = vld [vmem:[%s6136_s1 + $0x14] sm:$0xf] }
 0x196   : > { %v1606_v8 = vadd.f32 %v1500_v41, %v1382_v45  ;;  %v1503_v62 = vpop.f32.mrf.mxu3  ;;  %3972 = vmatpush.msk.msra.mxu1 %vm578_vm0, %v3971_v14 }
 0x197   : > { %3809 = vmatmul.msk.f32.gmra.mxu1 %vm481_vm2, %v4644_v48 }
 0x198   : > { %v5180_v39 = vadd.f32 %v1908_v15, %v1606_v8  ;;  %3859 = vmatmul.msk.f32.gmra.mxu2 %vm481_vm2, %v1080_v20  ;;  %3958 = vmatmul.msk.f32.gmra.mxu0 %vm481_vm2, %v1710_v27  ;;  %v4071_v20 = vld [vmem:[%s6136_s1 + $0x1c] sm:$0xf]  ;;  %v1712_v15 = vsel %vm1637_vm4, %v1709_v31, %v1711_v33  ;;  %v6263_v27 = vld [vmem:[#allocation11_spill] sm:$0xff] }
 0x199   : > { %v1087_v60 = vrot.slane %v6263_v27, 2  ;;  %4072 = vmatpush.msk.msra.mxu3 %vm578_vm0, %v4071_v20 }
 0x19a   : > { %6262 = vst [vmem:[#allocation57_spill] sm:$0xff] %v5180_v39 }
 0x19b   : > { %v1279_v41 = vpop.f32.mrf.mxu2  ;;  %3910 = vmatmul.msk.f32.gmra.mxu3 %vm481_vm2, %v1086_v29  ;;  %v1088_v31 = vsel %vm1005_vm3, %v1085_v32, %v1087_v60 }
 0x19c   : > { %v1383_v37 = vadd.f32 %v1279_v41, %v920_v4  ;;  %v922_v3 = vpop.f32.mrf.mxu1  ;;  %v1713_v4 = vrot.slane %v4469_v50, 3 }
 0x19d   : > { %v1911_v45 = vpop.f32.mrf.mxu0 }
 0x19e   : > { %v1607_v8 = vadd.f32 %v1503_v62, %v1383_v37  ;;  %v1506_v16 = vpop.f32.mrf.mxu3  ;;  %v6265_v62 = vld [vmem:[#allocation42_spill] sm:$0xff] }
 0x19f   : > { %3810 = vmatmul.msk.f32.gmra.mxu1 %vm481_vm2, %v4427_v25  ;;  %v923_v41 = vadd.f32 %v922_v3, %v6265_v62 }
 0x1a0   : > { %v5203_v2 = vadd.f32 %v1911_v45, %v1607_v8  ;;  %3860 = vmatmul.msk.f32.gmra.mxu2 %vm481_vm2, %v1082_v44  ;;  %3959 = vmatmul.msk.f32.gmra.mxu0 %vm481_vm2, %v1712_v15  ;;  %v4121_v45 = vld [vmem:[%s6136_s1 + $0x20] sm:$0xf]  ;;  %v1714_v15 = vsel %vm1637_vm4, %v1711_v33, %v1713_v4  ;;  %v6266_v8 = vld [vmem:[#allocation13_spill] sm:$0xff] }
 0x1a1   : > { %v1089_v32 = vrot.slane %v6266_v8, 2  ;;  %4122 = vmatpush.msk.msra.mxu0 %vm578_vm0, %v4121_v45  ;;  %v6268_v33 = vld [vmem:[#allocation45_spill] sm:$0xff] }
 0x1a2   : > { %6264 = vst [vmem:[#allocation58_spill] sm:$0xff] %v5203_v2 }
 0x1a3   : > { %v1282_v37 = vpop.f32.mrf.mxu2  ;;  %3911 = vmatmul.msk.f32.gmra.mxu3 %vm481_vm2, %v1088_v31  ;;  %v1090_v62 = vsel %vm1005_vm3, %v1087_v60, %v1089_v32 }
 0x1a4   : > { %v1384_v20 = vadd.f32 %v1282_v37, %v923_v41  ;;  %v925_v39 = vpop.f32.mrf.mxu1  ;;  %v1715_v41 = vrot.slane %v6263_v27, 3 }
 0x1a5   : > { %v1914_v44 = vpop.f32.mrf.mxu0  ;;  %v926_v37 = vadd.f32 %v925_v39, %v6268_v33  ;;  %v1717_v39 = vrot.slane %v6266_v8, 3 }
 0x1a6   : > { %v1608_v2 = vadd.f32 %v1506_v16, %v1384_v20  ;;  %v1509_v3 = vpop.f32.mrf.mxu3  ;;  %v1716_v20 = vsel %vm1637_vm4, %v1713_v4, %v1715_v41 }
 0x1a7   : > { %3811 = vmatmul.msk.f32.gmra.mxu1 %vm481_vm2, %v4434_v28 }
 0x1a8   : > { %v5220_v14 = vadd.f32 %v1914_v44, %v1608_v2  ;;  %3861 = vmatmul.msk.f32.gmra.mxu2 %vm481_vm2, %v1084_v24  ;;  %3960 = vmatmul.msk.f32.gmra.mxu0 %vm481_vm2, %v1714_v15  ;;  %v6269_v2 = vld [vmem:[#allocation15_spill] sm:$0xff]  ;;  %v6271_v15 = vld [vmem:[#allocation48_spill] sm:$0xff] }
 0x1a9   : > { %v1091_v44 = vrot.slane %v6269_v2, 2 }
 0x1aa   : > { %6267 = vst [vmem:[#allocation42_spill] sm:$0xff] %v5220_v14 }
 0x1ab   : > { %v1285_v43 = vpop.f32.mrf.mxu2  ;;  %3912 = vmatmul.msk.f32.gmra.mxu3 %vm481_vm2, %v1090_v62 }
 0x1ac   : > { %v1385_v11 = vadd.f32 %v1285_v43, %v926_v37  ;;  %v928_v45 = vpop.f32.mrf.mxu1  ;;  %v1092_v43 = vsel %vm1005_vm3, %v1089_v32, %v1091_v44 }
 0x1ad   : > { %v1917_v16 = vpop.f32.mrf.mxu0  ;;  %v929_v33 = vadd.f32 %v928_v45, %v6271_v15  ;;  %v6274_v15 = vld [vmem:[#allocation51_spill] sm:$0xff] }
 0x1ae   : > { %v1609_v14 = vadd.f32 %v1509_v3, %v1385_v11  ;;  %v1512_v24 = vpop.f32.mrf.mxu3  ;;  %v1718_v3 = vsel %vm1637_vm4, %v1715_v41, %v1717_v39 }
 0x1af   : > { %3812 = vmatmul.msk.f32.gmra.mxu1 %vm481_vm2, %v4444_v35 }
 0x1b0   : > { %v5232_v60 = vadd.f32 %v1917_v16, %v1609_v14  ;;  %3862 = vmatmul.msk.f32.gmra.mxu2 %vm481_vm2, %v1086_v29  ;;  %3961 = vmatmul.msk.f32.gmra.mxu0 %vm481_vm2, %v1716_v20  ;;  %v6272_v14 = vld [vmem:[#allocation17_spill] sm:$0xff]  ;;  %v1719_v20 = vrot.slane %v6269_v2, 3 }
 0x1b1   : > { %v1093_v16 = vrot.slane %v6272_v14, 2 }
 0x1b2   : > { %6270 = vst [vmem:[#allocation45_spill] sm:$0xff] %v5232_v60 }
 0x1b3   : > { %v1288_v4 = vpop.f32.mrf.mxu2  ;;  %3913 = vmatmul.msk.f32.gmra.mxu3 %vm481_vm2, %v1092_v43  ;;  %v1094_v45 = vsel %vm1005_vm3, %v1091_v44, %v1093_v16 }
 0x1b4   : > { %v1386_v37 = vadd.f32 %v1288_v4, %v929_v33  ;;  %v931_v30 = vpop.f32.mrf.mxu1 }
 0x1b5   : > { %v1920_v11 = vpop.f32.mrf.mxu0  ;;  %v932_v33 = vadd.f32 %v931_v30, %v6274_v15  ;;  %v6277_v15 = vld [vmem:[#allocation27_spill] sm:$0xff] }
 0x1b6   : > { %v1610_v60 = vadd.f32 %v1512_v24, %v1386_v37  ;;  %v1515_v29 = vpop.f32.mrf.mxu3  ;;  %v1720_v37 = vsel %vm1637_vm4, %v1717_v39, %v1719_v20 }
 0x1b7   : > { %3813 = vmatmul.msk.f32.gmra.mxu1 %vm481_vm2, %v4469_v50 }
 0x1b8   : > { %v5244_v32 = vadd.f32 %v1920_v11, %v1610_v60  ;;  %3863 = vmatmul.msk.f32.gmra.mxu2 %vm481_vm2, %v1088_v31  ;;  %3962 = vmatmul.msk.f32.gmra.mxu0 %vm481_vm2, %v1718_v3  ;;  %v6275_v60 = vld [vmem:[#allocation19_spill] sm:$0xff]  ;;  %v1721_v3 = vrot.slane %v6272_v14, 3 }
 0x1b9   : > { %v1095_v11 = vrot.slane %v6275_v60, 2 }
 0x1ba   : > { %6273 = vst [vmem:[#allocation48_spill] sm:$0xff] %v5244_v32 }
 0x1bb   : > { %v1291_v41 = vpop.f32.mrf.mxu2  ;;  %3914 = vmatmul.msk.f32.gmra.mxu3 %vm481_vm2, %v1094_v45  ;;  %v1096_v30 = vsel %vm1005_vm3, %v1093_v16, %v1095_v11 }
 0x1bc   : > { %v1387_v4 = vadd.f32 %v1291_v41, %v932_v33  ;;  %v934_v35 = vpop.f32.mrf.mxu1 }
 0x1bd   : > { %v1923_v24 = vpop.f32.mrf.mxu0  ;;  %v935_v33 = vadd.f32 %v934_v35, %v6277_v15  ;;  %v6280_v15 = vld [vmem:[#allocation29_spill] sm:$0xff] }
 0x1be   : > { %v1611_v32 = vadd.f32 %v1515_v29, %v1387_v4  ;;  %v1518_v31 = vpop.f32.mrf.mxu3  ;;  %v1722_v4 = vsel %vm1637_vm4, %v1719_v20, %v1721_v3 }
 0x1bf   : > { %3814 = vmatmul.msk.f32.gmra.mxu1 %vm481_vm2, %v6263_v27 }
 0x1c0   : > { %v5256_v44 = vadd.f32 %v1923_v24, %v1611_v32  ;;  %3864 = vmatmul.msk.f32.gmra.mxu2 %vm481_vm2, %v1090_v62  ;;  %3963 = vmatmul.msk.f32.gmra.mxu0 %vm481_vm2, %v1720_v37  ;;  %v6278_v32 = vld [vmem:[#allocation21_spill] sm:$0xff]  ;;  %v1723_v37 = vrot.slane %v6275_v60, 3 }
 0x1c1   : > { %v1097_v24 = vrot.slane %v6278_v32, 2 }
 0x1c2   : > { %6276 = vst [vmem:[#allocation51_spill] sm:$0xff] %v5256_v44 }
 0x1c3   : > { %v1294_v39 = vpop.f32.mrf.mxu2  ;;  %3915 = vmatmul.msk.f32.gmra.mxu3 %vm481_vm2, %v1096_v30  ;;  %v1098_v35 = vsel %vm1005_vm3, %v1095_v11, %v1097_v24 }
 0x1c4   : > { %v1388_v41 = vadd.f32 %v1294_v39, %v935_v33  ;;  %v937_v50 = vpop.f32.mrf.mxu1 }
 0x1c5   : > { %v1926_v29 = vpop.f32.mrf.mxu0  ;;  %v938_v33 = vadd.f32 %v937_v50, %v6280_v15  ;;  %v6283_v15 = vld [vmem:[#allocation31_spill] sm:$0xff] }
 0x1c6   : > { %v1612_v44 = vadd.f32 %v1518_v31, %v1388_v41  ;;  %v1521_v62 = vpop.f32.mrf.mxu3  ;;  %v1724_v41 = vsel %vm1637_vm4, %v1721_v3, %v1723_v37 }
 0x1c7   : > { %3815 = vmatmul.msk.f32.gmra.mxu1 %vm481_vm2, %v6266_v8 }
 0x1c8   : > { %v5268_v16 = vadd.f32 %v1926_v29, %v1612_v44  ;;  %3865 = vmatmul.msk.f32.gmra.mxu2 %vm481_vm2, %v1092_v43  ;;  %3964 = vmatmul.msk.f32.gmra.mxu0 %vm481_vm2, %v1722_v4  ;;  %v6281_v44 = vld [vmem:[#allocation23_spill] sm:$0xff]  ;;  %v1725_v4 = vrot.slane %v6278_v32, 3 }
 0x1c9   : > { %v1099_v29 = vrot.slane %v6281_v44, 2 }
 0x1ca   : > { %6279 = vst [vmem:[#allocation27_spill] sm:$0xff] %v5268_v16 }
 0x1cb   : > { %v1297_v20 = vpop.f32.mrf.mxu2  ;;  %3916 = vmatmul.msk.f32.gmra.mxu3 %vm481_vm2, %v1098_v35  ;;  %v1100_v50 = vsel %vm1005_vm3, %v1097_v24, %v1099_v29 }
 0x1cc   : > { %v1389_v39 = vadd.f32 %v1297_v20, %v938_v33  ;;  %v940_v27 = vpop.f32.mrf.mxu1 }
 0x1cd   : > { %v1929_v31 = vpop.f32.mrf.mxu0  ;;  %v941_v33 = vadd.f32 %v940_v27, %v6283_v15  ;;  %v1727_v15 = vrot.slane %v6281_v44, 3 }
 0x1ce   : > { %v1613_v16 = vadd.f32 %v1521_v62, %v1389_v39  ;;  %v1524_v43 = vpop.f32.mrf.mxu3 }
 0x1cf   : > { %3816 = vmatmul.msk.f32.gmra.mxu1 %vm481_vm2, %v6269_v2 }
 0x1d0   : > { %v5280_v11 = vadd.f32 %v1929_v31, %v1613_v16  ;;  %3866 = vmatmul.msk.f32.gmra.mxu2 %vm481_vm2, %v1094_v45  ;;  %3965 = vmatmul.msk.f32.gmra.mxu0 %vm481_vm2, %v1724_v41  ;;  %v1726_v16 = vsel %vm1637_vm4, %v1723_v37, %v1725_v4  ;;  %v6284_v31 = vld [vmem:[#allocation25_spill] sm:$0xff] }
 0x1d2   : > { %6282 = vst [vmem:[#allocation29_spill] sm:$0xff] %v5280_v11  ;;  %v1101_v11 = vrot.slane %v6284_v31, 2 }
 0x1d3   : > { %v1300_v3 = vpop.f32.mrf.mxu2  ;;  %3917 = vmatmul.msk.f32.gmra.mxu3 %vm481_vm2, %v1100_v50 }
 0x1d4   : > { %v1390_v20 = vadd.f32 %v1300_v3, %v941_v33  ;;  %v943_v62 = vpop.f32.mrf.mxu1  ;;  %v1102_v27 = vsel %vm1005_vm3, %v1099_v29, %v1101_v11  ;;  %v4318_v33 = vld [vmem:[%s4381_s25 + $0xc0] sm:$0xff]   ;;  %v6287_v3 = vld [vmem:[#allocation33_spill] sm:$0xff] }
 0x1d5   : > { %v1932_v39 = vpop.f32.mrf.mxu0  ;;  %v5299_v37 = vunpack.c.h.bf16 %v4318_v33 }
 0x1d6   : > { %v1614_v45 = vadd.f32 %v1524_v43, %v1390_v20  ;;  %v1527_v24 = vpop.f32.mrf.mxu3  ;;  %v944_v43 = vadd.f32 %v943_v62, %v6287_v3  ;;  %v1729_v3 = vrot.slane %v6284_v31, 3  ;;  %v6299_v31 = vld [vmem:[#allocation14_spill] sm:$0xff] }
 0x1d7   : > { %3817 = vmatmul.msk.f32.gmra.mxu1 %vm481_vm2, %v6272_v14  ;;  %6286 = vst [vmem:[#allocation59_spill] sm:$0xff] %v5299_v37 }
 0x1d8   : > { %v5292_v41 = vadd.f32 %v1932_v39, %v1614_v45  ;;  %3867 = vmatmul.msk.f32.gmra.mxu2 %vm481_vm2, %v1096_v30  ;;  %3966 = vmatmul.msk.f32.gmra.mxu0 %vm481_vm2, %v1726_v16  ;;  %v1728_v45 = vsel %vm1637_vm4, %v1725_v4, %v1727_v15  ;;  %v1415_v30 = vrot.slane %v5299_v37, 2  ;;  %v6290_v4 = vld [vmem:[#allocation35_spill] sm:$0xff] }
 0x1da   : > { %6285 = vst [vmem:[#allocation31_spill] sm:$0xff] %v5292_v41  ;;  %v4301_v41 = vld [vmem:[%s4381_s25 + $0xc8] sm:$0xff]   ;;  %v1416_v62 = vsel %vm1005_vm3, %v1101_v11, %v1415_v30 }
 0x1db   : > { %v1303_v20 = vpop.f32.mrf.mxu2  ;;  %3918 = vmatmul.msk.f32.gmra.mxu3 %vm481_vm2, %v1102_v27 }
 0x1dc   : > { %v1391_v2 = vadd.f32 %v1303_v20, %v944_v43  ;;  %v946_v14 = vpop.f32.mrf.mxu1  ;;  %v5314_v43 = vunpack.c.l.bf16 %v4301_v41  ;;  %v1731_v41 = vrot.slane %v5299_v37, 3 }
 0x1dd   : > { %v1935_v39 = vpop.f32.mrf.mxu0  ;;  %v947_v20 = vadd.f32 %v946_v14, %v6290_v4 }
 0x1de   : > { %v1615_v16 = vadd.f32 %v1527_v24, %v1391_v2  ;;  %v1530_v29 = vpop.f32.mrf.mxu3  ;;  %6289 = vst [vmem:[#allocation60_spill] sm:$0xff] %v5314_v43 }
 0x1df   : > { %3818 = vmatmul.msk.f32.gmra.mxu1 %vm481_vm2, %v6275_v60 }
 0x1e0   : > { %v5308_v33 = vadd.f32 %v1935_v39, %v1615_v16  ;;  %3868 = vmatmul.msk.f32.gmra.mxu2 %vm481_vm2, %v1098_v35  ;;  %3967 = vmatmul.msk.f32.gmra.mxu0 %vm481_vm2, %v1728_v45  ;;  %v1730_v39 = vsel %vm1637_vm4, %v1727_v15, %v1729_v3  ;;  %v1417_v35 = vrot.slane %v5314_v43, 2 }
 0x1e2   : > { %6288 = vst [vmem:[#allocation33_spill] sm:$0xff] %v5308_v33  ;;  %v1418_v14 = vsel %vm1005_vm3, %v1415_v30, %v1417_v35  ;;  %v6294_v33 = vld [vmem:[#allocation12_spill] sm:$0xff] }
 0x1e3   : > { %v1306_v2 = vpop.f32.mrf.mxu2  ;;  %3919 = vmatmul.msk.f32.gmra.mxu3 %vm481_vm2, %v1416_v62  ;;  %v6292_v62 = vld [vmem:[#allocation37_spill] sm:$0xff] }
 0x1e4   : > { %v1392_v24 = vadd.f32 %v1306_v2, %v947_v20  ;;  %v949_v8 = vpop.f32.mrf.mxu1 }
 0x1e5   : > { %v1938_v60 = vpop.f32.mrf.mxu0  ;;  %v950_v4 = vadd.f32 %v949_v8, %v6292_v62  ;;  %v6296_v8 = vld [vmem:[#allocation5_spill] sm:$0xff] }
 0x1e6   : > { %v1616_v16 = vadd.f32 %v1530_v29, %v1392_v24  ;;  %v1533_v11 = vpop.f32.mrf.mxu3  ;;  %v1732_v24 = vsel %vm1637_vm4, %v1729_v3, %v1731_v41  ;;  %v2045_v35 = vrot.slane %v6296_v8, 4 }
 0x1e7   : > { %3819 = vmatmul.msk.f32.gmra.mxu1 %vm481_vm2, %v6278_v32 }
 0x1e8   : > { %v5322_v45 = vadd.f32 %v1938_v60, %v1616_v16  ;;  %3869 = vmatmul.msk.f32.gmra.mxu2 %vm481_vm2, %v1100_v50  ;;  %3968 = vmatmul.msk.f32.gmra.mxu0 %vm481_vm2, %v1730_v39  ;;  %v6293_v60 = vld [vmem:[#allocation10_spill] sm:$0xff]  ;;  %v2678_v50 = vrot.slane %v6294_v33, 5 }
 0x1e9   : > { %v2677_v16 = vrot.slane %v6293_v60, 5  ;;  %v2048_v62 = vrot.slane %v6293_v60, 4 }
 0x1ea   : > { %6291 = vst [vmem:[#allocation35_spill] sm:$0xff] %v5322_v45 }
 0x1eb   : > { %v1309_v15 = vpop.f32.mrf.mxu2  ;;  %3920 = vmatmul.msk.f32.gmra.mxu3 %vm481_vm2, %v1418_v14  ;;  %v6297_v14 = vld [vmem:[#allocation8_spill] sm:$0xff] }
 0x1ec   : > { %v1393_v20 = vadd.f32 %v1309_v15, %v950_v4  ;;  %v952_v2 = vpop.f32.mrf.mxu1  ;;  %v2046_v3 = vrot.slane %v6297_v14, 4  ;;  %v2050_v4 = vrot.slane %v6294_v33, 4  ;;  %v2679_v15 = vsel %vm2676_vm5, %v2677_v16, %v2678_v50 }
 0x1ed   : > { %v1941_v29 = vpop.f32.mrf.mxu0 }
 0x1ee   : > { %v1617_v45 = vadd.f32 %v1533_v11, %v1393_v20  ;;  %v1536_v30 = vpop.f32.mrf.mxu3  ;;  %v1733_v11 = vrot.slane %v5314_v43, 3  ;;  %v6298_v20 = vld [vmem:[#allocation39_spill] sm:$0xff]  ;;  %v2051_v8 = vsel %vm578_vm0, %v2048_v62, %v2050_v4 }
 0x1ef   : > { %3820 = vmatmul.msk.f32.gmra.mxu1 %vm481_vm2, %v6281_v44  ;;  %v953_v37 = vadd.f32 %v952_v2, %v6298_v20  ;;  %v2680_v44 = vrot.slane %v6299_v31, 5 }
 0x1f0   : > { %v5335_v39 = vadd.f32 %v1941_v29, %v1617_v45  ;;  %3870 = vmatmul.msk.f32.gmra.mxu2 %vm481_vm2, %v1102_v27  ;;  %3969 = vmatmul.msk.f32.gmra.mxu0 %vm481_vm2, %v1732_v24  ;;  %v2047_v27 = vsel %vm578_vm0, %v2045_v35, %v2046_v3  ;;  %v1734_v14 = vsel %vm1637_vm4, %v1731_v41, %v1733_v11  ;;  %v3085_v35 = vrot.slane %v6293_v60, 6  ;;  %v6300_v11 = vld [vmem:[#allocation41_spill] sm:$0xff] }
 0x1f1   : > { %v2681_v2 = vsel %vm2676_vm5, %v2678_v50, %v2680_v44  ;;  %v3086_v41 = vrot.slane %v6294_v33, 6  ;;  %v6301_v50 = vld [vmem:[#allocation16_spill] sm:$0xff] }
 0x1f2   : > { %6295 = vst [vmem:[#allocation37_spill] sm:$0xff] %v5335_v39 }
 0x1f3   : > { %v1312_v45 = vpop.f32.mrf.mxu2  ;;  %4073 = vmatmul.msk.f32.vlgmr.msra.gmra.mxu3 %vm481_vm2, %v2679_v15 }
 0x1f4   : > { %v1394_v29 = vadd.f32 %v1312_v45, %v953_v37  ;;  %v955_v39 = vpop.f32.mrf.mxu1  ;;  %v2052_v37 = vrot.slane %v6299_v31, 4 }
 0x1f5   : > { %v1944_v24 = vpop.f32.mrf.mxu0  ;;  %v956_v15 = vadd.f32 %v955_v39, %v6300_v11 }
 0x1f6   : > { %v1618_v32 = vadd.f32 %v1536_v30, %v1394_v29  ;;  %v1539_v16 = vpop.f32.mrf.mxu3 }
 0x1f7   : > { %3973 = vmatmul.msk.f32.vlgmr.msra.gmra.mxu1 %vm481_vm2, %v2047_v27  ;;  %v2053_v27 = vsel %vm578_vm0, %v2050_v4, %v2052_v37  ;;  %v3088_v4 = vrot.slane %v6299_v31, 6 }
 0x1f8   : > { %v5352_v43 = vadd.f32 %v1944_v24, %v1618_v32  ;;  %4023 = vmatmul.msk.f32.vlgmr.msra.gmra.mxu2 %vm481_vm2, %v2051_v8  ;;  %3970 = vmatmul.msk.f32.gmra.mxu0 %vm481_vm2, %v1734_v14  ;;  %v2049_v32 = vsel %vm578_vm0, %v2046_v3, %v2048_v62  ;;  %v3087_v24 = vsel %vm3084_vm6, %v3085_v35, %v3086_v41  ;;  %v2682_v14 = vrot.slane %v6301_v50, 5 }
 0x1f9   : > { %v2054_v3 = vrot.slane %v6301_v50, 4 }
 0x1fa   : > { %v2683_v62 = vsel %vm2676_vm5, %v2680_v44, %v2682_v14 }
 0x1fb   : > { %v1315_v30 = vpop.f32.mrf.mxu2  ;;  %4074 = vmatmul.msk.f32.gmra.mxu3 %vm481_vm2, %v2681_v2  ;;  %v6303_v2 = vld [vmem:[#allocation44_spill] sm:$0xff] }
 0x1fc   : > { %v1395_v20 = vadd.f32 %v1315_v30, %v956_v15  ;;  %v958_v45 = vpop.f32.mrf.mxu1 }
 0x1fd   : > { %v1947_v29 = vpop.f32.mrf.mxu0  ;;  %v959_v35 = vadd.f32 %v958_v45, %v6303_v2 }
 0x1fe   : > { %v1619_v60 = vadd.f32 %v1539_v16, %v1395_v20  ;;  %v1542_v33 = vpop.f32.mrf.mxu3  ;;  %v2055_v20 = vsel %vm578_vm0, %v2052_v37, %v2054_v3  ;;  %v3090_v37 = vrot.slane %v6301_v50, 6 }
 0x1ff   : > { %3974 = vmatmul.msk.f32.gmra.mxu1 %vm481_vm2, %v2049_v32  ;;  %v3089_v32 = vsel %vm3084_vm6, %v3086_v41, %v3088_v4 }
 0x200   : > { %v5367_v39 = vadd.f32 %v1947_v29, %v1619_v60  ;;  %4024 = vmatmul.msk.f32.gmra.mxu2 %vm481_vm2, %v2053_v27  ;;  %4123 = vmatmul.msk.f32.vlgmr.msra.gmra.mxu0 %vm481_vm2, %v3087_v24  ;;  %v6304_v29 = vld [vmem:[#allocation18_spill] sm:$0xff] }
 0x201   : > { %v2684_v24 = vrot.slane %v6304_v29, 5  ;;  %v2056_v31 = vrot.slane %v6304_v29, 4 }
 0x202   : > { %6302 = vst [vmem:[#allocation10_spill] sm:$0xff] %v5367_v39 }
 0x203   : > { %v1318_v11 = vpop.f32.mrf.mxu2  ;;  %4075 = vmatmul.msk.f32.gmra.mxu3 %vm481_vm2, %v2683_v62  ;;  %v2685_v45 = vsel %vm2676_vm5, %v2682_v14, %v2684_v24  ;;  %v6306_v62 = vld [vmem:[#allocation47_spill] sm:$0xff] }
 0x204   : > { %v1396_v15 = vadd.f32 %v1318_v11, %v959_v35  ;;  %v961_v16 = vpop.f32.mrf.mxu1  ;;  %v2057_v11 = vsel %vm578_vm0, %v2054_v3, %v2056_v31  ;;  %v3092_v3 = vrot.slane %v6304_v29, 6 }
 0x205   : > { %v1950_v30 = vpop.f32.mrf.mxu0  ;;  %v962_v41 = vadd.f32 %v961_v16, %v6306_v62 }
 0x206   : > { %v1620_v60 = vadd.f32 %v1542_v33, %v1396_v15  ;;  %v1545_v44 = vpop.f32.mrf.mxu3  ;;  %v3091_v15 = vsel %vm3084_vm6, %v3088_v4, %v3090_v37 }
 0x207   : > { %3975 = vmatmul.msk.f32.gmra.mxu1 %vm481_vm2, %v2051_v8 }
 0x208   : > { %v5380_v39 = vadd.f32 %v1950_v30, %v1620_v60  ;;  %4025 = vmatmul.msk.f32.gmra.mxu2 %vm481_vm2, %v2055_v20  ;;  %4124 = vmatmul.msk.f32.gmra.mxu0 %vm481_vm2, %v3089_v32  ;;  %v6307_v30 = vld [vmem:[#allocation20_spill] sm:$0xff] }
 0x209   : > { %v2686_v32 = vrot.slane %v6307_v30, 5  ;;  %v2058_v50 = vrot.slane %v6307_v30, 4 }
 0x20a   : > { %6305 = vst [vmem:[#allocation12_spill] sm:$0xff] %v5380_v39 }
 0x20b   : > { %v1321_v2 = vpop.f32.mrf.mxu2  ;;  %4076 = vmatmul.msk.f32.gmra.mxu3 %vm481_vm2, %v2685_v45  ;;  %v2687_v16 = vsel %vm2676_vm5, %v2684_v24, %v2686_v32  ;;  %v6309_v45 = vld [vmem:[#allocation50_spill] sm:$0xff] }
 0x20c   : > { %v1397_v35 = vadd.f32 %v1321_v2, %v962_v41  ;;  %v964_v33 = vpop.f32.mrf.mxu1  ;;  %v2059_v2 = vsel %vm578_vm0, %v2056_v31, %v2058_v50  ;;  %v3094_v31 = vrot.slane %v6307_v30, 6 }
 0x20d   : > { %v1953_v8 = vpop.f32.mrf.mxu0  ;;  %v965_v4 = vadd.f32 %v964_v33, %v6309_v45 }
 0x20e   : > { %v1621_v60 = vadd.f32 %v1545_v44, %v1397_v35  ;;  %v1548_v14 = vpop.f32.mrf.mxu3  ;;  %v3093_v35 = vsel %vm3084_vm6, %v3090_v37, %v3092_v3 }
 0x20f   : > { %3976 = vmatmul.msk.f32.gmra.mxu1 %vm481_vm2, %v2053_v27 }
 0x210   : > { %v5393_v39 = vadd.f32 %v1953_v8, %v1621_v60  ;;  %4026 = vmatmul.msk.f32.gmra.mxu2 %vm481_vm2, %v2057_v11  ;;  %4125 = vmatmul.msk.f32.gmra.mxu0 %vm481_vm2, %v3091_v15  ;;  %v6310_v8 = vld [vmem:[#allocation22_spill] sm:$0xff] }
 0x211   : > { %v2688_v15 = vrot.slane %v6310_v8, 5  ;;  %v2060_v29 = vrot.slane %v6310_v8, 4 }
 0x212   : > { %6308 = vst [vmem:[#allocation5_spill] sm:$0xff] %v5393_v39 }
 0x213   : > { %v1324_v62 = vpop.f32.mrf.mxu2  ;;  %4077 = vmatmul.msk.f32.gmra.mxu3 %vm481_vm2, %v2687_v16  ;;  %v2689_v33 = vsel %vm2676_vm5, %v2686_v32, %v2688_v15  ;;  %v6312_v16 = vld [vmem:[#allocation53_spill] sm:$0xff] }
 0x214   : > { %v1398_v41 = vadd.f32 %v1324_v62, %v965_v4  ;;  %v967_v44 = vpop.f32.mrf.mxu1  ;;  %v2061_v62 = vsel %vm578_vm0, %v2058_v50, %v2060_v29  ;;  %v3096_v50 = vrot.slane %v6310_v8, 6 }
 0x215   : > { %v1956_v27 = vpop.f32.mrf.mxu0  ;;  %v968_v37 = vadd.f32 %v967_v44, %v6312_v16 }
 0x216   : > { %v1622_v60 = vadd.f32 %v1548_v14, %v1398_v41  ;;  %v1551_v24 = vpop.f32.mrf.mxu3  ;;  %v3095_v41 = vsel %vm3084_vm6, %v3092_v3, %v3094_v31 }
 0x217   : > { %3977 = vmatmul.msk.f32.gmra.mxu1 %vm481_vm2, %v2055_v20 }
 0x218   : > { %v5406_v39 = vadd.f32 %v1956_v27, %v1622_v60  ;;  %4027 = vmatmul.msk.f32.gmra.mxu2 %vm481_vm2, %v2059_v2  ;;  %4126 = vmatmul.msk.f32.gmra.mxu0 %vm481_vm2, %v3093_v35  ;;  %v6313_v27 = vld [vmem:[#allocation24_spill] sm:$0xff] }
 0x219   : > { %v2690_v35 = vrot.slane %v6313_v27, 5  ;;  %v2062_v30 = vrot.slane %v6313_v27, 4 }
 0x21a   : > { %6311 = vst [vmem:[#allocation8_spill] sm:$0xff] %v5406_v39 }
 0x21b   : > { %v1327_v45 = vpop.f32.mrf.mxu2  ;;  %4078 = vmatmul.msk.f32.gmra.mxu3 %vm481_vm2, %v2689_v33  ;;  %v2691_v44 = vsel %vm2676_vm5, %v2688_v15, %v2690_v35  ;;  %v6315_v33 = vld [vmem:[#allocation28_spill] sm:$0xff] }
 0x21c   : > { %v1399_v4 = vadd.f32 %v1327_v45, %v968_v37  ;;  %v970_v14 = vpop.f32.mrf.mxu1  ;;  %v2063_v45 = vsel %vm578_vm0, %v2060_v29, %v2062_v30  ;;  %v3098_v29 = vrot.slane %v6313_v27, 6 }
 0x21d   : > { %v1959_v20 = vpop.f32.mrf.mxu0  ;;  %v971_v3 = vadd.f32 %v970_v14, %v6315_v33 }
 0x21e   : > { %v1623_v60 = vadd.f32 %v1551_v24, %v1399_v4  ;;  %v1554_v32 = vpop.f32.mrf.mxu3  ;;  %v3097_v4 = vsel %vm3084_vm6, %v3094_v31, %v3096_v50 }
 0x21f   : > { %3978 = vmatmul.msk.f32.gmra.mxu1 %vm481_vm2, %v2057_v11 }
 0x220   : > { %v5419_v39 = vadd.f32 %v1959_v20, %v1623_v60  ;;  %4028 = vmatmul.msk.f32.gmra.mxu2 %vm481_vm2, %v2061_v62  ;;  %4127 = vmatmul.msk.f32.gmra.mxu0 %vm481_vm2, %v3095_v41  ;;  %v6316_v20 = vld [vmem:[#allocation26_spill] sm:$0xff] }
 0x221   : > { %v2692_v41 = vrot.slane %v6316_v20, 5  ;;  %v2064_v8 = vrot.slane %v6316_v20, 4 }
 0x222   : > { %6314 = vst [vmem:[#allocation39_spill] sm:$0xff] %v5419_v39 }
 0x223   : > { %v1330_v16 = vpop.f32.mrf.mxu2  ;;  %4079 = vmatmul.msk.f32.gmra.mxu3 %vm481_vm2, %v2691_v44  ;;  %v2693_v14 = vsel %vm2676_vm5, %v2690_v35, %v2692_v41  ;;  %v6318_v44 = vld [vmem:[#allocation30_spill] sm:$0xff] }
 0x224   : > { %v1400_v37 = vadd.f32 %v1330_v16, %v971_v3  ;;  %v973_v24 = vpop.f32.mrf.mxu1  ;;  %v2065_v16 = vsel %vm578_vm0, %v2062_v30, %v2064_v8  ;;  %v3100_v30 = vrot.slane %v6316_v20, 6 }
 0x225   : > { %v1962_v11 = vpop.f32.mrf.mxu0  ;;  %v974_v31 = vadd.f32 %v973_v24, %v6318_v44 }
 0x226   : > { %v1624_v60 = vadd.f32 %v1554_v32, %v1400_v37  ;;  %v1557_v15 = vpop.f32.mrf.mxu3  ;;  %v3099_v37 = vsel %vm3084_vm6, %v3096_v50, %v3098_v29 }
 0x227   : > { %3979 = vmatmul.msk.f32.gmra.mxu1 %vm481_vm2, %v2059_v2 }
 0x228   : > { %v5432_v39 = vadd.f32 %v1962_v11, %v1624_v60  ;;  %4029 = vmatmul.msk.f32.gmra.mxu2 %vm481_vm2, %v2063_v45  ;;  %4128 = vmatmul.msk.f32.gmra.mxu0 %vm481_vm2, %v3097_v4  ;;  %v6319_v11 = vld [vmem:[#allocation2_spill] sm:$0xff] }
 0x229   : > { %v2694_v4 = vrot.slane %v6319_v11, 5  ;;  %v2066_v27 = vrot.slane %v6319_v11, 4 }
 0x22a   : > { %6317 = vst [vmem:[#allocation14_spill] sm:$0xff] %v5432_v39 }
 0x22b   : > { %v1333_v33 = vpop.f32.mrf.mxu2  ;;  %4080 = vmatmul.msk.f32.gmra.mxu3 %vm481_vm2, %v2693_v14  ;;  %v2695_v24 = vsel %vm2676_vm5, %v2692_v41, %v2694_v4  ;;  %v6321_v14 = vld [vmem:[#allocation32_spill] sm:$0xff] }
 0x22c   : > { %v1401_v3 = vadd.f32 %v1333_v33, %v974_v31  ;;  %v976_v32 = vpop.f32.mrf.mxu1  ;;  %v2067_v33 = vsel %vm578_vm0, %v2064_v8, %v2066_v27  ;;  %v3102_v8 = vrot.slane %v6319_v11, 6 }
 0x22d   : > { %v1965_v2 = vpop.f32.mrf.mxu0  ;;  %v977_v50 = vadd.f32 %v976_v32, %v6321_v14 }
 0x22e   : > { %v1625_v60 = vadd.f32 %v1557_v15, %v1401_v3  ;;  %v1560_v35 = vpop.f32.mrf.mxu3  ;;  %v3101_v3 = vsel %vm3084_vm6, %v3098_v29, %v3100_v30 }
 0x22f   : > { %3980 = vmatmul.msk.f32.gmra.mxu1 %vm481_vm2, %v2061_v62 }
 0x230   : > { %v5445_v39 = vadd.f32 %v1965_v2, %v1625_v60  ;;  %4030 = vmatmul.msk.f32.gmra.mxu2 %vm481_vm2, %v2065_v16  ;;  %4129 = vmatmul.msk.f32.gmra.mxu0 %vm481_vm2, %v3099_v37  ;;  %v6322_v2 = vld [vmem:[#allocation3_spill] sm:$0xff] }
 0x231   : > { %v2696_v37 = vrot.slane %v6322_v2, 5  ;;  %v2068_v20 = vrot.slane %v6322_v2, 4 }
 0x232   : > { %6320 = vst [vmem:[#allocation41_spill] sm:$0xff] %v5445_v39 }
 0x233   : > { %v1336_v44 = vpop.f32.mrf.mxu2  ;;  %4081 = vmatmul.msk.f32.gmra.mxu3 %vm481_vm2, %v2695_v24  ;;  %v2697_v32 = vsel %vm2676_vm5, %v2694_v4, %v2696_v37  ;;  %v6324_v24 = vld [vmem:[#allocation34_spill] sm:$0xff] }
 0x234   : > { %v1402_v31 = vadd.f32 %v1336_v44, %v977_v50  ;;  %v979_v15 = vpop.f32.mrf.mxu1  ;;  %v2069_v44 = vsel %vm578_vm0, %v2066_v27, %v2068_v20  ;;  %v3104_v27 = vrot.slane %v6322_v2, 6 }
 0x235   : > { %v1968_v62 = vpop.f32.mrf.mxu0  ;;  %v980_v29 = vadd.f32 %v979_v15, %v6324_v24 }
 0x236   : > { %v1626_v60 = vadd.f32 %v1560_v35, %v1402_v31  ;;  %v1563_v41 = vpop.f32.mrf.mxu3  ;;  %v3103_v31 = vsel %vm3084_vm6, %v3100_v30, %v3102_v8 }
 0x237   : > { %3981 = vmatmul.msk.f32.gmra.mxu1 %vm481_vm2, %v2063_v45 }
 0x238   : > { %v5458_v39 = vadd.f32 %v1968_v62, %v1626_v60  ;;  %4031 = vmatmul.msk.f32.gmra.mxu2 %vm481_vm2, %v2067_v33  ;;  %4130 = vmatmul.msk.f32.gmra.mxu0 %vm481_vm2, %v3101_v3  ;;  %v6325_v62 = vld [vmem:[#allocation4_spill] sm:$0xff] }
 0x239   : > { %v2698_v3 = vrot.slane %v6325_v62, 5  ;;  %v2070_v11 = vrot.slane %v6325_v62, 4 }
 0x23a   : > { %6323 = vst [vmem:[#allocation16_spill] sm:$0xff] %v5458_v39 }
 0x23b   : > { %v1339_v14 = vpop.f32.mrf.mxu2  ;;  %4082 = vmatmul.msk.f32.gmra.mxu3 %vm481_vm2, %v2697_v32  ;;  %v2699_v15 = vsel %vm2676_vm5, %v2696_v37, %v2698_v3  ;;  %v6327_v32 = vld [vmem:[#allocation36_spill] sm:$0xff] }
 0x23c   : > { %v1403_v50 = vadd.f32 %v1339_v14, %v980_v29  ;;  %v982_v35 = vpop.f32.mrf.mxu1  ;;  %v2071_v14 = vsel %vm578_vm0, %v2068_v20, %v2070_v11  ;;  %v3106_v20 = vrot.slane %v6325_v62, 6  ;;  %v2074_v62 = vrot.slane %v4474_v53, 4 }
 0x23d   : > { %v1971_v45 = vpop.f32.mrf.mxu0  ;;  %v983_v30 = vadd.f32 %v982_v35, %v6327_v32 }
 0x23e   : > { %v1627_v60 = vadd.f32 %v1563_v41, %v1403_v50  ;;  %v1566_v4 = vpop.f32.mrf.mxu3  ;;  %v3105_v50 = vsel %vm3084_vm6, %v3102_v8, %v3104_v27 }
 0x23f   : > { %3982 = vmatmul.msk.f32.gmra.mxu1 %vm481_vm2, %v2065_v16 }
 0x240   : > { %v5471_v39 = vadd.f32 %v1971_v45, %v1627_v60  ;;  %4032 = vmatmul.msk.f32.gmra.mxu2 %vm481_vm2, %v2069_v44  ;;  %4131 = vmatmul.msk.f32.gmra.mxu0 %vm481_vm2, %v3103_v31  ;;  %v6328_v45 = vld [vmem:[#allocation7_spill] sm:$0xff] }
 0x241   : > { %v2700_v31 = vrot.slane %v6328_v45, 5  ;;  %v2072_v2 = vrot.slane %v6328_v45, 4 }
 0x242   : > { %6326 = vst [vmem:[#allocation44_spill] sm:$0xff] %v5471_v39 }
 0x243   : > { %v1342_v24 = vpop.f32.mrf.mxu2  ;;  %4083 = vmatmul.msk.f32.gmra.mxu3 %vm481_vm2, %v2699_v15  ;;  %v2701_v35 = vsel %vm2676_vm5, %v2698_v3, %v2700_v31  ;;  %v6329_v15 = vld [vmem:[#allocation38_spill] sm:$0xff] }
 0x244   : > { %v1404_v29 = vadd.f32 %v1342_v24, %v983_v30  ;;  %v985_v41 = vpop.f32.mrf.mxu1  ;;  %v2073_v24 = vsel %vm578_vm0, %v2070_v11, %v2072_v2  ;;  %v3108_v11 = vrot.slane %v6328_v45, 6  ;;  %v2076_v45 = vrot.slane %v4497_v13, 4 }
 0x245   : > { %v1974_v16 = vpop.f32.mrf.mxu0  ;;  %v986_v8 = vadd.f32 %v985_v41, %v6329_v15 }
 0x246   : > { %v1628_v60 = vadd.f32 %v1566_v4, %v1404_v29  ;;  %v1569_v37 = vpop.f32.mrf.mxu3  ;;  %v3107_v29 = vsel %vm3084_vm6, %v3104_v27, %v3106_v20 }
 0x247   : > { %3983 = vmatmul.msk.f32.gmra.mxu1 %vm481_vm2, %v2067_v33 }
 0x248   : > { %v5484_v39 = vadd.f32 %v1974_v16, %v1628_v60  ;;  %4033 = vmatmul.msk.f32.gmra.mxu2 %vm481_vm2, %v2071_v14  ;;  %4132 = vmatmul.msk.f32.gmra.mxu0 %vm481_vm2, %v3105_v50  ;;  %v2702_v16 = vrot.slane %v4474_v53, 5 }
 0x24a   : > { %v2703_v41 = vsel %vm2676_vm5, %v2700_v31, %v2702_v16 }
 0x24b   : > { %v1345_v32 = vpop.f32.mrf.mxu2  ;;  %4084 = vmatmul.msk.f32.gmra.mxu3 %vm481_vm2, %v2701_v35  ;;  %v6331_v35 = vld [vmem:[#allocation40_spill] sm:$0xff] }
 0x24c   : > { %v1405_v30 = vadd.f32 %v1345_v32, %v986_v8  ;;  %v988_v4 = vpop.f32.mrf.mxu1  ;;  %v2075_v32 = vsel %vm578_vm0, %v2072_v2, %v2074_v62  ;;  %v3110_v2 = vrot.slane %v4474_v53, 6  ;;  %v2078_v53 = vrot.slane %v4518_v34, 4 }
 0x24d   : > { %v1977_v33 = vpop.f32.mrf.mxu0  ;;  %v989_v27 = vadd.f32 %v988_v4, %v6331_v35 }
 0x24e   : > { %v1629_v50 = vadd.f32 %v1569_v37, %v1405_v30  ;;  %v1572_v3 = vpop.f32.mrf.mxu3  ;;  %v3109_v30 = vsel %vm3084_vm6, %v3106_v20, %v3108_v11 }
 0x24f   : > { %3984 = vmatmul.msk.f32.gmra.mxu1 %vm481_vm2, %v2069_v44 }
 0x250   : > { %v5497_v60 = vadd.f32 %v1977_v33, %v1629_v50  ;;  %4034 = vmatmul.msk.f32.gmra.mxu2 %vm481_vm2, %v2073_v24  ;;  %4133 = vmatmul.msk.f32.gmra.mxu0 %vm481_vm2, %v3107_v29  ;;  %v2704_v33 = vrot.slane %v4497_v13, 5 }
 0x252   : > { %6330 = vst [vmem:[#allocation18_spill] sm:$0xff] %v5497_v60  ;;  %v2705_v4 = vsel %vm2676_vm5, %v2702_v16, %v2704_v33 }
 0x253   : > { %v1348_v15 = vpop.f32.mrf.mxu2  ;;  %4085 = vmatmul.msk.f32.gmra.mxu3 %vm481_vm2, %v2703_v41  ;;  %v6333_v41 = vld [vmem:[#allocation43_spill] sm:$0xff] }
 0x254   : > { %v1406_v8 = vadd.f32 %v1348_v15, %v989_v27  ;;  %v991_v37 = vpop.f32.mrf.mxu1  ;;  %v2077_v15 = vsel %vm578_vm0, %v2074_v62, %v2076_v45  ;;  %v3112_v62 = vrot.slane %v4497_v13, 6  ;;  %v2080_v13 = vrot.slane %v4541_v56, 4 }
 0x255   : > { %v1980_v44 = vpop.f32.mrf.mxu0  ;;  %v992_v20 = vadd.f32 %v991_v37, %v6333_v41 }
 0x256   : > { %v1630_v29 = vadd.f32 %v1572_v3, %v1406_v8  ;;  %v1575_v31 = vpop.f32.mrf.mxu3  ;;  %v3111_v8 = vsel %vm3084_vm6, %v3108_v11, %v3110_v2 }
 0x257   : > { %3985 = vmatmul.msk.f32.gmra.mxu1 %vm481_vm2, %v2071_v14 }
 0x258   : > { %v5510_v50 = vadd.f32 %v1980_v44, %v1630_v29  ;;  %4035 = vmatmul.msk.f32.gmra.mxu2 %vm481_vm2, %v2075_v32  ;;  %4134 = vmatmul.msk.f32.gmra.mxu0 %vm481_vm2, %v3109_v30  ;;  %v2706_v44 = vrot.slane %v4518_v34, 5 }
 0x25a   : > { %6332 = vst [vmem:[#allocation47_spill] sm:$0xff] %v5510_v50  ;;  %v2707_v37 = vsel %vm2676_vm5, %v2704_v33, %v2706_v44 }
 0x25b   : > { %v1351_v35 = vpop.f32.mrf.mxu2  ;;  %4086 = vmatmul.msk.f32.gmra.mxu3 %vm481_vm2, %v2705_v4  ;;  %v6334_v4 = vld [vmem:[#allocation46_spill] sm:$0xff] }
 0x25c   : > { %v1407_v27 = vadd.f32 %v1351_v35, %v992_v20  ;;  %v994_v3 = vpop.f32.mrf.mxu1  ;;  %v2079_v35 = vsel %vm578_vm0, %v2076_v45, %v2078_v53  ;;  %v3114_v45 = vrot.slane %v4518_v34, 6  ;;  %v2082_v34 = vrot.slane %v4562_v23, 4 }
 0x25d   : > { %v1983_v14 = vpop.f32.mrf.mxu0  ;;  %v995_v11 = vadd.f32 %v994_v3, %v6334_v4 }
 0x25e   : > { %v1631_v30 = vadd.f32 %v1575_v31, %v1407_v27  ;;  %v1578_v16 = vpop.f32.mrf.mxu3  ;;  %v3113_v27 = vsel %vm3084_vm6, %v3110_v2, %v3112_v62 }
 0x25f   : > { %3986 = vmatmul.msk.f32.gmra.mxu1 %vm481_vm2, %v2073_v24 }
 0x260   : > { %v5523_v29 = vadd.f32 %v1983_v14, %v1631_v30  ;;  %4036 = vmatmul.msk.f32.gmra.mxu2 %vm481_vm2, %v2077_v15  ;;  %4135 = vmatmul.msk.f32.gmra.mxu0 %vm481_vm2, %v3111_v8  ;;  %v2708_v14 = vrot.slane %v4541_v56, 5 }
 0x262   : > { %v2709_v3 = vsel %vm2676_vm5, %v2706_v44, %v2708_v14 }
 0x263   : > { %v1354_v41 = vpop.f32.mrf.mxu2  ;;  %4087 = vmatmul.msk.f32.gmra.mxu3 %vm481_vm2, %v2707_v37  ;;  %v6335_v37 = vld [vmem:[#allocation49_spill] sm:$0xff] }
 0x264   : > { %v1408_v20 = vadd.f32 %v1354_v41, %v995_v11  ;;  %v997_v31 = vpop.f32.mrf.mxu1  ;;  %v2081_v41 = vsel %vm578_vm0, %v2078_v53, %v2080_v13  ;;  %v3116_v53 = vrot.slane %v4541_v56, 6  ;;  %v2084_v56 = vrot.slane %v4585_v52, 4 }
 0x265   : > { %v1986_v24 = vpop.f32.mrf.mxu0  ;;  %v998_v2 = vadd.f32 %v997_v31, %v6335_v37 }
 0x266   : > { %v1632_v8 = vadd.f32 %v1578_v16, %v1408_v20  ;;  %v1581_v33 = vpop.f32.mrf.mxu3  ;;  %v3115_v20 = vsel %vm3084_vm6, %v3112_v62, %v3114_v45 }
 0x267   : > { %3987 = vmatmul.msk.f32.gmra.mxu1 %vm481_vm2, %v2075_v32 }
 0x268   : > { %v5536_v30 = vadd.f32 %v1986_v24, %v1632_v8  ;;  %4037 = vmatmul.msk.f32.gmra.mxu2 %vm481_vm2, %v2079_v35  ;;  %4136 = vmatmul.msk.f32.gmra.mxu0 %vm481_vm2, %v3113_v27  ;;  %v2710_v24 = vrot.slane %v4562_v23, 5 }
 0x26a   : > { %v2711_v31 = vsel %vm2676_vm5, %v2708_v14, %v2710_v24 }
 0x26b   : > { %v1357_v4 = vpop.f32.mrf.mxu2  ;;  %4088 = vmatmul.msk.f32.gmra.mxu3 %vm481_vm2, %v2709_v3  ;;  %v6336_v3 = vld [vmem:[#allocation52_spill] sm:$0xff] }
 0x26c   : > { %v1409_v11 = vadd.f32 %v1357_v4, %v998_v2  ;;  %v1000_v16 = vpop.f32.mrf.mxu1  ;;  %v2083_v4 = vsel %vm578_vm0, %v2080_v13, %v2082_v34  ;;  %v3118_v13 = vrot.slane %v4562_v23, 6  ;;  %v2086_v23 = vrot.slane %v4614_v51, 4 }
 0x26d   : > { %v1989_v32 = vpop.f32.mrf.mxu0  ;;  %v1001_v62 = vadd.f32 %v1000_v16, %v6336_v3 }
 0x26e   : > { %v1633_v27 = vadd.f32 %v1581_v33, %v1409_v11  ;;  %v1584_v44 = vpop.f32.mrf.mxu3  ;;  %v3117_v11 = vsel %vm3084_vm6, %v3114_v45, %v3116_v53 }
 0x26f   : > { %3988 = vmatmul.msk.f32.gmra.mxu1 %vm481_vm2, %v2077_v15 }
 0x270   : > { %v5549_v8 = vadd.f32 %v1989_v32, %v1633_v27  ;;  %4038 = vmatmul.msk.f32.gmra.mxu2 %vm481_vm2, %v2081_v41  ;;  %4137 = vmatmul.msk.f32.gmra.mxu0 %vm481_vm2, %v3115_v20  ;;  %v2712_v32 = vrot.slane %v4585_v52, 5 }
 0x272   : > { %v2713_v16 = vsel %vm2676_vm5, %v2710_v24, %v2712_v32 }
 0x273   : > { %v1360_v37 = vpop.f32.mrf.mxu2  ;;  %4089 = vmatmul.msk.f32.gmra.mxu3 %vm481_vm2, %v2711_v31 }
 0x274   : > { %v1410_v2 = vadd.f32 %v1360_v37, %v1001_v62  ;;  %v2258_v33 = vpop.f32.mrf.mxu1  ;;  %v2085_v62 = vsel %vm578_vm0, %v2082_v34, %v2084_v56  ;;  %v3119_v37 = vsel %vm3084_vm6, %v3116_v53, %v3118_v13  ;;  %v3120_v34 = vrot.slane %v4585_v52, 6 }
 0x275   : > { %v1992_v15 = vpop.f32.mrf.mxu0  ;;  %v2402_v45 = vadd.f32 %v2258_v33, %v4952_v61  ;;  %v2088_v52 = vrot.slane %v4640_v7, 4 }
 0x276   : > { %v1634_v20 = vadd.f32 %v1584_v44, %v1410_v2  ;;  %v2890_v14 = vpop.f32.mrf.mxu3  ;;  %v2714_v2 = vrot.slane %v4614_v51, 5 }
 0x277   : > { %3989 = vmatmul.msk.f32.gmra.mxu1 %vm481_vm2, %v2079_v35 }
 0x278   : > { %v5562_v27 = vadd.f32 %v1992_v15, %v1634_v20  ;;  %4039 = vmatmul.msk.f32.gmra.mxu2 %vm481_vm2, %v2083_v4  ;;  %4138 = vmatmul.msk.f32.gmra.mxu0 %vm481_vm2, %v3117_v11  ;;  %v2715_v61 = vsel %vm2676_vm5, %v2712_v32, %v2714_v2 }
 0x27b   : > { %v2482_v31 = vpop.f32.mrf.mxu2  ;;  %4090 = vmatmul.msk.f32.gmra.mxu3 %vm481_vm2, %v2713_v16  ;;  %v2087_v16 = vsel %vm578_vm0, %v2084_v56, %v2086_v23  ;;  %v3122_v56 = vrot.slane %v4614_v51, 6  ;;  %v2090_v51 = vrot.slane %v4396_v6, 4 }
 0x27c   : > { %v2626_v3 = vadd.f32 %v2482_v31, %v2402_v45  ;;  %v2261_v44 = vpop.f32.mrf.mxu1  ;;  %v3121_v45 = vsel %vm3084_vm6, %v3118_v13, %v3120_v34  ;;  %v2716_v31 = vrot.slane %v4640_v7, 5 }
 0x27d   : > { %v3298_v35 = vpop.f32.mrf.mxu0  ;;  %v2403_v53 = vadd.f32 %v2261_v44, %v4964_v12 }
 0x27e   : > { %v3034_v15 = vadd.f32 %v2890_v14, %v2626_v3  ;;  %v2893_v24 = vpop.f32.mrf.mxu3  ;;  %v2717_v12 = vsel %vm2676_vm5, %v2714_v2, %v2716_v31 }
 0x27f   : > { %3990 = vmatmul.msk.f32.gmra.mxu1 %vm481_vm2, %v2081_v41 }
 0x280   : > { %v5575_v11 = vadd.f32 %v3298_v35, %v3034_v15  ;;  %4040 = vmatmul.msk.f32.gmra.mxu2 %vm481_vm2, %v2085_v62  ;;  %4139 = vmatmul.msk.f32.gmra.mxu0 %vm481_vm2, %v3119_v37 }
 0x283   : > { %v2485_v33 = vpop.f32.mrf.mxu2  ;;  %4091 = vmatmul.msk.f32.gmra.mxu3 %vm481_vm2, %v2715_v61  ;;  %v3123_v61 = vsel %vm3084_vm6, %v3120_v34, %v3122_v56 }
 0x284   : > { %v2627_v20 = vadd.f32 %v2485_v33, %v2403_v53  ;;  %v2264_v14 = vpop.f32.mrf.mxu1  ;;  %v2718_v53 = vrot.slane %v4396_v6, 5 }
 0x285   : > { %v3301_v41 = vpop.f32.mrf.mxu0  ;;  %v2404_v13 = vadd.f32 %v2264_v14, %v4976_v40 }
 0x286   : > { %v3035_v3 = vadd.f32 %v2893_v24, %v2627_v20  ;;  %v2896_v32 = vpop.f32.mrf.mxu3  ;;  %v2089_v24 = vsel %vm578_vm0, %v2086_v23, %v2088_v52  ;;  %v2719_v40 = vsel %vm2676_vm5, %v2716_v31, %v2718_v53  ;;  %v3124_v23 = vrot.slane %v4640_v7, 6 }
 0x287   : > { %3991 = vmatmul.msk.f32.gmra.mxu1 %vm481_vm2, %v2083_v4  ;;  %v2092_v7 = vrot.slane %v4400_v9, 4 }
 0x288   : > { %v5588_v35 = vadd.f32 %v3301_v41, %v3035_v3  ;;  %4041 = vmatmul.msk.f32.gmra.mxu2 %vm481_vm2, %v2087_v16  ;;  %4140 = vmatmul.msk.f32.gmra.mxu0 %vm481_vm2, %v3121_v45  ;;  %v2091_v3 = vsel %vm578_vm0, %v2088_v52, %v2090_v51  ;;  %v3126_v52 = vrot.slane %v4396_v6, 6  ;;  %v2094_v6 = vrot.slane %v4415_v18, 4 }
 0x28b   : > { %v2488_v44 = vpop.f32.mrf.mxu2  ;;  %4092 = vmatmul.msk.f32.gmra.mxu3 %vm481_vm2, %v2717_v12  ;;  %v2720_v12 = vrot.slane %v4400_v9, 5 }
 0x28c   : > { %v2628_v37 = vadd.f32 %v2488_v44, %v2404_v13  ;;  %v2267_v15 = vpop.f32.mrf.mxu1 }
 0x28d   : > { %v3304_v4 = vpop.f32.mrf.mxu0  ;;  %v2405_v34 = vadd.f32 %v2267_v15, %v4988_v0  ;;  %v2721_v0 = vsel %vm2676_vm5, %v2718_v53, %v2720_v12 }
 0x28e   : > { %v3036_v33 = vadd.f32 %v2896_v32, %v2628_v37  ;;  %v2899_v2 = vpop.f32.mrf.mxu3  ;;  %v3125_v32 = vsel %vm3084_vm6, %v3122_v56, %v3124_v23 }
 0x28f   : > { %3992 = vmatmul.msk.f32.gmra.mxu1 %vm481_vm2, %v2085_v62 }
 0x290   : > { %v5601_v20 = vadd.f32 %v3304_v4, %v3036_v33  ;;  %4042 = vmatmul.msk.f32.gmra.mxu2 %vm481_vm2, %v2089_v24  ;;  %4141 = vmatmul.msk.f32.gmra.mxu0 %vm481_vm2, %v3123_v61  ;;  %v2093_v61 = vsel %vm578_vm0, %v2090_v51, %v2092_v7  ;;  %v3127_v33 = vsel %vm3084_vm6, %v3124_v23, %v3126_v52  ;;  %v3128_v51 = vrot.slane %v4400_v9, 6 }
 0x291   : > { %v2096_v9 = vrot.slane %v4456_v42, 4 }
 0x293   : > { %v2491_v14 = vpop.f32.mrf.mxu2  ;;  %4093 = vmatmul.msk.f32.gmra.mxu3 %vm481_vm2, %v2719_v40 }
 0x294   : > { %v2629_v41 = vadd.f32 %v2491_v14, %v2405_v34  ;;  %v2270_v45 = vpop.f32.mrf.mxu1 }
 0x295   : > { %v3307_v62 = vpop.f32.mrf.mxu0  ;;  %v2406_v56 = vadd.f32 %v2270_v45, %v5000_v46 }
 0x296   : > { %v3037_v13 = vadd.f32 %v2899_v2, %v2629_v41  ;;  %v2902_v31 = vpop.f32.mrf.mxu3  ;;  %v2722_v2 = vrot.slane %v4415_v18, 5 }
 0x297   : > { %3993 = vmatmul.msk.f32.gmra.mxu1 %vm481_vm2, %v2087_v16 }
 0x298   : > { %v5614_v44 = vadd.f32 %v3307_v62, %v3037_v13  ;;  %4043 = vmatmul.msk.f32.gmra.mxu2 %vm481_vm2, %v2091_v3  ;;  %4142 = vmatmul.msk.f32.gmra.mxu0 %vm481_vm2, %v3125_v32  ;;  %v2723_v46 = vsel %vm2676_vm5, %v2720_v12, %v2722_v2  ;;  %v2095_v62 = vsel %vm578_vm0, %v2092_v7, %v2094_v6  ;;  %v2724_v13 = vrot.slane %v4456_v42, 5 }
 0x299   : > { %v3129_v32 = vsel %vm3084_vm6, %v3126_v52, %v3128_v51  ;;  %v3130_v7 = vrot.slane %v4415_v18, 6  ;;  %v2098_v18 = vrot.slane %v4476_v54, 4 }
 0x29b   : > { %v2494_v37 = vpop.f32.mrf.mxu2  ;;  %4094 = vmatmul.msk.f32.gmra.mxu3 %vm481_vm2, %v2721_v0 }
 0x29c   : > { %v2630_v15 = vadd.f32 %v2494_v37, %v2406_v56  ;;  %v2273_v4 = vpop.f32.mrf.mxu1 }
 0x29d   : > { %v3310_v16 = vpop.f32.mrf.mxu0  ;;  %v2407_v23 = vadd.f32 %v2273_v4, %v5012_v49  ;;  %v2725_v49 = vsel %vm2676_vm5, %v2722_v2, %v2724_v13  ;;  %v2097_v4 = vsel %vm578_vm0, %v2094_v6, %v2096_v9  ;;  %v3132_v6 = vrot.slane %v4456_v42, 6 }
 0x29e   : > { %v3038_v40 = vadd.f32 %v2902_v31, %v2630_v15  ;;  %v2905_v53 = vpop.f32.mrf.mxu3  ;;  %v2100_v42 = vrot.slane %v4500_v19, 4 }
 0x29f   : > { %3994 = vmatmul.msk.f32.gmra.mxu1 %vm481_vm2, %v2089_v24 }
 0x2a0   : > { %v5627_v34 = vadd.f32 %v3310_v16, %v3038_v40  ;;  %4044 = vmatmul.msk.f32.gmra.mxu2 %vm481_vm2, %v2093_v61  ;;  %4143 = vmatmul.msk.f32.gmra.mxu0 %vm481_vm2, %v3127_v33  ;;  %v3131_v16 = vsel %vm3084_vm6, %v3128_v51, %v3130_v7  ;;  %v2726_v33 = vrot.slane %v4476_v54, 5 }
 0x2a3   : > { %v2497_v14 = vpop.f32.mrf.mxu2  ;;  %4095 = vmatmul.msk.f32.gmra.mxu3 %vm481_vm2, %v2723_v46 }
 0x2a4   : > { %v2631_v41 = vadd.f32 %v2497_v14, %v2407_v23  ;;  %v2276_v45 = vpop.f32.mrf.mxu1 }
 0x2a5   : > { %v3313_v24 = vpop.f32.mrf.mxu0  ;;  %v2408_v52 = vadd.f32 %v2276_v45, %v5024_v1  ;;  %v2727_v1 = vsel %vm2676_vm5, %v2724_v13, %v2726_v33  ;;  %v3133_v45 = vsel %vm3084_vm6, %v3130_v7, %v3132_v6 }
 0x2a6   : > { %v3039_v31 = vadd.f32 %v2905_v53, %v2631_v41  ;;  %v2908_v12 = vpop.f32.mrf.mxu3  ;;  %v2099_v41 = vsel %vm578_vm0, %v2096_v9, %v2098_v18 }
 0x2a7   : > { %3995 = vmatmul.msk.f32.gmra.mxu1 %vm481_vm2, %v2091_v3 }
 0x2a8   : > { %v5640_v0 = vadd.f32 %v3313_v24, %v3039_v31  ;;  %4045 = vmatmul.msk.f32.gmra.mxu2 %vm481_vm2, %v2095_v62  ;;  %4144 = vmatmul.msk.f32.gmra.mxu0 %vm481_vm2, %v3129_v32  ;;  %v2728_v24 = vrot.slane %v4500_v19, 5 }
 0x2ab   : > { %v2500_v56 = vpop.f32.mrf.mxu2  ;;  %4096 = vmatmul.msk.f32.gmra.mxu3 %vm481_vm2, %v2725_v49 }
 0x2ac   : > { %v2632_v37 = vadd.f32 %v2500_v56, %v2408_v52  ;;  %v2279_v15 = vpop.f32.mrf.mxu1  ;;  %v2101_v56 = vsel %vm578_vm0, %v2098_v18, %v2100_v42 }
 0x2ad   : > { %v3316_v3 = vpop.f32.mrf.mxu0  ;;  %v2409_v46 = vadd.f32 %v2279_v15, %v5036_v47  ;;  %v2729_v47 = vsel %vm2676_vm5, %v2726_v33, %v2728_v24  ;;  %v2730_v15 = vrot.slane %v4520_v36, 5 }
 0x2ae   : > { %v3040_v40 = vadd.f32 %v2908_v12, %v2632_v37  ;;  %v2911_v2 = vpop.f32.mrf.mxu3  ;;  %v3134_v12 = vrot.slane %v4476_v54, 6  ;;  %v2102_v54 = vrot.slane %v4520_v36, 4 }
 0x2af   : > { %3996 = vmatmul.msk.f32.gmra.mxu1 %vm481_vm2, %v2093_v61 }
 0x2b0   : > { %v5653_v53 = vadd.f32 %v3316_v3, %v3040_v40  ;;  %4046 = vmatmul.msk.f32.gmra.mxu2 %vm481_vm2, %v2097_v4  ;;  %4145 = vmatmul.msk.f32.gmra.mxu0 %vm481_vm2, %v3131_v16  ;;  %v3135_v37 = vsel %vm3084_vm6, %v3132_v6, %v3134_v12  ;;  %v3136_v40 = vrot.slane %v4500_v19, 6 }
 0x2b3   : > { %v2503_v51 = vpop.f32.mrf.mxu2  ;;  %4097 = vmatmul.msk.f32.gmra.mxu3 %vm481_vm2, %v2727_v1 }
 0x2b4   : > { %v2633_v23 = vadd.f32 %v2503_v51, %v2409_v46  ;;  %v2282_v14 = vpop.f32.mrf.mxu1  ;;  %v2103_v46 = vsel %vm578_vm0, %v2100_v42, %v2102_v54  ;;  %v3137_v51 = vsel %vm3084_vm6, %v3134_v12, %v3136_v40  ;;  %v2734_v12 = vrot.slane %v4564_v26, 5 }
 0x2b5   : > { %v3319_v61 = vpop.f32.mrf.mxu0  ;;  %v2410_v9 = vadd.f32 %v2282_v14, %v5048_v5  ;;  %v2731_v5 = vsel %vm2676_vm5, %v2728_v24, %v2730_v15  ;;  %v3138_v24 = vrot.slane %v4520_v36, 6  ;;  %v2106_v36 = vrot.slane %v4564_v26, 4 }
 0x2b6   : > { %v3041_v32 = vadd.f32 %v2911_v2, %v2633_v23  ;;  %v2914_v13 = vpop.f32.mrf.mxu3  ;;  %v2732_v23 = vrot.slane %v4544_v59, 5 }
 0x2b7   : > { %3997 = vmatmul.msk.f32.gmra.mxu1 %vm481_vm2, %v2095_v62 }
 0x2b8   : > { %v5666_v31 = vadd.f32 %v3319_v61, %v3041_v32  ;;  %4047 = vmatmul.msk.f32.gmra.mxu2 %vm481_vm2, %v2099_v41  ;;  %4146 = vmatmul.msk.f32.gmra.mxu0 %vm481_vm2, %v3133_v45  ;;  %v2733_v45 = vsel %vm2676_vm5, %v2730_v15, %v2732_v23 }
 0x2bb   : > { %v2506_v49 = vpop.f32.mrf.mxu2  ;;  %4098 = vmatmul.msk.f32.gmra.mxu3 %vm481_vm2, %v2729_v47  ;;  %v3139_v47 = vsel %vm3084_vm6, %v3136_v40, %v3138_v24 }
 0x2bc   : > { %v2634_v7 = vadd.f32 %v2506_v49, %v2410_v9  ;;  %v2285_v52 = vpop.f32.mrf.mxu1  ;;  %v2735_v49 = vsel %vm2676_vm5, %v2732_v23, %v2734_v12 }
 0x2bd   : > { %v3322_v62 = vpop.f32.mrf.mxu0  ;;  %v2411_v2 = vadd.f32 %v2285_v52, %v5060_v57  ;;  %v2104_v57 = vrot.slane %v4544_v59, 4 }
 0x2be   : > { %v3042_v3 = vadd.f32 %v2914_v13, %v2634_v7  ;;  %v2917_v16 = vpop.f32.mrf.mxu3  ;;  %v3140_v7 = vrot.slane %v4544_v59, 6  ;;  %v2108_v59 = vrot.slane %v4588_v58, 4 }
 0x2bf   : > { %3998 = vmatmul.msk.f32.gmra.mxu1 %vm481_vm2, %v2097_v4  ;;  %v2105_v42 = vsel %vm578_vm0, %v2102_v54, %v2104_v57 }
 0x2c0   : > { %v5679_v33 = vadd.f32 %v3322_v62, %v3042_v3  ;;  %4048 = vmatmul.msk.f32.gmra.mxu2 %vm481_vm2, %v2101_v56  ;;  %4147 = vmatmul.msk.f32.gmra.mxu0 %vm481_vm2, %v3135_v37  ;;  %v3141_v15 = vsel %vm3084_vm6, %v3138_v24, %v3140_v7  ;;  %v2736_v3 = vrot.slane %v4588_v58, 5 }
 0x2c2   : > { %v2737_v54 = vsel %vm2676_vm5, %v2734_v12, %v2736_v3  ;;  %v2740_v12 = vrot.slane %v4644_v48, 5 }
 0x2c3   : > { %v2509_v18 = vpop.f32.mrf.mxu2  ;;  %4099 = vmatmul.msk.f32.gmra.mxu3 %vm481_vm2, %v2731_v5  ;;  %v3142_v5 = vrot.slane %v4564_v26, 6  ;;  %v2110_v26 = vrot.slane %v4616_v55, 4 }
 0x2c4   : > { %v2635_v1 = vadd.f32 %v2509_v18, %v2411_v2  ;;  %v5687_v6 = vpop.f32.mrf.mxu1 }
 0x2c5   : > { %v3325_v4 = vpop.f32.mrf.mxu0 }
 0x2c6   : > { %v3043_v14 = vadd.f32 %v2917_v16, %v2635_v1  ;;  %v5694_v61 = vpop.f32.mrf.mxu3  ;;  %v2109_v1 = vsel %vm578_vm0, %v2106_v36, %v2108_v59 }
 0x2c7   : > { %3999 = vmatmul.msk.f32.gmra.mxu1 %vm481_vm2, %v2099_v41 }
 0x2c8   : > { %v5696_v19 = vadd.f32 %v3325_v4, %v3043_v14  ;;  %4049 = vmatmul.msk.f32.gmra.mxu2 %vm481_vm2, %v2103_v46  ;;  %4148 = vmatmul.msk.f32.gmra.mxu0 %vm481_vm2, %v3137_v51  ;;  %v3143_v4 = vsel %vm3084_vm6, %v3140_v7, %v3142_v5  ;;  %v3144_v14 = vrot.slane %v4588_v58, 6  ;;  %v2112_v58 = vrot.slane %v4644_v48, 4 }
 0x2c9   : > { %v3146_v7 = vrot.slane %v4616_v55, 6 }
 0x2cb   : > { %v5703_v32 = vpop.f32.mrf.mxu2  ;;  %4100 = vmatmul.msk.f32.gmra.mxu3 %vm481_vm2, %v2733_v45 }
 0x2cc   : > { %v5705_v13 = vpop.f32.mrf.mxu1 }
 0x2cd   : > { %v5708_v41 = vpop.f32.mrf.mxu0 }
 0x2ce   : > { %v5714_v9 = vpop.f32.mrf.mxu3 }
 0x2cf   : > { %4000 = vmatmul.msk.f32.gmra.mxu1 %vm481_vm2, %v2101_v56  ;;  %v2107_v56 = vsel %vm578_vm0, %v2104_v57, %v2106_v36 }
 0x2d0   : > { %4050 = vmatmul.msk.f32.gmra.mxu2 %vm481_vm2, %v2105_v42  ;;  %4149 = vmatmul.msk.f32.gmra.mxu0 %vm481_vm2, %v3139_v47  ;;  %v2111_v47 = vsel %vm578_vm0, %v2108_v59, %v2110_v26 }
 0x2d3   : > { %v5721_v52 = vpop.f32.mrf.mxu2  ;;  %4101 = vmatmul.msk.f32.gmra.mxu3 %vm481_vm2, %v2735_v49 }
 0x2d4   : > { %v5723_v62 = vpop.f32.mrf.mxu1 }
 0x2d5   : > { %v5726_v37 = vpop.f32.mrf.mxu0 }
 0x2d6   : > { %v5732_v16 = vpop.f32.mrf.mxu3 }
 0x2d7   : > { %4001 = vmatmul.msk.f32.gmra.mxu1 %vm481_vm2, %v2103_v46  ;;  %v2738_v46 = vrot.slane %v4616_v55, 5  ;;  %v2114_v55 = vrot.slane %v4427_v25, 4 }
 0x2d8   : > { %4051 = vmatmul.msk.f32.gmra.mxu2 %vm481_vm2, %v2107_v56  ;;  %4150 = vmatmul.msk.f32.gmra.mxu0 %vm481_vm2, %v3141_v15 }
 0x2d9   : > { %v2739_v23 = vsel %vm2676_vm5, %v2736_v3, %v2738_v46  ;;  %v2741_v49 = vsel %vm2676_vm5, %v2738_v46, %v2740_v12 }
 0x2db   : > { %v2518_v40 = vpop.f32.mrf.mxu2  ;;  %4102 = vmatmul.msk.f32.gmra.mxu3 %vm481_vm2, %v2737_v54  ;;  %v2113_v54 = vsel %vm578_vm0, %v2110_v26, %v2112_v58  ;;  %v3148_v26 = vrot.slane %v4644_v48, 6 }
 0x2dc   : > { %v2297_v2 = vpop.f32.mrf.mxu1 }
 0x2dd   : > { %v5740_v18 = vpop.f32.mrf.mxu0  ;;  %v3149_v48 = vsel %vm3084_vm6, %v3146_v7, %v3148_v26 }
 0x2de   : > { %v2929_v51 = vpop.f32.mrf.mxu3 }
 0x2df   : > { %4002 = vmatmul.msk.f32.gmra.mxu1 %vm481_vm2, %v2105_v42  ;;  %v3145_v42 = vsel %vm3084_vm6, %v3142_v5, %v3144_v14  ;;  %v2742_v5 = vrot.slane %v4427_v25, 5 }
 0x2e0   : > { %4052 = vmatmul.msk.f32.gmra.mxu2 %vm481_vm2, %v2109_v1  ;;  %4151 = vmatmul.msk.f32.gmra.mxu0 %vm481_vm2, %v3143_v4 }
 0x2e1   : > { %v2743_v46 = vsel %vm2676_vm5, %v2740_v12, %v2742_v5 }
 0x2e3   : > { %v2521_v57 = vpop.f32.mrf.mxu2  ;;  %4103 = vmatmul.msk.f32.gmra.mxu3 %vm481_vm2, %v2739_v23 }
 0x2e4   : > { %v2300_v45 = vpop.f32.mrf.mxu1 }
 0x2e5   : > { %v3337_v24 = vpop.f32.mrf.mxu0  ;;  %v2416_v4 = vadd.f32 %v2300_v45, %v5120_v38 }
 0x2e6   : > { %v2932_v36 = vpop.f32.mrf.mxu3 }
 0x2e7   : > { %4003 = vmatmul.msk.f32.gmra.mxu1 %vm481_vm2, %v2107_v56  ;;  %v3147_v56 = vsel %vm3084_vm6, %v3144_v14, %v3146_v7  ;;  %v2415_v14 = vadd.f32 %v2297_v2, %v5108_v63  ;;  %v2744_v63 = vrot.slane %v4434_v28, 5 }
 0x2e8   : > { %4053 = vmatmul.msk.f32.gmra.mxu2 %vm481_vm2, %v2111_v47  ;;  %4152 = vmatmul.msk.f32.gmra.mxu0 %vm481_vm2, %v3145_v42 }
 0x2e9   : > { %v2639_v38 = vadd.f32 %v2521_v57, %v2415_v14 }
 0x2eb   : > { %v2524_v15 = vpop.f32.mrf.mxu2  ;;  %4104 = vmatmul.msk.f32.gmra.mxu3 %vm481_vm2, %v2741_v49  ;;  %v3047_v12 = vadd.f32 %v2929_v51, %v2639_v38 }
 0x2ec   : > { %v2303_v3 = vpop.f32.mrf.mxu1  ;;  %v2640_v42 = vadd.f32 %v2524_v15, %v2416_v4  ;;  %v2414_v15 = vadd.f32 %v5723_v62, %v5096_v17  ;;  %v5778_v4 = vsel %vm578_vm0, %v2112_v58, %v2114_v55  ;;  %v3150_v58 = vrot.slane %v4427_v25, 6 }
 0x2ed   : > { %v3340_v59 = vpop.f32.mrf.mxu0  ;;  %v2417_v49 = vadd.f32 %v2303_v3, %v5132_v22 }
 0x2ee   : > { %v2935_v23 = vpop.f32.mrf.mxu3  ;;  %v3048_v45 = vadd.f32 %v2932_v36, %v2640_v42  ;;  %v2638_v22 = vadd.f32 %v2518_v40, %v2414_v15  ;;  %v2413_v36 = vadd.f32 %v5705_v13, %v5084_v21  ;;  %v2116_v40 = vrot.slane %v4434_v28, 4 }
 0x2ef   : > { %4004 = vmatmul.msk.f32.gmra.mxu1 %vm481_vm2, %v2109_v1  ;;  %v3455_v42 = vadd.f32 %v3337_v24, %v3047_v12 }
 0x2f0   : > { %4054 = vmatmul.msk.f32.gmra.mxu2 %vm481_vm2, %v2113_v54  ;;  %4153 = vmatmul.msk.f32.gmra.mxu0 %vm481_vm2, %v3147_v56  ;;  %v3456_v17 = vadd.f32 %v3340_v59, %v3048_v45  ;;  %v2637_v3 = vadd.f32 %v5721_v52, %v2413_v36  ;;  %v3046_v59 = vadd.f32 %v5732_v16, %v2638_v22  ;;  %v6338_v52 = vld [vmem:[#allocation6_spill] sm:$0xff] }
 0x2f1   : > { %v2746_v38 = vrot.slane %v6338_v52, 5 }
 0x2f2   : > { %v3045_v45 = vadd.f32 %v5714_v9, %v2637_v3  ;;  %v3454_v15 = vadd.f32 %v5740_v18, %v3046_v59  ;;  %v3152_v9 = vrot.slane %v4434_v28, 6 }
 0x2f3   : > { %v2527_v60 = vpop.f32.mrf.mxu2  ;;  %4105 = vmatmul.msk.f32.gmra.mxu3 %vm481_vm2, %v2743_v46 }
 0x2f4   : > { %v2641_v1 = vadd.f32 %v2527_v60, %v2417_v49  ;;  %v2306_v50 = vpop.f32.mrf.mxu1  ;;  %v5786_v60 = vld [vmem:[%s6137_s2] ss:$0 sm:$0xff]  ;;  %v3453_v22 = vadd.f32 %v5726_v37, %v3045_v45  ;;  %v3153_v28 = vsel %vm3084_vm6, %v3150_v58, %v3152_v9 }
 0x2f5   : > { %v3343_v56 = vpop.f32.mrf.mxu0  ;;  %v2418_v7 = vadd.f32 %v2306_v50, %v5144_v10  ;;  %v3508_v46 = vadd.f32 %v5786_v60, %v3456_v17  ;;  %v2117_v10 = vsel %vm578_vm0, %v2114_v55, %v2116_v40  ;;  %v3151_v50 = vsel %vm3084_vm6, %v3148_v26, %v3150_v58 }
 0x2f6   : > { %v3049_v2 = vadd.f32 %v2935_v23, %v2641_v1  ;;  %v2938_v57 = vpop.f32.mrf.mxu3  ;;  %v2118_v26 = vrot.slane %v6338_v52, 4  ;;  %v3505_v3 = vadd.f32 %v5786_v60, %v3453_v22  ;;  %v3503_v45 = vadd.f32 %v5786_v60, %v5696_v19 }
 0x2f7   : > { %4005 = vmatmul.msk.f32.gmra.mxu1 %vm481_vm2, %v2111_v47  ;;  %v2745_v47 = vsel %vm2676_vm5, %v2742_v5, %v2744_v63  ;;  %v6337_v5 = vld [vmem:[#allocation54_spill] sm:$0xff]  ;;  %v3556_v55 = vmax.f32 %v3508_v46, 0.0  ;;  %v6341_v46 = vld [vmem:[#allocation56_spill] sm:$0xff]  ;;  %v3502_v19 = vadd.f32 %v5786_v60, %v5679_v33  ;;  %v3501_v33 = vadd.f32 %v5786_v60, %v5666_v31 }
 0x2f8   : > { %v3457_v62 = vadd.f32 %v3343_v56, %v3049_v2  ;;  %4055 = vmatmul.msk.f32.gmra.mxu2 %vm481_vm2, %v5778_v4  ;;  %4154 = vmatmul.msk.f32.gmra.mxu0 %vm481_vm2, %v3149_v48  ;;  %v2412_v25 = vadd.f32 %v5687_v6, %v6337_v5  ;;  %v3507_v6 = vadd.f32 %v5786_v60, %v3455_v42  ;;  %v6339_v48 = vld [vmem:[#allocation55_spill] sm:$0xff]  ;;  %v3154_v42 = vrot.slane %v6338_v52, 6 }
 0x2f9   : > { %v3553_v5 = vmax.f32 %v3505_v3, 0.0  ;;  %v3500_v31 = vadd.f32 %v5786_v60, %v5653_v53  ;;  %v3499_v53 = vadd.f32 %v5786_v60, %v5640_v0  ;;  %v3498_v0 = vadd.f32 %v5786_v60, %v5627_v34 }
 0x2fa   : > { %v3509_v51 = vadd.f32 %v5786_v60, %v3457_v62  ;;  %v2636_v24 = vadd.f32 %v5703_v32, %v2412_v25  ;;  %v2747_v32 = vsel %vm2676_vm5, %v2744_v63, %v2746_v38  ;;  %v3555_v62 = vmax.f32 %v3507_v6, 0.0 }
 0x2fb   : > { %v2530_v23 = vpop.f32.mrf.mxu2  ;;  %4106 = vmatmul.msk.f32.gmra.mxu3 %vm481_vm2, %v2745_v47  ;;  %v2119_v63 = vsel %vm578_vm0, %v2116_v40, %v2118_v26  ;;  %v6340_v47 = vld [vmem:[#allocation9_spill] sm:$0xff]  ;;  %v3497_v34 = vadd.f32 %v5786_v60, %v5614_v44  ;;  %v3496_v44 = vadd.f32 %v5786_v60, %v5601_v20  ;;  %v3495_v20 = vadd.f32 %v5786_v60, %v5588_v35 }
 0x2fc   : > { %v3557_v14 = vmax.f32 %v3509_v51, 0.0  ;;  %v2642_v21 = vadd.f32 %v2530_v23, %v2418_v7  ;;  %v2309_v13 = vpop.f32.mrf.mxu1  ;;  %v3044_v18 = vadd.f32 %v5694_v61, %v2636_v24  ;;  %v2748_v7 = vrot.slane %v6340_v47, 5 }
 0x2fd   : > { %v3346_v49 = vpop.f32.mrf.mxu0  ;;  %v2120_v58 = vrot.slane %v6340_v47, 4  ;;  %v3494_v35 = vadd.f32 %v5786_v60, %v5575_v11 }
 0x2fe   : > { %v3050_v16 = vadd.f32 %v2938_v57, %v2642_v21  ;;  %3597 = vmatpush.xpose.msrb.mxu1 %v3557_v14  ;;  %v2941_v1 = vpop.f32.mrf.mxu3  ;;  %v3506_v57 = vadd.f32 %v5786_v60, %v3454_v15  ;;  %v3452_v37 = vadd.f32 %v5708_v41, %v3044_v18  ;;  %v2749_v23 = vsel %vm2676_vm5, %v2746_v38, %v2748_v7 }
 0x2ff   : > { %4006 = vmatmul.msk.f32.gmra.mxu1 %vm481_vm2, %v2113_v54  ;;  %v2419_v54 = vadd.f32 %v2309_v13, %v6339_v48  ;;  %v3551_v18 = vmax.f32 %v3503_v45, 0.0  ;;  %v3542_v11 = vmax.f32 %v3494_v35, 0.0 }
 0x300   : > { %v5812_v56 = vadd.f32 %v3346_v49, %v3050_v16  ;;  %4056 = vmatmul.msk.f32.gmra.mxu2 %vm481_vm2, %v2117_v10  ;;  %4155 = vmatmul.msk.f32.gmra.mxu0 %vm481_vm2, %v3151_v50  ;;  %v3554_v40 = vmax.f32 %v3506_v57, 0.0  ;;  %v3504_v41 = vadd.f32 %v5786_v60, %v3452_v37  ;;  %v2121_v49 = vsel %vm578_vm0, %v2118_v26, %v2120_v58  ;;  %v6342_v16 = vld [vmem:[#allocation11_spill] sm:$0xff]  ;;  %v6345_v37 = vld [vmem:[#allocation58_spill] sm:$0xff] }
 0x301   : > { %v3155_v50 = vsel %vm3084_vm6, %v3152_v9, %v3154_v42  ;;  %v2750_v38 = vrot.slane %v6342_v16, 5  ;;  %v2122_v6 = vrot.slane %v6342_v16, 4  ;;  %v3156_v26 = vrot.slane %v6340_v47, 6 }
 0x302   : > { %3598 = vmatpush.xpose.msrb.mxu1 %v3556_v55  ;;  %v3552_v15 = vmax.f32 %v3504_v41, 0.0  ;;  %v3550_v47 = vmax.f32 %v3502_v19, 0.0 }
 0x303   : > { %v2533_v2 = vpop.f32.mrf.mxu2  ;;  %4107 = vmatmul.msk.f32.gmra.mxu3 %vm481_vm2, %v2747_v32  ;;  %v2751_v55 = vsel %vm2676_vm5, %v2748_v7, %v2750_v38  ;;  %v6343_v32 = vld [vmem:[#allocation57_spill] sm:$0xff]  ;;  %v2123_v22 = vsel %vm578_vm0, %v2120_v58, %v2122_v6  ;;  %v3157_v57 = vsel %vm3084_vm6, %v3154_v42, %v3156_v26 }
 0x304   : > { %v2643_v12 = vadd.f32 %v2533_v2, %v2419_v54  ;;  %v2312_v17 = vpop.f32.mrf.mxu1 }
 0x305   : > { %v3349_v36 = vpop.f32.mrf.mxu0 }
 0x306   : > { %v3051_v51 = vadd.f32 %v2941_v1, %v2643_v12  ;;  %3599 = vmatpush.xpose.msrb.mxu1 %v3555_v62  ;;  %v2944_v61 = vpop.f32.mrf.mxu3  ;;  %v6344_v12 = vld [vmem:[#allocation13_spill] sm:$0xff] }
 0x307   : > { %4007 = vmatmul.msk.f32.gmra.mxu1 %vm481_vm2, %v5778_v4  ;;  %v2420_v4 = vadd.f32 %v2312_v17, %v6341_v46  ;;  %v2752_v17 = vrot.slane %v6344_v12, 5  ;;  %v2124_v7 = vrot.slane %v6344_v12, 4 }
 0x308   : > { %v5831_v59 = vadd.f32 %v3349_v36, %v3051_v51  ;;  %4057 = vmatmul.msk.f32.gmra.mxu2 %vm481_vm2, %v2119_v63  ;;  %4156 = vmatmul.msk.f32.gmra.mxu0 %vm481_vm2, %v3153_v28 }
 0x309   : > { %v2753_v51 = vsel %vm2676_vm5, %v2750_v38, %v2752_v17  ;;  %v2125_v46 = vsel %vm578_vm0, %v2122_v6, %v2124_v7  ;;  %v3160_v38 = vrot.slane %v6344_v12, 6  ;;  %v3547_v6 = vmax.f32 %v3499_v53, 0.0 }
 0x30a   : > { %3600 = vmatpush.xpose.msrb.mxu1 %v3554_v40  ;;  %v3543_v53 = vmax.f32 %v3495_v20, 0.0 }
 0x30b   : > { %v2536_v14 = vpop.f32.mrf.mxu2  ;;  %4108 = vmatmul.msk.f32.gmra.mxu3 %vm481_vm2, %v2749_v23  ;;  %v3549_v23 = vmax.f32 %v3501_v33, 0.0 }
 0x30c   : > { %v2644_v21 = vadd.f32 %v2536_v14, %v2420_v4  ;;  %v2315_v13 = vpop.f32.mrf.mxu1  ;;  %v6346_v14 = vld [vmem:[#allocation15_spill] sm:$0xff] }
 0x30d   : > { %v3352_v25 = vpop.f32.mrf.mxu0  ;;  %v2421_v9 = vadd.f32 %v2315_v13, %v6343_v32  ;;  %v2754_v41 = vrot.slane %v6346_v14, 5  ;;  %v3162_v12 = vrot.slane %v6346_v14, 6 }
 0x30e   : > { %v3052_v24 = vadd.f32 %v2944_v61, %v2644_v21  ;;  %3601 = vmatpush.xpose.msrb.mxu1 %v3553_v5  ;;  %v2947_v52 = vpop.f32.mrf.mxu3  ;;  %v3158_v61 = vrot.slane %v6342_v16, 6 }
 0x30f   : > { %4008 = vmatmul.msk.f32.gmra.mxu1 %vm481_vm2, %v2117_v10  ;;  %v2755_v16 = vsel %vm2676_vm5, %v2752_v17, %v2754_v41  ;;  %v6349_v17 = vld [vmem:[#allocation45_spill] sm:$0xff] }
 0x310   : > { %v5847_v1 = vadd.f32 %v3352_v25, %v3052_v24  ;;  %4058 = vmatmul.msk.f32.gmra.mxu2 %vm481_vm2, %v2121_v49  ;;  %4157 = vmatmul.msk.f32.gmra.mxu0 %vm481_vm2, %v3155_v50  ;;  %v3159_v4 = vsel %vm3084_vm6, %v3156_v26, %v3158_v61  ;;  %v3548_v25 = vmax.f32 %v3500_v31, 0.0  ;;  %v2126_v50 = vrot.slane %v6346_v14, 4  ;;  %v6347_v24 = vld [vmem:[#allocation42_spill] sm:$0xff]  ;;  %v6351_v14 = vld [vmem:[#allocation48_spill] sm:$0xff] }
 0x311   : > { %v3161_v32 = vsel %vm3084_vm6, %v3158_v61, %v3160_v38  ;;  %v3163_v61 = vsel %vm3084_vm6, %v3160_v38, %v3162_v12  ;;  %v6352_v38 = vld [vmem:[#allocation21_spill] sm:$0xff] }
 0x312   : > { %3602 = vmatpush.xpose.msrb.mxu1 %v3552_v15  ;;  %v2127_v26 = vsel %vm578_vm0, %v2124_v7, %v2126_v50 }
 0x313   : > { %v2539_v10 = vpop.f32.mrf.mxu2  ;;  %4109 = vmatmul.msk.f32.gmra.mxu3 %vm481_vm2, %v2751_v55 }
 0x314   : > { %v2645_v48 = vadd.f32 %v2539_v10, %v2421_v9  ;;  %v2318_v54 = vpop.f32.mrf.mxu1  ;;  %v6348_v9 = vld [vmem:[#allocation17_spill] sm:$0xff] }
 0x315   : > { %v3355_v2 = vpop.f32.mrf.mxu0  ;;  %v2422_v3 = vadd.f32 %v2318_v54, %v6345_v37  ;;  %v2756_v10 = vrot.slane %v6348_v9, 5  ;;  %v6350_v37 = vld [vmem:[#allocation19_spill] sm:$0xff] }
 0x316   : > { %v3053_v62 = vadd.f32 %v2947_v52, %v2645_v48  ;;  %3603 = vmatpush.xpose.msrb.mxu1 %v3551_v18  ;;  %v2950_v36 = vpop.f32.mrf.mxu3  ;;  %v3546_v18 = vmax.f32 %v3498_v0, 0.0 }
 0x317   : > { %4009 = vmatmul.msk.f32.gmra.mxu1 %vm481_vm2, %v2119_v63 }
 0x318   : > { %v5864_v28 = vadd.f32 %v3355_v2, %v3053_v62  ;;  %4059 = vmatmul.msk.f32.gmra.mxu2 %vm481_vm2, %v2123_v22  ;;  %4158 = vmatmul.msk.f32.gmra.mxu0 %vm481_vm2, %v3157_v57  ;;  %v2128_v2 = vrot.slane %v6348_v9, 4  ;;  %v2757_v57 = vsel %vm2676_vm5, %v2754_v41, %v2756_v10 }
 0x31a   : > { %3604 = vmatpush.xpose.msrb.mxu1 %v3550_v47  ;;  %v3545_v47 = vmax.f32 %v3497_v34, 0.0 }
 0x31b   : > { %v2542_v63 = vpop.f32.mrf.mxu2  ;;  %4110 = vmatmul.msk.f32.gmra.mxu3 %vm481_vm2, %v2753_v51  ;;  %v2129_v51 = vsel %vm578_vm0, %v2126_v50, %v2128_v2 }
 0x31c   : > { %v2646_v40 = vadd.f32 %v2542_v63, %v2422_v3  ;;  %v2321_v58 = vpop.f32.mrf.mxu1  ;;  %v2758_v3 = vrot.slane %v6350_v37, 5 }
 0x31d   : > { %v3358_v42 = vpop.f32.mrf.mxu0  ;;  %v2423_v52 = vadd.f32 %v2321_v58, %v6347_v24  ;;  %v3544_v58 = vmax.f32 %v3496_v44, 0.0  ;;  %v2760_v24 = vrot.slane %v6352_v38, 5 }
 0x31e   : > { %v3054_v21 = vadd.f32 %v2950_v36, %v2646_v40  ;;  %3605 = vmatpush.xpose.msrb.mxu1 %v3549_v23  ;;  %v2953_v13 = vpop.f32.mrf.mxu3  ;;  %v2130_v23 = vrot.slane %v6350_v37, 4 }
 0x31f   : > { %4010 = vmatmul.msk.f32.gmra.mxu1 %vm481_vm2, %v2121_v49 }
 0x320   : > { %v5881_v5 = vadd.f32 %v3358_v42, %v3054_v21  ;;  %4060 = vmatmul.msk.f32.gmra.mxu2 %vm481_vm2, %v2125_v46  ;;  %4159 = vmatmul.msk.f32.gmra.mxu0 %vm481_vm2, %v3159_v4  ;;  %v2759_v42 = vsel %vm2676_vm5, %v2756_v10, %v2758_v3  ;;  %v3164_v4 = vrot.slane %v6348_v9, 6  ;;  %v2131_v50 = vsel %vm578_vm0, %v2128_v2, %v2130_v23 }
 0x322   : > { %3606 = vmatpush.xpose.msrb.mxu1 %v3548_v25 }
 0x323   : > { %v2545_v49 = vpop.f32.mrf.mxu2  ;;  %4111 = vmatmul.msk.f32.gmra.mxu3 %vm481_vm2, %v2755_v16  ;;  %v3165_v16 = vsel %vm3084_vm6, %v3162_v12, %v3164_v4 }
 0x324   : > { %v2647_v45 = vadd.f32 %v2545_v49, %v2423_v52  ;;  %v2324_v15 = vpop.f32.mrf.mxu1 }
 0x325   : > { %v3361_v55 = vpop.f32.mrf.mxu0  ;;  %v2424_v62 = vadd.f32 %v2324_v15, %v6349_v17  ;;  %v2761_v15 = vsel %vm2676_vm5, %v2758_v3, %v2760_v24 }
 0x326   : > { %v3055_v19 = vadd.f32 %v2953_v13, %v2647_v45  ;;  %3607 = vmatpush.xpose.msrb.mxu1 %v3547_v6  ;;  %v2956_v48 = vpop.f32.mrf.mxu3  ;;  %v2132_v45 = vrot.slane %v6352_v38, 4  ;;  %v3166_v6 = vrot.slane %v6350_v37, 6 }
 0x327   : > { %4011 = vmatmul.msk.f32.gmra.mxu1 %vm481_vm2, %v2123_v22 }
 0x328   : > { %v5898_v54 = vadd.f32 %v3361_v55, %v3055_v19  ;;  %4061 = vmatmul.msk.f32.gmra.mxu2 %vm481_vm2, %v2127_v26  ;;  %4160 = vmatmul.msk.f32.gmra.mxu0 %vm481_vm2, %v3161_v32  ;;  %v6353_v55 = vld [vmem:[#allocation51_spill] sm:$0xff]  ;;  %v3167_v2 = vsel %vm3084_vm6, %v3164_v4, %v3166_v6 }
 0x329   : > { %v6354_v19 = vld [vmem:[#allocation27_spill] sm:$0xff] }
 0x32a   : > { %3608 = vmatpush.xpose.msrb.mxu1 %v3546_v18  ;;  %v2133_v18 = vsel %vm578_vm0, %v2130_v23, %v2132_v45 }
 0x32b   : > { %v2548_v22 = vpop.f32.mrf.mxu2  ;;  %4112 = vmatmul.msk.f32.gmra.mxu3 %vm481_vm2, %v2757_v57  ;;  %v6355_v57 = vld [vmem:[#allocation23_spill] sm:$0xff] }
 0x32c   : > { %v2648_v36 = vadd.f32 %v2548_v22, %v2424_v62  ;;  %v2327_v33 = vpop.f32.mrf.mxu1  ;;  %v2762_v12 = vrot.slane %v6355_v57, 5  ;;  %v2134_v44 = vrot.slane %v6355_v57, 4 }
 0x32d   : > { %v3364_v7 = vpop.f32.mrf.mxu0  ;;  %v2425_v41 = vadd.f32 %v2327_v33, %v6351_v14  ;;  %v3168_v33 = vrot.slane %v6352_v38, 6  ;;  %v3170_v14 = vrot.slane %v6355_v57, 6 }
 0x32e   : > { %v3056_v63 = vadd.f32 %v2956_v48, %v2648_v36  ;;  %3609 = vmatpush.xpose.msrb.mxu1 %v3545_v47  ;;  %v2959_v31 = vpop.f32.mrf.mxu3  ;;  %v2763_v36 = vsel %vm2676_vm5, %v2760_v24, %v2762_v12  ;;  %v2135_v37 = vsel %vm578_vm0, %v2132_v45, %v2134_v44 }
 0x32f   : > { %4012 = vmatmul.msk.f32.gmra.mxu1 %vm481_vm2, %v2125_v46  ;;  %v3169_v3 = vsel %vm3084_vm6, %v3166_v6, %v3168_v33  ;;  %v6358_v6 = vld [vmem:[#allocation60_spill] sm:$0xff] }
 0x330   : > { %v5915_v40 = vadd.f32 %v3364_v7, %v3056_v63  ;;  %4062 = vmatmul.msk.f32.gmra.mxu2 %vm481_vm2, %v2129_v51  ;;  %4161 = vmatmul.msk.f32.gmra.mxu0 %vm481_vm2, %v3163_v61  ;;  %v6356_v63 = vld [vmem:[#allocation25_spill] sm:$0xff] }
 0x331   : > { %v3172_v24 = vrot.slane %v6356_v63, 6 }
 0x332   : > { %3610 = vmatpush.xpose.msrb.mxu1 %v3544_v58 }
 0x333   : > { %v2551_v46 = vpop.f32.mrf.mxu2  ;;  %4113 = vmatmul.msk.f32.gmra.mxu3 %vm481_vm2, %v2759_v42  ;;  %v2136_v42 = vrot.slane %v6356_v63, 4 }
 0x334   : > { %v2649_v21 = vadd.f32 %v2551_v46, %v2425_v41  ;;  %v2330_v13 = vpop.f32.mrf.mxu1 }
 0x335   : > { %v3367_v25 = vpop.f32.mrf.mxu0  ;;  %v2426_v32 = vadd.f32 %v2330_v13, %v6353_v55  ;;  %v3171_v13 = vsel %vm3084_vm6, %v3168_v33, %v3170_v14  ;;  %v2768_v55 = vrot.slane %v6358_v6, 5 }
 0x336   : > { %v3057_v52 = vadd.f32 %v2959_v31, %v2649_v21  ;;  %3611 = vmatpush.xpose.msrb.mxu1 %v3543_v53  ;;  %v2962_v49 = vpop.f32.mrf.mxu3  ;;  %v2764_v31 = vrot.slane %v6356_v63, 5  ;;  %v2137_v21 = vsel %vm578_vm0, %v2134_v44, %v2136_v42  ;;  %v6357_v53 = vld [vmem:[#allocation59_spill] sm:$0xff]  ;;  %v277_v44 = vld [vmem:[%s4381_s25 + $0xd0] sm:$0xf] }
 0x337   : > { %4013 = vmatmul.msk.f32.gmra.mxu1 %vm481_vm2, %v2127_v26 }
 0x338   : > { %v5930_v0 = vadd.f32 %v3367_v25, %v3057_v52  ;;  %4063 = vmatmul.msk.f32.gmra.mxu2 %vm481_vm2, %v2131_v50  ;;  %4162 = vmatmul.msk.f32.gmra.mxu0 %vm481_vm2, %v3165_v16  ;;  %v2765_v4 = vsel %vm2676_vm5, %v2762_v12, %v2764_v31  ;;  %v2766_v25 = vrot.slane %v6357_v53, 5  ;;  %v2138_v16 = vrot.slane %v6357_v53, 4 }
 0x33a   : > { %3612 = vmatpush.xpose.msrb.mxu1 %v3542_v11  ;;  %v2767_v38 = vsel %vm2676_vm5, %v2764_v31, %v2766_v25  ;;  %v2139_v45 = vsel %vm578_vm0, %v2136_v42, %v2138_v16 }
 0x33b   : > { %v2554_v9 = vpop.f32.mrf.mxu2  ;;  %4114 = vmatmul.msk.f32.gmra.mxu3 %vm481_vm2, %v2761_v15  ;;  %v3173_v15 = vsel %vm3084_vm6, %v3170_v14, %v3172_v24 }
 0x33c   : > { %v2650_v10 = vadd.f32 %v2554_v9, %v2426_v32  ;;  %v2333_v26 = vpop.f32.mrf.mxu1  ;;  %v2140_v9 = vrot.slane %v6358_v6, 4 }
 0x33d   : > { %v2427_v48 = vadd.f32 %v2333_v26, %v6354_v19  ;;  %v3370_v34 = vpop.f32.mrf.mxu0  ;;  %v3174_v26 = vrot.slane %v6357_v53, 6 }
 0x33e   : > { %v3058_v17 = vadd.f32 %v2962_v49, %v2650_v10  ;;  %v2965_v62 = vpop.f32.mrf.mxu3  ;;  %v2769_v10 = vsel %vm2676_vm5, %v2766_v25, %v2768_v55  ;;  %v2141_v57 = vsel %vm578_vm0, %v2138_v16, %v2140_v9 }
 0x33f   : > { %4014 = vmatmul.msk.f32.gmra.mxu1 %vm481_vm2, %v2129_v51  ;;  %v3175_v12 = vsel %vm3084_vm6, %v3172_v24, %v3174_v26  ;;  %v6359_v24 = vld [vmem:[#allocation37_spill] sm:$0xff] }
 0x340   : > { %v5944_v22 = vadd.f32 %v3370_v34, %v3058_v17  ;;  %4064 = vmatmul.msk.f32.gmra.mxu2 %vm481_vm2, %v2133_v18  ;;  %4163 = vmatmul.msk.f32.gmra.mxu0 %vm481_vm2, %v3167_v2 }
 0x343   : > { %v2557_v47 = vpop.f32.mrf.mxu2  ;;  %4115 = vmatmul.msk.f32.gmra.mxu3 %vm481_vm2, %v2763_v36 }
 0x344   : > { %v2651_v7 = vadd.f32 %v2557_v47, %v2427_v48  ;;  %v5951_v61 = vpop.f32.mrf.mxu1  ;;  %v4319_v48 = vld [vmem:[%s4381_s25 + $0xc8] sm:$0xff]   ;;  %v3176_v47 = vrot.slane %v6358_v6, 6 }
 0x345   : > { %v3373_v51 = vpop.f32.mrf.mxu0  ;;  %v4276_v34 = vunpack.c.h.bf16 %v4319_v48 }
 0x346   : > { %v3059_v20 = vadd.f32 %v2965_v62, %v2651_v7  ;;  %v5958_v58 = vpop.f32.mrf.mxu3  ;;  %v3177_v31 = vsel %vm3084_vm6, %v3174_v26, %v3176_v47 }
 0x347   : > { %4015 = vmatmul.msk.f32.gmra.mxu1 %vm481_vm2, %v2131_v50  ;;  %v2770_v17 = vrot.slane %v4276_v34, 5  ;;  %v2454_v36 = vrot.slane %v4276_v34, 4 }
 0x348   : > { %v5960_v23 = vadd.f32 %v3373_v51, %v3059_v20  ;;  %4065 = vmatmul.msk.f32.gmra.mxu2 %vm481_vm2, %v2135_v37  ;;  %4164 = vmatmul.msk.f32.gmra.mxu0 %vm481_vm2, %v3169_v3  ;;  %v330_v51 = vunpack.c.l.bf16 %v277_v44 }
 0x349   : > { %v2771_v33 = vsel %vm2676_vm5, %v2768_v55, %v2770_v17  ;;  %v2455_v63 = vsel %vm578_vm0, %v2140_v9, %v2454_v36  ;;  %v6360_v9 = vld [vmem:[#allocation35_spill] sm:$0xff] }
 0x34a   : > { %v2772_v20 = vrot.slane %v330_v51, 5  ;;  %v3180_v55 = vrot.slane %v330_v51, 6 }
 0x34b   : > { %v5967_v41 = vpop.f32.mrf.mxu2  ;;  %4116 = vmatmul.msk.f32.gmra.mxu3 %vm481_vm2, %v2765_v4  ;;  %v2456_v4 = vrot.slane %v330_v51, 4 }
 0x34c   : > { %v5969_v46 = vpop.f32.mrf.mxu1  ;;  %v2773_v14 = vsel %vm2676_vm5, %v2770_v17, %v2772_v20 }
 0x34d   : > { %v5972_v35 = vpop.f32.mrf.mxu0  ;;  %v2457_v16 = vsel %vm578_vm0, %v2454_v36, %v2456_v4  ;;  %v6361_v36 = vld [vmem:[#allocation33_spill] sm:$0xff] }
 0x34e   : > { %v5978_v50 = vpop.f32.mrf.mxu3 }
 0x34f   : > { %4016 = vmatmul.msk.f32.gmra.mxu1 %vm481_vm2, %v2133_v18 }
 0x350   : > { %4066 = vmatmul.msk.f32.gmra.mxu2 %vm481_vm2, %v2137_v21  ;;  %4165 = vmatmul.msk.f32.gmra.mxu0 %vm481_vm2, %v3171_v13 }
 0x353   : > { %v5985_v52 = vpop.f32.mrf.mxu2  ;;  %4117 = vmatmul.msk.f32.gmra.mxu3 %vm481_vm2, %v2767_v38 }
 0x354   : > { %v5987_v49 = vpop.f32.mrf.mxu1 }
 0x355   : > { %v5990_v11 = vpop.f32.mrf.mxu0 }
 0x356   : > { %v5996_v32 = vpop.f32.mrf.mxu3 }
 0x357   : > { %4017 = vmatmul.msk.f32.gmra.mxu1 %vm481_vm2, %v2135_v37 }
 0x358   : > { %4067 = vmatmul.msk.f32.gmra.mxu2 %vm481_vm2, %v2139_v45  ;;  %4166 = vmatmul.msk.f32.gmra.mxu0 %vm481_vm2, %v3173_v15 }
 0x35b   : > { %v2566_v19 = vpop.f32.mrf.mxu2  ;;  %4118 = vmatmul.msk.f32.gmra.mxu3 %vm481_vm2, %v2769_v10 }
 0x35c   : > { %v2345_v18 = vpop.f32.mrf.mxu1 }
 0x35d   : > { %v6005_v2 = vpop.f32.mrf.mxu0  ;;  %v2431_v10 = vadd.f32 %v2345_v18, %v6360_v9 }
 0x35e   : > { %v2977_v62 = vpop.f32.mrf.mxu3 }
 0x35f   : > { %4018 = vmatmul.msk.f32.gmra.mxu1 %vm481_vm2, %v2137_v21  ;;  %v3178_v21 = vrot.slane %v4276_v34, 6 }
 0x360   : > { %4068 = vmatmul.msk.f32.gmra.mxu2 %vm481_vm2, %v2141_v57  ;;  %4167 = vmatmul.msk.f32.gmra.mxu0 %vm481_vm2, %v3175_v12 }
 0x361   : > { %v3179_v38 = vsel %vm3084_vm6, %v3176_v47, %v3178_v21 }
 0x363   : > { %v2569_v7 = vpop.f32.mrf.mxu2  ;;  %4119 = vmatmul.msk.f32.gmra.mxu3 %vm481_vm2, %v2771_v33  ;;  %v2430_v33 = vadd.f32 %v5987_v49, %v6361_v36 }
 0x364   : > { %v2348_v37 = vpop.f32.mrf.mxu1  ;;  %v2655_v34 = vadd.f32 %v2569_v7, %v2431_v10 }
 0x365   : > { %v3385_v3 = vpop.f32.mrf.mxu0  ;;  %v2654_v20 = vadd.f32 %v2566_v19, %v2430_v33 }
 0x366   : > { %v2980_v42 = vpop.f32.mrf.mxu3  ;;  %v3063_v4 = vadd.f32 %v2977_v62, %v2655_v34 }
 0x367   : > { %4019 = vmatmul.msk.f32.gmra.mxu1 %vm481_vm2, %v2139_v45  ;;  %v2432_v45 = vadd.f32 %v2348_v37, %v6359_v24 }
 0x368   : > { %4069 = vmatmul.msk.f32.gmra.mxu2 %vm481_vm2, %v2455_v63  ;;  %4168 = vmatmul.msk.f32.gmra.mxu0 %vm481_vm2, %v3177_v31  ;;  %v3181_v63 = vsel %vm3084_vm6, %v3178_v21, %v3180_v55 }
 0x36b   : > { %v2572_v13 = vpop.f32.mrf.mxu2  ;;  %4120 = vmatmul.msk.f32.gmra.mxu3 %vm481_vm2, %v2773_v14 }
 0x36c   : > { %v2351_v53 = vpop.f32.mrf.mxu1  ;;  %v2656_v6 = vadd.f32 %v2572_v13, %v2432_v45  ;;  %v3062_v13 = vadd.f32 %v5996_v32, %v2654_v20  ;;  %v6365_v45 = vld [vmem:[#allocation12_spill] sm:$0xff] }
 0x36d   : > { %v3388_v25 = vpop.f32.mrf.mxu0  ;;  %v2433_v26 = vadd.f32 %v2351_v53, %v5352_v43  ;;  %v6363_v43 = vld [vmem:[#allocation31_spill] sm:$0xff] }
 0x36e   : > { %v2983_v15 = vpop.f32.mrf.mxu3  ;;  %v3064_v12 = vadd.f32 %v2980_v42, %v2656_v6  ;;  %v2429_v7 = vadd.f32 %v5969_v46, %v6363_v43 }
 0x36f   : > { %4020 = vmatmul.msk.f32.gmra.mxu1 %vm481_vm2, %v2141_v57  ;;  %v6362_v57 = vld [vmem:[#allocation10_spill] sm:$0xff] }
 0x370   : > { %4070 = vmatmul.msk.f32.gmra.mxu2 %vm481_vm2, %v2457_v16  ;;  %4169 = vmatmul.msk.f32.gmra.mxu0 %vm481_vm2, %v3179_v38  ;;  %v3472_v18 = vadd.f32 %v3388_v25, %v3064_v12  ;;  %v2653_v49 = vadd.f32 %v5985_v52, %v2429_v7  ;;  %v3471_v16 = vadd.f32 %v3385_v3, %v3063_v4  ;;  %v6364_v25 = vld [vmem:[#allocation29_spill] sm:$0xff] }
 0x371   : > { %v2428_v24 = vadd.f32 %v5951_v61, %v6364_v25  ;;  %v3470_v3 = vadd.f32 %v6005_v2, %v3062_v13 }
 0x372   : > { %v3524_v21 = vadd.f32 %v5786_v60, %v3472_v18  ;;  %v3061_v52 = vadd.f32 %v5978_v50, %v2653_v49  ;;  %v3523_v9 = vadd.f32 %v5786_v60, %v3471_v16  ;;  %v6366_v50 = vld [vmem:[#allocation5_spill] sm:$0xff]  ;;  %v6367_v18 = vld [vmem:[#allocation8_spill] sm:$0xff]  ;;  %v3518_v16 = vadd.f32 %v5786_v60, %v5944_v22 }
 0x373   : > { %v2575_v48 = vpop.f32.mrf.mxu2  ;;  %v2652_v55 = vadd.f32 %v5967_v41, %v2428_v24  ;;  %v3522_v12 = vadd.f32 %v5786_v60, %v3470_v3  ;;  %v3516_v22 = vadd.f32 %v5786_v60, %v5915_v40  ;;  %v3514_v40 = vadd.f32 %v5786_v60, %v5881_v5 }
 0x374   : > { %v2657_v17 = vadd.f32 %v2575_v48, %v2433_v26  ;;  %v2354_v44 = vpop.f32.mrf.mxu1  ;;  %v3572_v10 = vmax.f32 %v3524_v21, 0.0  ;;  %v3469_v34 = vadd.f32 %v5990_v11, %v3061_v52  ;;  %v3512_v5 = vadd.f32 %v5786_v60, %v5847_v1 }
 0x375   : > { %v2434_v47 = vadd.f32 %v2354_v44, %v6362_v57  ;;  %v3391_v37 = vpop.f32.mrf.mxu0  ;;  %v3060_v61 = vadd.f32 %v5958_v58, %v2652_v55  ;;  %v3510_v1 = vadd.f32 %v5786_v60, %v5812_v56 }
 0x376   : > { %v3065_v31 = vadd.f32 %v2983_v15, %v2657_v17  ;;  %v2986_v51 = vpop.f32.mrf.mxu3  ;;  %v3571_v17 = vmax.f32 %v3523_v9, 0.0  ;;  %v6369_v9 = vld [vmem:[#allocation14_spill] sm:$0xff] }
 0x378   : > { %v3473_v14 = vadd.f32 %v3391_v37, %v3065_v31  ;;  %4170 = vmatmul.msk.f32.gmra.mxu0 %vm481_vm2, %v3181_v63  ;;  %v3521_v37 = vadd.f32 %v5786_v60, %v3469_v34  ;;  %v3570_v63 = vmax.f32 %v3522_v12, 0.0 }
 0x37a   : > { %v3525_v42 = vadd.f32 %v5786_v60, %v3473_v14  ;;  %v3569_v20 = vmax.f32 %v3521_v37, 0.0 }
 0x37b   : > { %v2578_v53 = vpop.f32.mrf.mxu2 }
 0x37c   : > { %v3573_v19 = vmax.f32 %v3525_v42, 0.0  ;;  %v2658_v38 = vadd.f32 %v2578_v53, %v2434_v47  ;;  %v2357_v62 = vpop.f32.mrf.mxu1  ;;  %v3468_v47 = vadd.f32 %v5972_v35, %v3060_v61  ;;  %v3519_v35 = vadd.f32 %v5786_v60, %v5960_v23 }
 0x37d   : > { %v2435_v15 = vadd.f32 %v2357_v62, %v6365_v45  ;;  %v3394_v6 = vpop.f32.mrf.mxu0  ;;  %v6368_v62 = vld [vmem:[#allocation39_spill] sm:$0xff]  ;;  %v3517_v23 = vadd.f32 %v5786_v60, %v5930_v0  ;;  %v3515_v0 = vadd.f32 %v5786_v60, %v5898_v54  ;;  %v3513_v54 = vadd.f32 %v5786_v60, %v5864_v28 }
 0x37e   : > { %v3066_v46 = vadd.f32 %v2986_v51, %v2658_v38  ;;  %3617 = vmatpush.xpose.msrb.mxu2 %v3573_v19  ;;  %v2989_v32 = vpop.f32.mrf.mxu3  ;;  %v3520_v31 = vadd.f32 %v5786_v60, %v3468_v47  ;;  %v3567_v21 = vmax.f32 %v3519_v35, 0.0  ;;  %v3511_v28 = vadd.f32 %v5786_v60, %v5831_v59 }
 0x37f   : > { %v3565_v3 = vmax.f32 %v3517_v23, 0.0  ;;  %v3558_v59 = vmax.f32 %v3510_v1, 0.0 }
 0x380   : > { %v6049_v26 = vadd.f32 %v3394_v6, %v3066_v46  ;;  %v3568_v49 = vmax.f32 %v3520_v31, 0.0  ;;  %v3566_v6 = vmax.f32 %v3518_v16, 0.0 }
 0x382   : > { %3618 = vmatpush.xpose.msrb.mxu2 %v3572_v10 }
 0x383   : > { %v2581_v48 = vpop.f32.mrf.mxu2 }
 0x384   : > { %v2659_v41 = vadd.f32 %v2581_v48, %v2435_v15  ;;  %v2360_v44 = vpop.f32.mrf.mxu1 }
 0x385   : > { %v2436_v36 = vadd.f32 %v2360_v44, %v6366_v50  ;;  %v3397_v33 = vpop.f32.mrf.mxu0 }
 0x386   : > { %v3067_v2 = vadd.f32 %v2989_v32, %v2659_v41  ;;  %3619 = vmatpush.xpose.msrb.mxu2 %v3571_v17  ;;  %v2992_v57 = vpop.f32.mrf.mxu3  ;;  %v3564_v17 = vmax.f32 %v3516_v22, 0.0 }
 0x388   : > { %v6057_v58 = vadd.f32 %v3397_v33, %v3067_v2  ;;  %v6370_v33 = vld [vmem:[#allocation41_spill] sm:$0xff] }
 0x38a   : > { %3620 = vmatpush.xpose.msrb.mxu2 %v3570_v63 }
 0x38b   : > { %v2584_v11 = vpop.f32.mrf.mxu2 }
 0x38c   : > { %v2660_v51 = vadd.f32 %v2584_v11, %v2436_v36  ;;  %v2363_v4 = vpop.f32.mrf.mxu1  ;;  %v3563_v36 = vmax.f32 %v3515_v0, 0.0  ;;  %v3562_v11 = vmax.f32 %v3514_v40, 0.0 }
 0x38d   : > { %v2437_v14 = vadd.f32 %v2363_v4, %v6367_v18  ;;  %v3400_v43 = vpop.f32.mrf.mxu0  ;;  %v3561_v4 = vmax.f32 %v3513_v54, 0.0  ;;  %v6371_v18 = vld [vmem:[#allocation16_spill] sm:$0xff] }
 0x38e   : > { %v3068_v7 = vadd.f32 %v2992_v57, %v2660_v51  ;;  %3621 = vmatpush.xpose.msrb.mxu2 %v3569_v20  ;;  %v2995_v42 = vpop.f32.mrf.mxu3 }
 0x390   : > { %v6063_v13 = vadd.f32 %v3400_v43, %v3068_v7 }
 0x392   : > { %3622 = vmatpush.xpose.msrb.mxu2 %v3568_v49  ;;  %v3560_v49 = vmax.f32 %v3512_v5, 0.0 }
 0x393   : > { %v2587_v53 = vpop.f32.mrf.mxu2 }
 0x394   : > { %v2661_v19 = vadd.f32 %v2587_v53, %v2437_v14  ;;  %v2366_v38 = vpop.f32.mrf.mxu1 }
 0x395   : > { %v2438_v25 = vadd.f32 %v2366_v38, %v6368_v62  ;;  %v3403_v24 = vpop.f32.mrf.mxu0  ;;  %v6372_v38 = vld [vmem:[#allocation44_spill] sm:$0xff] }
 0x396   : > { %v3069_v45 = vadd.f32 %v2995_v42, %v2661_v19  ;;  %3623 = vmatpush.xpose.msrb.mxu2 %v3567_v21  ;;  %v2998_v15 = vpop.f32.mrf.mxu3  ;;  %v3559_v19 = vmax.f32 %v3511_v28, 0.0 }
 0x398   : > { %v6070_v46 = vadd.f32 %v3403_v24, %v3069_v45 }
 0x39a   : > { %3624 = vmatpush.xpose.msrb.mxu2 %v3566_v6 }
 0x39b   : > { %v2590_v55 = vpop.f32.mrf.mxu2 }
 0x39c   : > { %v2662_v52 = vadd.f32 %v2590_v55, %v2438_v25  ;;  %v2369_v32 = vpop.f32.mrf.mxu1 }
 0x39d   : > { %v2439_v10 = vadd.f32 %v2369_v32, %v6369_v9  ;;  %v3406_v61 = vpop.f32.mrf.mxu0 }
 0x39e   : > { %v3070_v48 = vadd.f32 %v2998_v15, %v2662_v52  ;;  %3625 = vmatpush.xpose.msrb.mxu2 %v3565_v3  ;;  %v3001_v34 = vpop.f32.mrf.mxu3 }
 0x3a0   : > { %v6077_v12 = vadd.f32 %v3406_v61, %v3070_v48 }
 0x3a2   : > { %3626 = vmatpush.xpose.msrb.mxu2 %v3564_v17 }
 0x3a3   : > { %v2593_v41 = vpop.f32.mrf.mxu2 }
 0x3a4   : > { %v2663_v44 = vadd.f32 %v2593_v41, %v2439_v10  ;;  %v2372_v50 = vpop.f32.mrf.mxu1 }
 0x3a5   : > { %v2440_v2 = vadd.f32 %v2372_v50, %v6370_v33  ;;  %v3409_v57 = vpop.f32.mrf.mxu0 }
 0x3a6   : > { %v3071_v47 = vadd.f32 %v3001_v34, %v2663_v44  ;;  %3627 = vmatpush.xpose.msrb.mxu2 %v3563_v36  ;;  %v3004_v37 = vpop.f32.mrf.mxu3 }
 0x3a8   : > { %v6084_v63 = vadd.f32 %v3409_v57, %v3071_v47 }
 0x3aa   : > { %3628 = vmatpush.xpose.msrb.mxu2 %v3562_v11 }
 0x3ab   : > { %v2596_v31 = vpop.f32.mrf.mxu2 }
 0x3ac   : > { %v2664_v20 = vadd.f32 %v2596_v31, %v2440_v2  ;;  %v2375_v51 = vpop.f32.mrf.mxu1 }
 0x3ad   : > { %v2441_v14 = vadd.f32 %v2375_v51, %v6371_v18  ;;  %v3412_v43 = vpop.f32.mrf.mxu0 }
 0x3ae   : > { %v3072_v7 = vadd.f32 %v3004_v37, %v2664_v20  ;;  %3629 = vmatpush.xpose.msrb.mxu2 %v3561_v4  ;;  %v3007_v42 = vpop.f32.mrf.mxu3 }
 0x3b0   : > { %v6091_v35 = vadd.f32 %v3412_v43, %v3072_v7 }
 0x3b2   : > { %3630 = vmatpush.xpose.msrb.mxu2 %v3560_v49 }
 0x3b3   : > { %v2599_v53 = vpop.f32.mrf.mxu2 }
 0x3b4   : > { %v2665_v16 = vadd.f32 %v2599_v53, %v2441_v14  ;;  %v2378_v21 = vpop.f32.mrf.mxu1 }
 0x3b5   : > { %v2442_v62 = vadd.f32 %v2378_v21, %v6372_v38  ;;  %v3415_v25 = vpop.f32.mrf.mxu0 }
 0x3b6   : > { %v3073_v24 = vadd.f32 %v3007_v42, %v2665_v16  ;;  %3631 = vmatpush.xpose.msrb.mxu2 %v3559_v19  ;;  %v3010_v45 = vpop.f32.mrf.mxu3 }
 0x3b8   : > { %v6096_v15 = vadd.f32 %v3415_v25, %v3073_v24 }
 0x3ba   : > { %3632 = vmatpush.xpose.msrb.mxu2 %v3558_v59 }
 0x3bb   : > { %v2602_v23 = vpop.f32.mrf.mxu2 }
 0x3bc   : > { %v2666_v6 = vadd.f32 %v2602_v23, %v2442_v62  ;;  %v2381_v55 = vpop.f32.mrf.mxu1 }
 0x3bd   : > { %v2443_v22 = vadd.f32 %v2381_v55, %v5484_v39  ;;  %v3418_v52 = vpop.f32.mrf.mxu0 }
 0x3be   : > { %v3074_v60 = vadd.f32 %v3010_v45, %v2666_v6  ;;  %v3013_v56 = vpop.f32.mrf.mxu3 }
 0x3c0   : > { %v6099_v32 = vadd.f32 %v3418_v52, %v3074_v60  ;;  %v6374_v52 = vld [vmem:[#allocation18_spill] sm:$0xff] }
 0x3c3   : > { %v2605_v3 = vpop.f32.mrf.mxu2 }
 0x3c4   : > { %v2667_v9 = vadd.f32 %v2605_v3, %v2443_v22  ;;  %v2384_v10 = vpop.f32.mrf.mxu1 }
 0x3c5   : > { %v3421_v61 = vpop.f32.mrf.mxu0  ;;  %v2444_v60 = vadd.f32 %v2384_v10, %v6374_v52 }
 0x3c6   : > { %v3075_v48 = vadd.f32 %v3013_v56, %v2667_v9  ;;  %v3016_v34 = vpop.f32.mrf.mxu3 }
 0x3c8   : > { %v6101_v0 = vadd.f32 %v3421_v61, %v3075_v48 }
 0x3cb   : > { %v2608_v17 = vpop.f32.mrf.mxu2 }
 0x3cc   : > { %v2387_v41 = vpop.f32.mrf.mxu1 }
 0x3cd   : > { %v3424_v40 = vpop.f32.mrf.mxu0 }
 0x3ce   : > { %v3019_v44 = vpop.f32.mrf.mxu3 }
 0x3d3   : > { %v2611_v50 = vpop.f32.mrf.mxu2 }
 0x3d4   : > { %v2390_v36 = vpop.f32.mrf.mxu1 }
 0x3d5   : > { %v3427_v39 = vpop.f32.mrf.mxu0  ;;  %v2446_v21 = vadd.f32 %v2390_v36, %v5523_v29  ;;  %v2668_v29 = vadd.f32 %v2608_v17, %v2444_v60 }
 0x3d6   : > { %v3022_v33 = vpop.f32.mrf.mxu3 }
 0x3d7   : > { %v3076_v48 = vadd.f32 %v3016_v34, %v2668_v29 }
 0x3db   : > { %v2614_v2 = vpop.f32.mrf.mxu2 }
 0x3dc   : > { %v2393_v57 = vpop.f32.mrf.mxu1  ;;  %v2670_v38 = vadd.f32 %v2614_v2, %v2446_v21 }
 0x3dd   : > { %v3430_v47 = vpop.f32.mrf.mxu0  ;;  %v2447_v43 = vadd.f32 %v2393_v57, %v5536_v30  ;;  %v4320_v30 = vld [vmem:[%s6137_s2] ss:$0 sm:$0xff]  ;;  %v3484_v57 = vadd.f32 %v3424_v40, %v3076_v48 }
 0x3de   : > { %v3025_v37 = vpop.f32.mrf.mxu3  ;;  %v3078_v23 = vadd.f32 %v3022_v33, %v2670_v38  ;;  %v3535_v10 = vadd.f32 %v4320_v30, %v6101_v0  ;;  %v3533_v34 = vadd.f32 %v4320_v30, %v6096_v15  ;;  %v3590_v40 = vld [vmem:[%s6138_s3] sm:$0xff]  ;;  %v3531_v15 = vadd.f32 %v4320_v30, %v6084_v63 }
 0x3df   : > { %3633 = vmatmul.f32.vlgmr.msrb.gmra.mxu2 %v3590_v40  ;;  %3613 = vmatmul.f32.vlgmr.msrb.gmra.mxu1 %v3590_v40  ;;  %v3591_v0 = vld [vmem:[%s6139_s4] sm:$0xff]  ;;  %v3526_v63 = vadd.f32 %v4320_v30, %v6049_v26 }
 0x3e0   : > { %v3486_v3 = vadd.f32 %v3430_v47, %v3078_v23  ;;  %v3583_v47 = vmax.f32 %v3535_v10, 0.0 }
 0x3e2   : > { %v3538_v36 = vadd.f32 %v4320_v30, %v3486_v3 }
 0x3e3   : > { %v2617_v54 = vpop.f32.mrf.mxu2 }
 0x3e4   : > { %v2396_v11 = vpop.f32.mrf.mxu1  ;;  %v2671_v49 = vadd.f32 %v2617_v54, %v2447_v43  ;;  %v3586_v33 = vmax.f32 %v3538_v36, 0.0  ;;  %v3527_v43 = vadd.f32 %v4320_v30, %v6057_v58 }
 0x3e5   : > { %v3433_v31 = vpop.f32.mrf.mxu0  ;;  %v2448_v4 = vadd.f32 %v2396_v11, %v5549_v8  ;;  %v6373_v8 = vld [vmem:[#allocation47_spill] sm:$0xff]  ;;  %v3532_v11 = vadd.f32 %v4320_v30, %v6091_v35  ;;  %v3529_v35 = vadd.f32 %v4320_v30, %v6070_v46 }
 0x3e6   : > { %v3028_v5 = vpop.f32.mrf.mxu3  ;;  %v3079_v62 = vadd.f32 %v3025_v37, %v2671_v49  ;;  %v2445_v45 = vadd.f32 %v2387_v41, %v6373_v8  ;;  %v3536_v37 = vadd.f32 %v4320_v30, %v3484_v57 }
 0x3e8   : > { %v2669_v59 = vadd.f32 %v2611_v50, %v2445_v45  ;;  %v3487_v6 = vadd.f32 %v3433_v31, %v3079_v62  ;;  %v3584_v17 = vmax.f32 %v3536_v37, 0.0  ;;  %v3581_v31 = vmax.f32 %v3533_v34, 0.0 }
 0x3ea   : > { %v3077_v56 = vadd.f32 %v3019_v44, %v2669_v59  ;;  %v3539_v9 = vadd.f32 %v4320_v30, %v3487_v6  ;;  %v3534_v44 = vadd.f32 %v4320_v30, %v6099_v32  ;;  %v4329_v32 = vmov 0  }
 0x3eb   : > { %v2620_v20 = vpop.f32.mrf.mxu2  ;;  %4316 = vset.pattern.permute.xlu0 %v4329_v32 }
 0x3ec   : > { %v2399_v18 = vpop.f32.mrf.mxu1  ;;  %v2672_v14 = vadd.f32 %v2620_v20, %v2448_v4  ;;  %v3485_v41 = vadd.f32 %v3427_v39, %v3077_v56  ;;  %v3587_v2 = vmax.f32 %v3539_v9, 0.0  ;;  %v3582_v39 = vmax.f32 %v3534_v44, 0.0  ;;  %3594 = vperm.xlu0 %4316, %v3591_v0  }
 0x3ed   : > { %v3436_v51 = vpop.f32.mrf.mxu0  ;;  %v2449_v7 = vadd.f32 %v2399_v18, %v5562_v27  ;;  %v3530_v20 = vadd.f32 %v4320_v30, %v6077_v12  ;;  %v3528_v18 = vadd.f32 %v4320_v30, %v6063_v13  ;;  %v3574_v12 = vmax.f32 %v3526_v63, 0.0 }
 0x3ee   : > { %v3031_v28 = vpop.f32.mrf.mxu3  ;;  %v3080_v53 = vadd.f32 %v3028_v5, %v2672_v14  ;;  %v3537_v50 = vadd.f32 %v4320_v30, %v3485_v41  ;;  %v3580_v5 = vmax.f32 %v3532_v11, 0.0  ;;  %v3577_v14 = vmax.f32 %v3529_v35, 0.0 }
 0x3ef   : > { %v3578_v4 = vmax.f32 %v3530_v20, 0.0 }
 0x3f0   : > { %v3488_v25 = vadd.f32 %v3436_v51, %v3080_v53  ;;  %v3585_v54 = vmax.f32 %v3537_v50, 0.0  ;;  %v3579_v51 = vmax.f32 %v3531_v15, 0.0 }
 0x3f2   : > { %v3540_v55 = vadd.f32 %v4320_v30, %v3488_v25 }
 0x3f3   : > { %v2623_v42 = vpop.f32.mrf.mxu2 }
 0x3f4   : > { %v2673_v1 = vadd.f32 %v2623_v42, %v2449_v7  ;;  %v3588_v61 = vmax.f32 %v3540_v55, 0.0  ;;  %v3576_v7 = vmax.f32 %v3528_v18, 0.0  ;;  %v3575_v42 = vmax.f32 %v3527_v43, 0.0 }
 0x3f5   : > { %v3439_v16 = vpop.f32.mrf.mxu0 }
 0x3f6   : > { %v3081_v19 = vadd.f32 %v3031_v28, %v2673_v1 }
 0x3f8   : > { %v3489_v24 = vadd.f32 %v3439_v16, %v3081_v19 }
 0x3fa   : > { %v3541_v27 = vadd.f32 %v4320_v30, %v3489_v24 }
 0x3fc   : > { %v3589_v22 = vmax.f32 %v3541_v27, 0.0 }
 0x3fe   : > { %3637 = vmatpush.xpose.msrb.mxu3 %v3589_v22 }
 0x402   : > { %3638 = vmatpush.xpose.msrb.mxu3 %v3588_v61 }
 0x406   : > { %3639 = vmatpush.xpose.msrb.mxu3 %v3587_v2 }
 0x40a   : > { %3640 = vmatpush.xpose.msrb.mxu3 %v3586_v33 }
 0x40e   : > { %3641 = vmatpush.xpose.msrb.mxu3 %v3585_v54 }
 0x412   : > { %3642 = vmatpush.xpose.msrb.mxu3 %v3584_v17 }
 0x416   : > { %3643 = vmatpush.xpose.msrb.mxu3 %v3583_v47 }
 0x41a   : > { %3644 = vmatpush.xpose.msrb.mxu3 %v3582_v39 }
 0x41e   : > { %3645 = vmatpush.xpose.msrb.mxu3 %v3581_v31 }
 0x422   : > { %3646 = vmatpush.xpose.msrb.mxu3 %v3580_v5 }
 0x426   : > { %3647 = vmatpush.xpose.msrb.mxu3 %v3579_v51 }
 0x42a   : > { %3648 = vmatpush.xpose.msrb.mxu3 %v3578_v4 }
 0x42e   : > { %3649 = vmatpush.xpose.msrb.mxu3 %v3577_v14 }
 0x432   : > { %3650 = vmatpush.xpose.msrb.mxu3 %v3576_v7 }
 0x436   : > { %3651 = vmatpush.xpose.msrb.mxu3 %v3575_v42 }
 0x43a   : > { %3652 = vmatpush.xpose.msrb.mxu3 %v3574_v12 }
 0x43d   : > { %3653 = vmatmul.f32.vlgmr.msrb.gmra.mxu3 %v3590_v40 }
 0x45c   : > { %v3614_v13 = vpop.f32.mrf.mxu1 }
 0x45e   : > { %v3595_v28 = vpop.permute.xlu0 %3594 }
 0x45f   : > { %v3615_v46 = vadd.f32 %v3614_v13, %v3595_v28 }
 0x461   : > { %3657 = vst [vmem:[%s224_s30] sm:$0xff] %v3615_v46 }
 0x462   : > { %v3634_v49 = vpop.f32.mrf.mxu2 }
 0x463   : > { %v3635_v58 = vadd.f32 %v3634_v49, %v3595_v28 }
 0x465   : > { %3658 = vst [vmem:[%s224_s30 + $0x8] sm:$0xff] %v3635_v58 }
 0x4c0   : > { %v3654_v53 = vpop.f32.mrf.mxu3 }
 0x4c1   : > { %v3655_v1 = vadd.f32 %v3654_v53, %v3595_v28 }
 0x4c3   : > { %3659 = vst [vmem:[%s224_s30 + $0x10] sm:$0xff] %v3655_v1 }
 0x4c4 PF: > { %s15_s18 = sadd.s32 1, %s4327_s18  }
 0x4c5   : > { %p12_p4 = scmp.ge.s32.totalorder %s15_s18, 4  }
 0x4c7   :  { %14 = sbr.rel (!%p12_p4) target bundleno = 1 (0x1), region = 78 }

</bundles_post_ra>
